<compile_context>
chip_gen: v6e
topology: v6e:2x2x1
jax: 0.10.0
libtpu: 0.0.40
codegen_flags: <defaults>
</compile_context>

<pallas_src>
import functools

import jax
import jax.numpy as jnp
from jax.experimental import pallas as pl
from jax.experimental.pallas import tpu as pltpu


SNP_NUMBER = 64
SNP_H1, SNP_FEAT = 32, 16          # SNP branch:   64 -> 32 -> 16
CONV_CH, IMG_FEAT = 8, 16          # image branch: Cin -> 8 conv, GAP, 8 -> 16
NUM_CLASSES = 2                    # fusion head:  (16 + 16) -> 2


def _round_up(x, m):
    return -(-x // m) * m


# ---------------------------------------------------------------------------
# Packed-parameter layout: every weight/bias lives in ONE (rows, width) f32
# array at an 8-aligned row offset, sliced in-kernel with static views.
# ---------------------------------------------------------------------------
def _param_layout(img_channels):
    width = max(SNP_NUMBER, 9 * img_channels)
    off, row = {}, 0

    def take(name, rows):
        nonlocal row
        off[name] = row
        row += _round_up(rows, 8)

    take("snp_w1_t", SNP_H1)          # (32, 64)
    take("snp_w2_t", SNP_FEAT)        # (16, 32)
    take("img_w_t", IMG_FEAT)         # (16, 8)  (1/(H*W) GAP norm folded in)
    take("head_ws_t", NUM_CLASSES)    # (2, 16)
    take("head_wi_t", NUM_CLASSES)    # (2, 16)
    take("conv_w_oc", CONV_CH)        # (8, 9*C)
    take("snp_b1", SNP_H1)            # (32, 1)
    take("snp_b2", SNP_FEAT)          # (16, 1)
    take("conv_b", CONV_CH)           # (8, 1)
    take("img_b", IMG_FEAT)           # (16, 1)
    take("head_b", NUM_CLASSES)       # (2, 1)
    return off, row, width


def _pack_params(params, img_channels, hw):
    off, rows, width = _param_layout(img_channels)
    k9 = 9 * img_channels
    buf = jnp.zeros((rows, width), jnp.float32)

    def put(b, name, mat):
        mat = jnp.asarray(mat, jnp.float32)
        return b.at[off[name]:off[name] + mat.shape[0], :mat.shape[1]].set(mat)

    buf = put(buf, "snp_w1_t", params["snp_w1"].T)
    buf = put(buf, "snp_w2_t", params["snp_w2"].T)
    buf = put(buf, "img_w_t", (params["img_w"] / hw).T)        # fold GAP 1/(H*W)
    buf = put(buf, "head_ws_t", params["head_w"][:SNP_FEAT].T)
    buf = put(buf, "head_wi_t", params["head_w"][SNP_FEAT:].T)
    buf = put(buf, "conv_w_oc", params["conv_w"].reshape(k9, CONV_CH).T)
    buf = put(buf, "snp_b1", params["snp_b1"].reshape(-1, 1))
    buf = put(buf, "snp_b2", params["snp_b2"].reshape(-1, 1))
    buf = put(buf, "conv_b", params["conv_b"].reshape(-1, 1))
    buf = put(buf, "img_b", params["img_b"].reshape(-1, 1))
    buf = put(buf, "head_b", params["head_b"].reshape(-1, 1))
    return buf


# ---------------------------------------------------------------------------
# Fully fused per-image forward kernel (one grid step == one batch element)
# ---------------------------------------------------------------------------
def _fused_forward_kernel(img_ref,            # (H+2, C, W+2)  halo-padded image
                          snps_ref,           # (64, 1)        SNP column vector
                          prm_ref,            # (rows, width)  packed params
                          out_ref,            # (2, 1)         logits column
                          *, h, w, c, off):
    f32 = jnp.float32
    k9 = 9 * c

    def prm(name, rows, cols):
        r0 = off[name]
        return prm_ref[r0:r0 + rows, 0:cols]

    # -- 3x3 'same' conv: 9 shifted views of the VMEM image, each a
    #    rows-batched MXU matmul contracting the C input channels (in-kernel
    #    im2col: HBM sees only the raw padded image). ------------------------
    w_oc = prm("conv_w_oc", CONV_CH, k9).astype(img_ref.dtype)       # (8, 9C)
    lhs = jnp.broadcast_to(w_oc, (h, CONV_CH, k9))                   # hoisted
    conv = jnp.zeros((h, CONV_CH, w), f32)
    for di in range(3):
        for dj in range(3):
            k0 = (di * 3 + dj) * c
            slab = img_ref[di:di + h, :, dj:dj + w]                  # (h, C, w)
            conv += jnp.einsum("hoc,hcw->how", lhs[:, :, k0:k0 + c], slab,
                               preferred_element_type=f32)
    conv = jnp.maximum(conv + prm("conv_b", CONV_CH, 1), 0.0)        # bias+ReLU

    # -- global average pool (plain sums; 1/(H*W) pre-folded into img_w_t) ---
    pooled = jnp.sum(jnp.sum(conv, axis=0), axis=1, keepdims=True)   # (8, 1)

    img_feat = jnp.maximum(
        jnp.dot(prm("img_w_t", IMG_FEAT, CONV_CH), pooled,
                preferred_element_type=f32) + prm("img_b", IMG_FEAT, 1), 0.0)

    # -- SNP branch (column-vector oriented: no transposes anywhere) ---------
    sv = snps_ref[...]                                                # (64, 1)
    s1 = jnp.maximum(
        jnp.dot(prm("snp_w1_t", SNP_H1, SNP_NUMBER), sv,
                preferred_element_type=f32) + prm("snp_b1", SNP_H1, 1), 0.0)
    s2 = jnp.maximum(
        jnp.dot(prm("snp_w2_t", SNP_FEAT, SNP_H1), s1,
                preferred_element_type=f32) + prm("snp_b2", SNP_FEAT, 1), 0.0)

    # -- fused concat + head: [s, img] @ W == W[:16]^T s + W[16:]^T img ------
    y = (jnp.dot(prm("head_ws_t", NUM_CLASSES, SNP_FEAT), s2,
                 preferred_element_type=f32)
         + jnp.dot(prm("head_wi_t", NUM_CLASSES, IMG_FEAT), img_feat,
                   preferred_element_type=f32)
         + prm("head_b", NUM_CLASSES, 1))
    out_ref[...] = y.astype(out_ref.dtype)


# ---------------------------------------------------------------------------
# Parameters (canonical layouts, as the PyTorch module would hold them)
# ---------------------------------------------------------------------------
def init_params(key, img_channels):
    ks = jax.random.split(key, 10)
    s = 0.1

    def w(k, shape):
        return (s * jax.random.normal(k, shape)).astype(jnp.float32)

    return {
        "snp_w1": w(ks[0], (SNP_NUMBER, SNP_H1)),
        "snp_b1": w(ks[1], (SNP_H1,)),
        "snp_w2": w(ks[2], (SNP_H1, SNP_FEAT)),
        "snp_b2": w(ks[3], (SNP_FEAT,)),
        "conv_w": w(ks[4], (3, 3, img_channels, CONV_CH)),   # (kh, kw, Cin, Cout)
        "conv_b": w(ks[5], (CONV_CH,)),
        "img_w": w(ks[6], (CONV_CH, IMG_FEAT)),
        "img_b": w(ks[7], (IMG_FEAT,)),
        "head_w": w(ks[8], (SNP_FEAT + IMG_FEAT, NUM_CLASSES)),
        "head_b": w(ks[9], (NUM_CLASSES,)),
    }


# ---------------------------------------------------------------------------
# Forward (one pallas_call; grid over batch, "parallel" -> v7x megacore)
# ---------------------------------------------------------------------------
def snp_image_net_forward(params, snps, image_nchw, *, conv_dtype=jnp.bfloat16):
    """snps: (B, 64) f32; image_nchw: (B, C, H, W) f32 (PyTorch layout)."""
    B, C, H, W = image_nchw.shape
    HW = H * W
    Hp, Wp = H + 2, W + 2

    # One fused XLA pass: NCHW -> (B, H+2, C, W+2) halo-padded, conv dtype.
    x = jnp.transpose(image_nchw, (0, 2, 1, 3))           # (B, H, C, W)
    x = jnp.pad(x, ((0, 0), (1, 1), (0, 0), (1, 1)))      # (B, Hp, C, Wp)
    x = x.astype(conv_dtype)

    snps3 = snps.astype(jnp.float32)[:, :, None]           # (B, 64, 1)
    packed = _pack_params(params, C, HW)
    off, rows, width = _param_layout(C)

    kernel = functools.partial(_fused_forward_kernel, h=H, w=W, c=C, off=off)

    flops = 2 * B * (HW * 9 * C * CONV_CH
                     + SNP_NUMBER * SNP_H1 + SNP_H1 * SNP_FEAT
                     + CONV_CH * IMG_FEAT
                     + (SNP_FEAT + IMG_FEAT) * NUM_CLASSES)
    bytes_accessed = (x.size * x.dtype.itemsize + snps3.size * 4
                      + packed.size * 4 + B * NUM_CLASSES * 4)

    out3 = pl.pallas_call(
        kernel,
        out_shape=jax.ShapeDtypeStruct((B, NUM_CLASSES, 1), jnp.float32),
        grid=(B,),
        in_specs=[
            pl.BlockSpec((None, Hp, C, Wp), lambda b: (b, 0, 0, 0)),   # image
            pl.BlockSpec((None, SNP_NUMBER, 1), lambda b: (b, 0, 0)),  # snps
            pl.BlockSpec((rows, width), lambda b: (0, 0)),             # params
        ],
        out_specs=pl.BlockSpec((None, NUM_CLASSES, 1), lambda b: (b, 0, 0)),
        compiler_params=pltpu.CompilerParams(
            dimension_semantics=("parallel",)),
        cost_estimate=pl.CostEstimate(flops=flops, transcendentals=0,
                                      bytes_accessed=bytes_accessed),
    )(x, snps3, packed)
    return out3.reshape(B, NUM_CLASSES)


# ---------------------------------------------------------------------------
# Pure-JAX reference (for correctness checking only)
# ---------------------------------------------------------------------------
def snp_image_net_forward_ref(params, snps, image_nchw):
    s = jax.nn.relu(snps @ params["snp_w1"] + params["snp_b1"])
    s = jax.nn.relu(s @ params["snp_w2"] + params["snp_b2"])
    x = jnp.transpose(image_nchw, (0, 2, 3, 1))
    conv = jax.lax.conv_general_dilated(
        x, params["conv_w"], window_strides=(1, 1), padding=((1, 1), (1, 1)),
        dimension_numbers=("NHWC", "HWIO", "NHWC"))
    conv = jax.nn.relu(conv + params["conv_b"])
    pooled = conv.mean(axis=(1, 2))
    img_feat = jax.nn.relu(pooled @ params["img_w"] + params["img_b"])
    fused = jnp.concatenate([s, img_feat], axis=-1)
    return fused @ params["head_w"] + params["head_b"]


# ---------------------------------------------------------------------------
if __name__ == "__main__":
    key = jax.random.PRNGKey(0)
    k_p, k_s, k_i = jax.random.split(key, 3)

    B, C, H, W = 2, 4, 16, 16
    snps = jax.random.normal(k_s, (B, SNP_NUMBER), dtype=jnp.float32)
    image = jax.random.normal(k_i, (B, C, H, W), dtype=jnp.float32)   # NCHW

    params = init_params(k_p, C)

    fwd = jax.jit(snp_image_net_forward)
    y = fwd(params, snps, image)
    jax.block_until_ready(y)
    assert y.shape == (B, NUM_CLASSES) and y.dtype == jnp.float32

    y_ref = snp_image_net_forward_ref(params, snps, image)
    assert jnp.allclose(y, y_ref, atol=2e-2, rtol=2e-2), (y, y_ref)

    print("KERNEL_OK")
</pallas_src>

<mosaic_0001>
module attributes {stable_mosaic.version = 11 : i64} {
  func.func @_fused_forward_kernel(%arg0: i32, %arg1: memref<1x18x4x18xbf16, #tpu.memory_space<vmem>>, %arg2: memref<1x64x1xf32, #tpu.memory_space<vmem>>, %arg3: memref<168x64xf32, #tpu.memory_space<vmem>>, %arg4: memref<1x2x1xf32, #tpu.memory_space<vmem>>) attributes {dimension_semantics = [#tpu.dimension_semantics<parallel>], iteration_bounds = array<i64: 2>, scalar_prefetch = 0 : i64, scratch_operands = 0 : i64, tpu.core_type = #tpu.core_type<tc>, window_params = [{transform_indices = @transform_0, window_bounds = array<i64: 1, 18, 4, 18>}, {transform_indices = @transform_1, window_bounds = array<i64: 1, 64, 1>}, {pipeline_mode = #tpu.pipeline_mode<synchronous>, transform_indices = @transform_2, window_bounds = array<i64: 168, 64>}, {transform_indices = @transform_3, window_bounds = array<i64: 1, 2, 1>}]} {
    %c80 = arith.constant 80 : index
    %c0 = arith.constant 0 : index
    %0 = vector.load %arg3[%c80, %c0] : memref<168x64xf32, #tpu.memory_space<vmem>>, vector<8x36xf32>
    %1 = arith.truncf %0 : vector<8x36xf32> to vector<8x36xbf16>
    %2 = vector.shape_cast %1 : vector<8x36xbf16> to vector<1x8x36xbf16>
    %3 = vector.broadcast %2 : vector<1x8x36xbf16> to vector<16x8x36xbf16>
    %cst = arith.constant 0.000000e+00 : f32
    %4 = vector.broadcast %cst : f32 to vector<16x8x16xf32>
    %c0_0 = arith.constant 0 : index
    %c0_1 = arith.constant 0 : index
    %c0_2 = arith.constant 0 : index
    %c0_3 = arith.constant 0 : index
    %5 = vector.load %arg1[%c0_0, %c0_1, %c0_2, %c0_3] : memref<1x18x4x18xbf16, #tpu.memory_space<vmem>>, vector<1x16x4x16xbf16>
    %6 = vector.shape_cast %5 : vector<1x16x4x16xbf16> to vector<16x4x16xbf16>
    %7 = vector.extract_strided_slice %3 {offsets = [0, 0, 0], sizes = [16, 8, 4], strides = [1, 1, 1]} : vector<16x8x36xbf16> to vector<16x8x4xbf16>
    "tpu.trace_start"() <{level = 10 : i32, message = "hoc,hcw->how"}> : () -> ()
    %cst_4 = arith.constant dense<0.000000e+00> : vector<16x8x16xf32>
    %8 = tpu.matmul %7, %6, %cst_4 {dimension_numbers = #tpu.dot_dimension_numbers<[2], [1], [1], [2], [0, 0, 0, 1, 1, 2], [0], [0]>} : vector<16x8x4xbf16>, vector<16x4x16xbf16>, vector<16x8x16xf32> -> vector<16x8x16xf32>
    "tpu.trace_stop"() : () -> ()
    %9 = arith.addf %4, %8 : vector<16x8x16xf32>
    %c0_5 = arith.constant 0 : index
    %c0_6 = arith.constant 0 : index
    %c0_7 = arith.constant 0 : index
    %c1 = arith.constant 1 : index
    %10 = vector.load %arg1[%c0_5, %c0_6, %c0_7, %c1] : memref<1x18x4x18xbf16, #tpu.memory_space<vmem>>, vector<1x16x4x16xbf16>
    %11 = vector.shape_cast %10 : vector<1x16x4x16xbf16> to vector<16x4x16xbf16>
    %12 = vector.extract_strided_slice %3 {offsets = [0, 0, 4], sizes = [16, 8, 4], strides = [1, 1, 1]} : vector<16x8x36xbf16> to vector<16x8x4xbf16>
    "tpu.trace_start"() <{level = 10 : i32, message = "hoc,hcw->how"}> : () -> ()
    %cst_8 = arith.constant dense<0.000000e+00> : vector<16x8x16xf32>
    %13 = tpu.matmul %12, %11, %cst_8 {dimension_numbers = #tpu.dot_dimension_numbers<[2], [1], [1], [2], [0, 0, 0, 1, 1, 2], [0], [0]>} : vector<16x8x4xbf16>, vector<16x4x16xbf16>, vector<16x8x16xf32> -> vector<16x8x16xf32>
    "tpu.trace_stop"() : () -> ()
    %14 = arith.addf %9, %13 : vector<16x8x16xf32>
    %c0_9 = arith.constant 0 : index
    %c0_10 = arith.constant 0 : index
    %c0_11 = arith.constant 0 : index
    %c2 = arith.constant 2 : index
    %15 = vector.load %arg1[%c0_9, %c0_10, %c0_11, %c2] : memref<1x18x4x18xbf16, #tpu.memory_space<vmem>>, vector<1x16x4x16xbf16>
    %16 = vector.shape_cast %15 : vector<1x16x4x16xbf16> to vector<16x4x16xbf16>
    %17 = vector.extract_strided_slice %3 {offsets = [0, 0, 8], sizes = [16, 8, 4], strides = [1, 1, 1]} : vector<16x8x36xbf16> to vector<16x8x4xbf16>
    "tpu.trace_start"() <{level = 10 : i32, message = "hoc,hcw->how"}> : () -> ()
    %cst_12 = arith.constant dense<0.000000e+00> : vector<16x8x16xf32>
    %18 = tpu.matmul %17, %16, %cst_12 {dimension_numbers = #tpu.dot_dimension_numbers<[2], [1], [1], [2], [0, 0, 0, 1, 1, 2], [0], [0]>} : vector<16x8x4xbf16>, vector<16x4x16xbf16>, vector<16x8x16xf32> -> vector<16x8x16xf32>
    "tpu.trace_stop"() : () -> ()
    %19 = arith.addf %14, %18 : vector<16x8x16xf32>
    %c0_13 = arith.constant 0 : index
    %c1_14 = arith.constant 1 : index
    %c0_15 = arith.constant 0 : index
    %c0_16 = arith.constant 0 : index
    %20 = vector.load %arg1[%c0_13, %c1_14, %c0_15, %c0_16] : memref<1x18x4x18xbf16, #tpu.memory_space<vmem>>, vector<1x16x4x16xbf16>
    %21 = vector.shape_cast %20 : vector<1x16x4x16xbf16> to vector<16x4x16xbf16>
    %22 = vector.extract_strided_slice %3 {offsets = [0, 0, 12], sizes = [16, 8, 4], strides = [1, 1, 1]} : vector<16x8x36xbf16> to vector<16x8x4xbf16>
    "tpu.trace_start"() <{level = 10 : i32, message = "hoc,hcw->how"}> : () -> ()
    %cst_17 = arith.constant dense<0.000000e+00> : vector<16x8x16xf32>
    %23 = tpu.matmul %22, %21, %cst_17 {dimension_numbers = #tpu.dot_dimension_numbers<[2], [1], [1], [2], [0, 0, 0, 1, 1, 2], [0], [0]>} : vector<16x8x4xbf16>, vector<16x4x16xbf16>, vector<16x8x16xf32> -> vector<16x8x16xf32>
    "tpu.trace_stop"() : () -> ()
    %24 = arith.addf %19, %23 : vector<16x8x16xf32>
    %c0_18 = arith.constant 0 : index
    %c1_19 = arith.constant 1 : index
    %c0_20 = arith.constant 0 : index
    %c1_21 = arith.constant 1 : index
    %25 = vector.load %arg1[%c0_18, %c1_19, %c0_20, %c1_21] : memref<1x18x4x18xbf16, #tpu.memory_space<vmem>>, vector<1x16x4x16xbf16>
    %26 = vector.shape_cast %25 : vector<1x16x4x16xbf16> to vector<16x4x16xbf16>
    %27 = vector.extract_strided_slice %3 {offsets = [0, 0, 16], sizes = [16, 8, 4], strides = [1, 1, 1]} : vector<16x8x36xbf16> to vector<16x8x4xbf16>
    "tpu.trace_start"() <{level = 10 : i32, message = "hoc,hcw->how"}> : () -> ()
    %cst_22 = arith.constant dense<0.000000e+00> : vector<16x8x16xf32>
    %28 = tpu.matmul %27, %26, %cst_22 {dimension_numbers = #tpu.dot_dimension_numbers<[2], [1], [1], [2], [0, 0, 0, 1, 1, 2], [0], [0]>} : vector<16x8x4xbf16>, vector<16x4x16xbf16>, vector<16x8x16xf32> -> vector<16x8x16xf32>
    "tpu.trace_stop"() : () -> ()
    %29 = arith.addf %24, %28 : vector<16x8x16xf32>
    %c0_23 = arith.constant 0 : index
    %c1_24 = arith.constant 1 : index
    %c0_25 = arith.constant 0 : index
    %c2_26 = arith.constant 2 : index
    %30 = vector.load %arg1[%c0_23, %c1_24, %c0_25, %c2_26] : memref<1x18x4x18xbf16, #tpu.memory_space<vmem>>, vector<1x16x4x16xbf16>
    %31 = vector.shape_cast %30 : vector<1x16x4x16xbf16> to vector<16x4x16xbf16>
    %32 = vector.extract_strided_slice %3 {offsets = [0, 0, 20], sizes = [16, 8, 4], strides = [1, 1, 1]} : vector<16x8x36xbf16> to vector<16x8x4xbf16>
    "tpu.trace_start"() <{level = 10 : i32, message = "hoc,hcw->how"}> : () -> ()
    %cst_27 = arith.constant dense<0.000000e+00> : vector<16x8x16xf32>
    %33 = tpu.matmul %32, %31, %cst_27 {dimension_numbers = #tpu.dot_dimension_numbers<[2], [1], [1], [2], [0, 0, 0, 1, 1, 2], [0], [0]>} : vector<16x8x4xbf16>, vector<16x4x16xbf16>, vector<16x8x16xf32> -> vector<16x8x16xf32>
    "tpu.trace_stop"() : () -> ()
    %34 = arith.addf %29, %33 : vector<16x8x16xf32>
    %c0_28 = arith.constant 0 : index
    %c2_29 = arith.constant 2 : index
    %c0_30 = arith.constant 0 : index
    %c0_31 = arith.constant 0 : index
    %35 = vector.load %arg1[%c0_28, %c2_29, %c0_30, %c0_31] : memref<1x18x4x18xbf16, #tpu.memory_space<vmem>>, vector<1x16x4x16xbf16>
    %36 = vector.shape_cast %35 : vector<1x16x4x16xbf16> to vector<16x4x16xbf16>
    %37 = vector.extract_strided_slice %3 {offsets = [0, 0, 24], sizes = [16, 8, 4], strides = [1, 1, 1]} : vector<16x8x36xbf16> to vector<16x8x4xbf16>
    "tpu.trace_start"() <{level = 10 : i32, message = "hoc,hcw->how"}> : () -> ()
    %cst_32 = arith.constant dense<0.000000e+00> : vector<16x8x16xf32>
    %38 = tpu.matmul %37, %36, %cst_32 {dimension_numbers = #tpu.dot_dimension_numbers<[2], [1], [1], [2], [0, 0, 0, 1, 1, 2], [0], [0]>} : vector<16x8x4xbf16>, vector<16x4x16xbf16>, vector<16x8x16xf32> -> vector<16x8x16xf32>
    "tpu.trace_stop"() : () -> ()
    %39 = arith.addf %34, %38 : vector<16x8x16xf32>
    %c0_33 = arith.constant 0 : index
    %c2_34 = arith.constant 2 : index
    %c0_35 = arith.constant 0 : index
    %c1_36 = arith.constant 1 : index
    %40 = vector.load %arg1[%c0_33, %c2_34, %c0_35, %c1_36] : memref<1x18x4x18xbf16, #tpu.memory_space<vmem>>, vector<1x16x4x16xbf16>
    %41 = vector.shape_cast %40 : vector<1x16x4x16xbf16> to vector<16x4x16xbf16>
    %42 = vector.extract_strided_slice %3 {offsets = [0, 0, 28], sizes = [16, 8, 4], strides = [1, 1, 1]} : vector<16x8x36xbf16> to vector<16x8x4xbf16>
    "tpu.trace_start"() <{level = 10 : i32, message = "hoc,hcw->how"}> : () -> ()
    %cst_37 = arith.constant dense<0.000000e+00> : vector<16x8x16xf32>
    %43 = tpu.matmul %42, %41, %cst_37 {dimension_numbers = #tpu.dot_dimension_numbers<[2], [1], [1], [2], [0, 0, 0, 1, 1, 2], [0], [0]>} : vector<16x8x4xbf16>, vector<16x4x16xbf16>, vector<16x8x16xf32> -> vector<16x8x16xf32>
    "tpu.trace_stop"() : () -> ()
    %44 = arith.addf %39, %43 : vector<16x8x16xf32>
    %c0_38 = arith.constant 0 : index
    %c2_39 = arith.constant 2 : index
    %c0_40 = arith.constant 0 : index
    %c2_41 = arith.constant 2 : index
    %45 = vector.load %arg1[%c0_38, %c2_39, %c0_40, %c2_41] : memref<1x18x4x18xbf16, #tpu.memory_space<vmem>>, vector<1x16x4x16xbf16>
    %46 = vector.shape_cast %45 : vector<1x16x4x16xbf16> to vector<16x4x16xbf16>
    %47 = vector.extract_strided_slice %3 {offsets = [0, 0, 32], sizes = [16, 8, 4], strides = [1, 1, 1]} : vector<16x8x36xbf16> to vector<16x8x4xbf16>
    "tpu.trace_start"() <{level = 10 : i32, message = "hoc,hcw->how"}> : () -> ()
    %cst_42 = arith.constant dense<0.000000e+00> : vector<16x8x16xf32>
    %48 = tpu.matmul %47, %46, %cst_42 {dimension_numbers = #tpu.dot_dimension_numbers<[2], [1], [1], [2], [0, 0, 0, 1, 1, 2], [0], [0]>} : vector<16x8x4xbf16>, vector<16x4x16xbf16>, vector<16x8x16xf32> -> vector<16x8x16xf32>
    "tpu.trace_stop"() : () -> ()
    %49 = arith.addf %44, %48 : vector<16x8x16xf32>
    %c136 = arith.constant 136 : index
    %c0_43 = arith.constant 0 : index
    %50 = vector.load %arg3[%c136, %c0_43] : memref<168x64xf32, #tpu.memory_space<vmem>>, vector<8x1xf32>
    %51 = vector.shape_cast %50 : vector<8x1xf32> to vector<1x8x1xf32>
    %52 = vector.broadcast %51 : vector<1x8x1xf32> to vector<16x8x16xf32>
    %53 = arith.addf %49, %52 : vector<16x8x16xf32>
    %cst_44 = arith.constant 0.000000e+00 : f32
    %54 = vector.broadcast %cst_44 : f32 to vector<16x8x16xf32>
    %55 = arith.maximumf %53, %54 : vector<16x8x16xf32>
    %cst_45 = arith.constant dense<0.000000e+00> : vector<8x16xf32>
    %56 = vector.multi_reduction <add>, %55, %cst_45 [0] : vector<16x8x16xf32> to vector<8x16xf32>
    %cst_46 = arith.constant dense<0.000000e+00> : vector<8xf32>
    %57 = vector.multi_reduction <add>, %56, %cst_46 [1] : vector<8x16xf32> to vector<8xf32>
    %58 = vector.shape_cast %57 : vector<8xf32> to vector<8x1xf32>
    %c48 = arith.constant 48 : index
    %c0_47 = arith.constant 0 : index
    %59 = vector.load %arg3[%c48, %c0_47] : memref<168x64xf32, #tpu.memory_space<vmem>>, vector<16x8xf32>
    %cst_48 = arith.constant dense<0.000000e+00> : vector<16x1xf32>
    %60 = tpu.matmul %59, %58, %cst_48 {dimension_numbers = #tpu.dot_dimension_numbers<[1], [0], [0], [1], [0, 0, 1, 1], [], []>} : vector<16x8xf32>, vector<8x1xf32>, vector<16x1xf32> -> vector<16x1xf32>
    %c144 = arith.constant 144 : index
    %c0_49 = arith.constant 0 : index
    %61 = vector.load %arg3[%c144, %c0_49] : memref<168x64xf32, #tpu.memory_space<vmem>>, vector<16x1xf32>
    %62 = arith.addf %60, %61 : vector<16x1xf32>
    %cst_50 = arith.constant 0.000000e+00 : f32
    %63 = vector.broadcast %cst_50 : f32 to vector<16x1xf32>
    %64 = arith.maximumf %62, %63 : vector<16x1xf32>
    %c0_51 = arith.constant 0 : index
    %c0_52 = arith.constant 0 : index
    %c0_53 = arith.constant 0 : index
    %65 = vector.load %arg2[%c0_51, %c0_52, %c0_53] : memref<1x64x1xf32, #tpu.memory_space<vmem>>, vector<1x64x1xf32>
    %66 = vector.shape_cast %65 : vector<1x64x1xf32> to vector<64x1xf32>
    %c0_54 = arith.constant 0 : index
    %c0_55 = arith.constant 0 : index
    %67 = vector.load %arg3[%c0_54, %c0_55] : memref<168x64xf32, #tpu.memory_space<vmem>>, vector<32x64xf32>
    %cst_56 = arith.constant dense<0.000000e+00> : vector<32x1xf32>
    %68 = tpu.matmul %67, %66, %cst_56 {dimension_numbers = #tpu.dot_dimension_numbers<[1], [0], [0], [1], [0, 0, 1, 1], [], []>} : vector<32x64xf32>, vector<64x1xf32>, vector<32x1xf32> -> vector<32x1xf32>
    %c88 = arith.constant 88 : index
    %c0_57 = arith.constant 0 : index
    %69 = vector.load %arg3[%c88, %c0_57] : memref<168x64xf32, #tpu.memory_space<vmem>>, vector<32x1xf32>
    %70 = arith.addf %68, %69 : vector<32x1xf32>
    %cst_58 = arith.constant 0.000000e+00 : f32
    %71 = vector.broadcast %cst_58 : f32 to vector<32x1xf32>
    %72 = arith.maximumf %70, %71 : vector<32x1xf32>
    %c32 = arith.constant 32 : index
    %c0_59 = arith.constant 0 : index
    %73 = vector.load %arg3[%c32, %c0_59] : memref<168x64xf32, #tpu.memory_space<vmem>>, vector<16x32xf32>
    %cst_60 = arith.constant dense<0.000000e+00> : vector<16x1xf32>
    %74 = tpu.matmul %73, %72, %cst_60 {dimension_numbers = #tpu.dot_dimension_numbers<[1], [0], [0], [1], [0, 0, 1, 1], [], []>} : vector<16x32xf32>, vector<32x1xf32>, vector<16x1xf32> -> vector<16x1xf32>
    %c120 = arith.constant 120 : index
    %c0_61 = arith.constant 0 : index
    %75 = vector.load %arg3[%c120, %c0_61] : memref<168x64xf32, #tpu.memory_space<vmem>>, vector<16x1xf32>
    %76 = arith.addf %74, %75 : vector<16x1xf32>
    %cst_62 = arith.constant 0.000000e+00 : f32
    %77 = vector.broadcast %cst_62 : f32 to vector<16x1xf32>
    %78 = arith.maximumf %76, %77 : vector<16x1xf32>
    %c64 = arith.constant 64 : index
    %c0_63 = arith.constant 0 : index
    %79 = vector.load %arg3[%c64, %c0_63] : memref<168x64xf32, #tpu.memory_space<vmem>>, vector<2x16xf32>
    %cst_64 = arith.constant dense<0.000000e+00> : vector<2x1xf32>
    %80 = tpu.matmul %79, %78, %cst_64 {dimension_numbers = #tpu.dot_dimension_numbers<[1], [0], [0], [1], [0, 0, 1, 1], [], []>} : vector<2x16xf32>, vector<16x1xf32>, vector<2x1xf32> -> vector<2x1xf32>
    %c72 = arith.constant 72 : index
    %c0_65 = arith.constant 0 : index
    %81 = vector.load %arg3[%c72, %c0_65] : memref<168x64xf32, #tpu.memory_space<vmem>>, vector<2x16xf32>
    %cst_66 = arith.constant dense<0.000000e+00> : vector<2x1xf32>
    %82 = tpu.matmul %81, %64, %cst_66 {dimension_numbers = #tpu.dot_dimension_numbers<[1], [0], [0], [1], [0, 0, 1, 1], [], []>} : vector<2x16xf32>, vector<16x1xf32>, vector<2x1xf32> -> vector<2x1xf32>
    %83 = arith.addf %80, %82 : vector<2x1xf32>
    %c160 = arith.constant 160 : index
    %c0_67 = arith.constant 0 : index
    %84 = vector.load %arg3[%c160, %c0_67] : memref<168x64xf32, #tpu.memory_space<vmem>>, vector<2x1xf32>
    %85 = arith.addf %83, %84 : vector<2x1xf32>
    %c0_68 = arith.constant 0 : index
    %c0_69 = arith.constant 0 : index
    %c0_70 = arith.constant 0 : index
    %86 = vector.load %arg4[%c0_68, %c0_69, %c0_70] : memref<1x2x1xf32, #tpu.memory_space<vmem>>, vector<1x2x1xf32>
    %87 = vector.shape_cast %86 : vector<1x2x1xf32> to vector<2x1xf32>
    %88 = vector.shape_cast %85 : vector<2x1xf32> to vector<1x2x1xf32>
    tpu.vector_store %arg4[%c0_68, %c0_69, %c0_70], %88 {strides = array<i32>} : memref<1x2x1xf32, #tpu.memory_space<vmem>>, vector<1x2x1xf32>,
    return
  }
  func.func @transform_0(%arg0: i32) -> (i32, i32, i32, i32) {
    %c0_i32 = arith.constant 0 : i32
    %c0_i32_0 = arith.constant 0 : i32
    %c0_i32_1 = arith.constant 0 : i32
    %c0_i32_2 = arith.constant 0 : i32
    return %arg0, %c0_i32, %c0_i32_0, %c0_i32_1 : i32, i32, i32, i32
  }
  func.func @transform_1(%arg0: i32) -> (i32, i32, i32) {
    %c0_i32 = arith.constant 0 : i32
    %c0_i32_0 = arith.constant 0 : i32
    %c0_i32_1 = arith.constant 0 : i32
    return %arg0, %c0_i32, %c0_i32_0 : i32, i32, i32
  }
  func.func @transform_2(%arg0: i32) -> (i32, i32) {
    %c0_i32 = arith.constant 0 : i32
    %c0_i32_0 = arith.constant 0 : i32
    %c0_i32_1 = arith.constant 0 : i32
    return %c0_i32, %c0_i32_0 : i32, i32
  }
  func.func @transform_3(%arg0: i32) -> (i32, i32, i32) {
    %c0_i32 = arith.constant 0 : i32
    %c0_i32_0 = arith.constant 0 : i32
    %c0_i32_1 = arith.constant 0 : i32
    return %arg0, %c0_i32, %c0_i32_0 : i32, i32, i32
  }
}

</mosaic_0001>

<bundles_post_ra>
// kernel: snp_image_net_forward.1
= control target key start
LH: loop header
LB: loop body
LE: loop exit
PB: predicated region body
PF: predicated region fallthrough
CT: control target
= control target key end

     0   :  { %s9885_s12 = smov 0   ;;  %s11626_s0 = inlined_call_operand.vmem [shape: bf16[2,18,4,18], index: 0, kind: input, shape index: {}]   ;;  %s11627_s1 = inlined_call_operand.vmem [shape: f32[2,64,1], index: 1, kind: input, shape index: {}]   ;;  %s11628_s2 = inlined_call_operand.vmem [shape: f32[168,64], index: 2, kind: input, shape index: {}]   ;;  %s11629_s3 = inlined_call_operand.vmem [shape: f32[2,2,1], index: 3, kind: output, shape index: {}]  }
   0x1 LB: > { %s8232_s13 = sadd.s32 4294967295, %s9850_s12   ;;  %p8236_p0 = scmp.ge.s32.totalorder %s9850_s12, 1  ;;  %s9850_s12 = sphi %s9885_s12, %s13_s12  }
   0x2   : > { %p147_p1 = scmp.lt.s32.totalorder %s9850_s12, 3 }
   0x4   : > { %p148_p2 = pnand %p8236_p0, %p147_p1 }
   0x5   : > { %p175_p3 = scmp.lt.s32.totalorder (!%p148_p2), %s8232_s13, 1  ;;  %s9854_s16 = smov (!%p148_p2), 124  }
   0x6   : > { %151 = sbr.rel (%p148_p2) target bundleno = 1456 (0x5b0), region = 32  ;;  %s9855_s21 = smov (!%p148_p2), 127  }
   0x7   : > { %s9856_s22 = smov (!%p148_p2), 126   ;;  %s9857_s23 = smov (!%p148_p2), 120  }
   0x8   : > { %s9858_s24 = smov (!%p148_p2), 116   ;;  %s9859_s25 = smov (!%p148_p2), 112  }
   0x9   : > { %s9860_s26 = smov (!%p148_p2), 108   ;;  %s9861_s27 = smov (!%p148_p2), 104  }
   0xa   : > { %s9862_s28 = smov (!%p148_p2), 100   ;;  %s9863_s29 = smov (!%p148_p2), 96  }
   0xb   : > { %v190_v0 = vld [vmem:[%s11628_s2 + $0x50] sm:$0xff]  ;;  %v9852_v2 = vmov 0.0   ;;  %vm9853_vm0 = vmmov 0   ;;  %s11631_s13 = smov (!%p175_p3, %s8232_s13), 1  ;;  %vm241_vm1 = vcmask 1041408   ;;  %vm237_vm2 = vcmask 31744  }
   0xc   : > { %v9896_v1 = vpack.c.bf16 %v190_v0, %v190_v0  ;;  %8905 = vmatprep.subr.bf16.mxu0 %v9852_v2  ;;  %8907 = vmatprep.mubr.msk.bf16.mxu0 %vm9853_vm0, %v9852_v2  ;;  %s9821_s17 = smul.u32 36, %s11631_s13  ;;  %s8589_s5 = sshll.u32 %s11631_s13, 6  ;;  %vm7825_vm3 = vcmask 523264   ;;  %vm7686_vm4 = vcmask 130048   ;;  %vm7725_vm5 = vcmask 64512  }
   0xd   : > { %8911 = vmatprep.subr.bf16.mxu1 %v9852_v2  ;;  %8913 = vmatprep.mubr.msk.bf16.mxu1 %vm9853_vm0, %v9852_v2  ;;  %s11377_s8 = scalar_lea.vmem %s11627_s1, %s8589_s5  ;;  %vm7931_vm6 = vcmask 261120   ;;  %vm8165_vm7 = vcmask 1024  }
   0xe   : > { %225 = vrot.lane.b32.xlu1 %v9896_v1, %s9854_s16  ;;  %s9911_s20 = scalar_lea.vmem %s11626_s0, %s9821_s17 }
   0xf   : > { %v8241_v3 = vld.sshfl [vmem:[%s9911_s20] sm:$0x3 pattern:$0x76325410]  ;;  %v193_v54 = vld [vmem:[%s9911_s20 + $0x2] sm:$0x3] }
  0x10   : > { %235 = vrot.lane.b32.xlu0 %v8241_v3, %s9855_s21  ;;  %v8243_v4 = vld.sshfl [vmem:[%s9911_s20 + $0x2] sm:$0x3 pattern:$0x76325410]  ;;  %v192_v52 = vld [vmem:[%s9911_s20] sm:$0x3] }
  0x11   : > { %v9917_v5 = vld.sshfl [vmem:[%s9911_s20 + $0x4] sm:$0x3 pattern:$0x76325410]  ;;  %v1084_v53 = vsel %vm241_vm1, %v192_v52, 0  ;;  %v1127_v55 = vsel %vm241_vm1, %v193_v54, 0 }
  0x12   : > { %346 = vrot.lane.b32.xlu1 %v9917_v5, %s9855_s21  ;;  %v9922_v6 = vld.sshfl [vmem:[%s9911_s20 + $0x8] sm:$0x3 pattern:$0x76325410]  ;;  %v194_v56 = vld [vmem:[%s9911_s20 + $0x4] sm:$0x3] }
  0x13   : > { %v9926_v7 = vld.sshfl [vmem:[%s9911_s20 + $0x6] sm:$0x3 pattern:$0x76325410]  ;;  %v1170_v57 = vsel %vm241_vm1, %v194_v56, 0 }
  0x14   : > { %293 = vrot.lane.b32.xlu0 %v8243_v4, %s9855_s21  ;;  %v9931_v8 = vld.sshfl [vmem:[%s9911_s20 + $0xc] sm:$0x3 pattern:$0x76325410]  ;;  %v195_v58 = vld [vmem:[%s9911_s20 + $0x6] sm:$0x3] }
  0x15   : > { %v9936_v9 = vld.sshfl [vmem:[%s9911_s20 + $0xa] sm:$0x3 pattern:$0x76325410]  ;;  %v1213_v59 = vsel %vm241_vm1, %v195_v58, 0 }
  0x16   : > { %452 = vrot.lane.b32.xlu1 %v9922_v6, %s9855_s21  ;;  %v9941_v10 = vld.sshfl [vmem:[%s9911_s20 + $0x10] sm:$0x3 pattern:$0x76325410]  ;;  %v196_v60 = vld [vmem:[%s9911_s20 + $0x8] sm:$0x3] }
  0x17   : > { %v9946_v11 = vld.sshfl [vmem:[%s9911_s20 + $0xe] sm:$0x3 pattern:$0x76325410]  ;;  %v1256_v62 = vsel %vm241_vm1, %v196_v60, 0 }
  0x18   : > { %399 = vrot.lane.b32.xlu0 %v9926_v7, %s9855_s21  ;;  %v9951_v12 = vld.sshfl [vmem:[%s9911_s20 + $0x14] sm:$0x3 pattern:$0x76325410]  ;;  %v197_v63 = vld [vmem:[%s9911_s20 + $0xa] sm:$0x3] }
  0x19   : > { %v9956_v13 = vld.sshfl [vmem:[%s9911_s20 + $0x12] sm:$0x3 pattern:$0x76325410]  ;;  %v1299_v0 = vsel %vm241_vm1, %v197_v63, 0 }
  0x1a   : > { %558 = vrot.lane.b32.xlu1 %v9931_v8, %s9855_s21  ;;  %v9961_v14 = vld.sshfl [vmem:[%s9911_s20 + $0x18] sm:$0x3 pattern:$0x76325410] }
  0x1b   : > { %v8263_v15 = vld.sshfl [vmem:[%s9911_s20 + $0x16] sm:$0x3 pattern:$0x76325410] }
  0x1c   : > { %505 = vrot.lane.b32.xlu0 %v9936_v9, %s9855_s21  ;;  %v9969_v16 = vld.sshfl [vmem:[%s9911_s20 + $0x1c] sm:$0x3 pattern:$0x76325410] }
  0x1d   : > { %v8267_v17 = vld.sshfl [vmem:[%s9911_s20 + $0x1a] sm:$0x3 pattern:$0x76325410] }
  0x1e   : > { %664 = vrot.lane.b32.xlu1 %v9941_v10, %s9855_s21  ;;  %v8271_v18 = vld.sshfl [vmem:[%s9911_s20 + $0x1e] sm:$0x3 pattern:$0x76325410] }
  0x1f   : > { %v10152_v61 = vld.sshfl [vmem:[%s9911_s20 + $0x20] sm:$0x3 pattern:$0x76325410] }
  0x20   : > { %611 = vrot.lane.b32.xlu0 %v9946_v11, %s9855_s21 }
  0x22   : > { %770 = vrot.lane.b32.xlu1 %v9951_v12, %s9855_s21 }
  0x24   : > { %717 = vrot.lane.b32.xlu0 %v9956_v13, %s9855_s21 }
  0x26   : > { %876 = vrot.lane.b32.xlu1 %v9961_v14, %s9855_s21 }
  0x28   : > { %823 = vrot.lane.b32.xlu0 %v8263_v15, %s9855_s21 }
  0x2a   : > { %982 = vrot.lane.b32.xlu1 %v9969_v16, %s9855_s21 }
  0x2c   : > { %929 = vrot.lane.b32.xlu0 %v8267_v17, %s9855_s21 }
  0x2e   : > { %1797 = vrot.lane.b32.xlu1 %v8241_v3, %s9856_s22  ;;  %v198_v3 = vld [vmem:[%s9911_s20 + $0xc] sm:$0x3] }
  0x30   : > { %1035 = vrot.lane.b32.xlu0 %v8271_v18, %s9855_s21 }
  0x32   : > { %1787 = vrot.lane.b32.xlu1 %v9896_v1, %s9857_s23 }
  0x34   : > { %1853 = vrot.lane.b32.xlu0 %v8243_v4, %s9856_s22 }
  0x36   : > { %1959 = vrot.lane.b32.xlu1 %v9926_v7, %s9856_s22 }
  0x38   : > { %1906 = vrot.lane.b32.xlu0 %v9917_v5, %s9856_s22 }
  0x3a   : > { %2065 = vrot.lane.b32.xlu1 %v9936_v9, %s9856_s22 }
  0x3c   : > { %2012 = vrot.lane.b32.xlu0 %v9922_v6, %s9856_s22 }
  0x3e   : > { %2171 = vrot.lane.b32.xlu1 %v9946_v11, %s9856_s22 }
  0x40   : > { %2118 = vrot.lane.b32.xlu0 %v9931_v8, %s9856_s22 }
  0x42   : > { %2277 = vrot.lane.b32.xlu1 %v9956_v13, %s9856_s22 }
  0x44   : > { %2224 = vrot.lane.b32.xlu0 %v9941_v10, %s9856_s22 }
  0x46   : > { %2383 = vrot.lane.b32.xlu1 %v8263_v15, %s9856_s22 }
  0x48   : > { %2330 = vrot.lane.b32.xlu0 %v9951_v12, %s9856_s22 }
  0x4a   : > { %2489 = vrot.lane.b32.xlu1 %v8267_v17, %s9856_s22 }
  0x4c   : > { %2436 = vrot.lane.b32.xlu0 %v9961_v14, %s9856_s22 }
  0x4e   : > { %2595 = vrot.lane.b32.xlu1 %v8271_v18, %s9856_s22 }
  0x50   : > { %2542 = vrot.lane.b32.xlu0 %v9969_v16, %s9856_s22 }
  0x52   : > { %3408 = vrot.lane.b32.xlu1 %v8243_v4, %s9855_s21 }
  0x54   : > { %2673 = vrot.lane.b32.xlu0 %v9896_v1, %s9858_s24 }
  0x56   : > { %3398 = vrot.lane.b32.xlu1 %v9896_v1, %s9859_s25 }
  0x58   : > { %3464 = vrot.lane.b32.xlu0 %v9917_v5, %s9855_s21 }
  0x5a   : > { %3570 = vrot.lane.b32.xlu1 %v9922_v6, %s9855_s21 }
  0x5c   : > { %3517 = vrot.lane.b32.xlu0 %v9926_v7, %s9855_s21 }
  0x5e   : > { %3676 = vrot.lane.b32.xlu1 %v9931_v8, %s9855_s21 }
  0x60   : > { %3623 = vrot.lane.b32.xlu0 %v9936_v9, %s9855_s21 }
  0x62   : > { %3782 = vrot.lane.b32.xlu1 %v9941_v10, %s9855_s21 }
  0x64   : > { %3729 = vrot.lane.b32.xlu0 %v9946_v11, %s9855_s21 }
  0x66   : > { %3888 = vrot.lane.b32.xlu1 %v9951_v12, %s9855_s21  ;;  %v199_v12 = vld [vmem:[%s9911_s20 + $0xe] sm:$0x3] }
  0x68   : > { %3835 = vrot.lane.b32.xlu0 %v9956_v13, %s9855_s21 }
  0x6a   : > { %3994 = vrot.lane.b32.xlu1 %v9961_v14, %s9855_s21  ;;  %v200_v14 = vld [vmem:[%s9911_s20 + $0x10] sm:$0x3] }
  0x6c   : > { %3941 = vrot.lane.b32.xlu0 %v8263_v15, %s9855_s21  ;;  %v203_v15 = vld [vmem:[%s9911_s20 + $0x16] sm:$0x3] }
  0x6e   : > { %4100 = vrot.lane.b32.xlu1 %v9969_v16, %s9855_s21 }
  0x70   : > { %4047 = vrot.lane.b32.xlu0 %v8267_v17, %s9855_s21  ;;  %v205_v17 = vld [vmem:[%s9911_s20 + $0x1a] sm:$0x3] }
  0x72   : > { %4206 = vrot.lane.b32.xlu1 %v10152_v61, %s9855_s21 }
  0x74   : > { %4153 = vrot.lane.b32.xlu0 %v8271_v18, %s9855_s21  ;;  %v1643_v18 = vsel %vm241_vm1, %v205_v17, 0  ;;  %v8326_v17 = vld [vmem:[%s9911_s20 + $0xc] sm:$0x3] }
  0x76   : > { %4349 = vrot.lane.b32.xlu1 %v9917_v5, %s9856_s22  ;;  %v1385_v5 = vsel %vm241_vm1, %v199_v12, 0 }
  0x78   : > { %4293 = vrot.lane.b32.xlu0 %v8243_v4, %s9856_s22  ;;  %v1342_v4 = vsel %vm241_vm1, %v198_v3, 0 }
  0x7a   : > { %4402 = vrot.lane.b32.xlu1 %v9926_v7, %s9856_s22  ;;  %v1428_v7 = vsel %vm241_vm1, %v200_v14, 0  ;;  %v8324_v14 = vld [vmem:[%s9911_s20 + $0x8] sm:$0x3] }
  0x7c   : > { %4283 = vrot.lane.b32.xlu0 %v9896_v1, %s9860_s26 }
  0x7e   : > { %4508 = vrot.lane.b32.xlu1 %v9936_v9, %s9856_s22 }
  0x80   : > { %v10022_v19 = vpop.permute.xlu1 %225  ;;  %4455 = vrot.lane.b32.xlu0 %v9922_v6, %s9856_s22  ;;  %v201_v6 = vld [vmem:[%s9911_s20 + $0x12] sm:$0x3] }
  0x81   : > { %v1471_v9 = vsel %vm241_vm1, %v201_v6, 0 }
  0x82   : > { %v236_v20 = vpop.permute.xlu0 %235  ;;  %4614 = vrot.lane.b32.xlu1 %v9946_v11, %s9856_s22 }
  0x83   : > { %v243_v21 = vsel %vm241_vm1, %v236_v20, 0  ;;  %v10244_v20 = vld.sshfl [vmem:[%s9911_s20 + $0x14] sm:$0x3 pattern:$0x76325410] }
  0x84   : > { %8906 = vmatpush3.bf16.msra.mxu0 %v243_v21  ;;  %v347_v22 = vpop.permute.xlu1 %346  ;;  %4561 = vrot.lane.b32.xlu0 %v9931_v8, %s9856_s22  ;;  %v202_v8 = vld [vmem:[%s9911_s20 + $0x14] sm:$0x3] }
  0x85   : > { %v349_v23 = vsel %vm241_vm1, %v347_v22, 0  ;;  %8917 = vmatprep.subr.bf16.mxu0 %v9852_v2  ;;  %v1514_v11 = vsel %vm241_vm1, %v202_v8, 0  ;;  %v207_v22 = vld [vmem:[%s9911_s20 + $0x1e] sm:$0x3]  ;;  %v8325_v8 = vld [vmem:[%s9911_s20 + $0xa] sm:$0x3] }
  0x86   : > { %v294_v24 = vpop.permute.xlu0 %293  ;;  %4720 = vrot.lane.b32.xlu1 %v9956_v13, %s9856_s22  ;;  %v204_v13 = vld [vmem:[%s9911_s20 + $0x18] sm:$0x3] }
  0x87   : > { %8908 = vmatmul.mubr.msk.bf16.vlgmr.msra.gmra.mxu0 %vm237_vm2, %v10022_v19  ;;  %v296_v25 = vsel %vm241_vm1, %v294_v24, 0  ;;  %v1600_v16 = vsel %vm241_vm1, %v204_v13, 0  ;;  %v1729_v24 = vsel %vm241_vm1, %v207_v22, 0 }
  0x88   : > { %8912 = vmatpush3.bf16.msra.mxu1 %v296_v25  ;;  %8918 = vmatpush3.bf16.msra.mxu0 %v349_v23  ;;  %v453_v27 = vpop.permute.xlu1 %452  ;;  %v10256_v23 = vld.sshfl [vmem:[%s9911_s20 + $0x16] sm:$0x3 pattern:$0x76325410] }
  0x89   : > { %8919 = vmatprep.mubr.msk.bf16.mxu0 %vm9853_vm0, %v9852_v2  ;;  %8923 = vmatprep.subr.bf16.mxu1 %v9852_v2  ;;  %v455_v29 = vsel %vm241_vm1, %v453_v27, 0 }
  0x8a   : > { %v400_v26 = vpop.permute.xlu0 %399  ;;  %8929 = vmatprep.subr.bf16.mxu0 %v9852_v2  ;;  %4667 = vrot.lane.b32.xlu0 %v9941_v10, %s9856_s22  ;;  %v1557_v10 = vsel %vm241_vm1, %v203_v15, 0 }
  0x8b   : > { %8914 = vmatmul.mubr.msk.bf16.vlgmr.msra.gmra.mxu1 %vm237_vm2, %v10022_v19  ;;  %v402_v28 = vsel %vm241_vm1, %v400_v26, 0  ;;  %4826 = vrot.lane.b32.xlu1 %v10256_v23, %s9856_s22  ;;  %v10267_v26 = vld.sshfl [vmem:[%s9911_s20 + $0x18] sm:$0x3 pattern:$0x76325410] }
  0x8c   : > { %8924 = vmatpush3.bf16.msra.mxu1 %v402_v28  ;;  %8925 = vmatprep.mubr.msk.bf16.mxu1 %vm9853_vm0, %v9852_v2  ;;  %v559_v32 = vpop.permute.xlu1 %558 }
  0x8d   : > { %8935 = vmatprep.subr.bf16.mxu1 %v9852_v2  ;;  %v561_v33 = vsel %vm241_vm1, %v559_v32, 0 }
  0x8e   : > { %v506_v30 = vpop.permute.xlu0 %505  ;;  %4773 = vrot.lane.b32.xlu0 %v10244_v20, %s9856_s22 }
  0x8f   : > { %8920 = vmatmul.mubr.msk.bf16.vlgmr.msra.gmra.mxu0 %vm237_vm2, %v10022_v19  ;;  %v508_v31 = vsel %vm241_vm1, %v506_v30, 0 }
  0x90   : > { %8930 = vmatpush3.bf16.msra.mxu0 %v455_v29  ;;  %8931 = vmatprep.mubr.msk.bf16.mxu0 %vm9853_vm0, %v9852_v2  ;;  %v665_v36 = vpop.permute.xlu1 %664  ;;  %v10278_v29 = vld.sshfl [vmem:[%s9911_s20 + $0x1a] sm:$0x3 pattern:$0x76325410] }
  0x91   : > { %8941 = vmatprep.subr.bf16.mxu0 %v9852_v2  ;;  %v667_v37 = vsel %vm241_vm1, %v665_v36, 0  ;;  %4932 = vrot.lane.b32.xlu1 %v10278_v29, %s9856_s22  ;;  %v10302_v36 = vld.sshfl [vmem:[%s9911_s20 + $0x1e] sm:$0x3 pattern:$0x76325410] }
  0x92   : > { %v612_v34 = vpop.permute.xlu0 %611  ;;  %4879 = vrot.lane.b32.xlu0 %v10267_v26, %s9856_s22 }
  0x93   : > { %8926 = vmatmul.mubr.msk.bf16.vlgmr.msra.gmra.mxu1 %vm237_vm2, %v10022_v19  ;;  %v614_v35 = vsel %vm241_vm1, %v612_v34, 0 }
  0x94   : > { %8936 = vmatpush3.bf16.msra.mxu1 %v508_v31  ;;  %8937 = vmatprep.mubr.msk.bf16.mxu1 %vm9853_vm0, %v9852_v2  ;;  %v771_v40 = vpop.permute.xlu1 %770 }
  0x95   : > { %8947 = vmatprep.subr.bf16.mxu1 %v9852_v2  ;;  %v773_v41 = vsel %vm241_vm1, %v771_v40, 0  ;;  %5038 = vrot.lane.b32.xlu1 %v10302_v36, %s9856_s22 }
  0x96   : > { %v718_v38 = vpop.permute.xlu0 %717 }
  0x97   : > { %8932 = vmatmul.mubr.msk.bf16.vlgmr.msra.gmra.mxu0 %vm237_vm2, %v10022_v19  ;;  %v720_v39 = vsel %vm241_vm1, %v718_v38, 0 }
  0x98   : > { %8942 = vmatpush3.bf16.msra.mxu0 %v561_v33  ;;  %8943 = vmatprep.mubr.msk.bf16.mxu0 %vm9853_vm0, %v9852_v2  ;;  %v877_v44 = vpop.permute.xlu1 %876  ;;  %v10291_v33 = vld.sshfl [vmem:[%s9911_s20 + $0x1c] sm:$0x3 pattern:$0x76325410] }
  0x99   : > { %8953 = vmatprep.subr.bf16.mxu0 %v9852_v2  ;;  %v879_v45 = vsel %vm241_vm1, %v877_v44, 0  ;;  %4985 = vrot.lane.b32.xlu0 %v10291_v33, %s9856_s22 }
  0x9a   : > { %v824_v42 = vpop.permute.xlu0 %823  ;;  %5169 = vrot.lane.b32.xlu1 %v9896_v1, %s9861_s27 }
  0x9b   : > { %8938 = vmatmul.mubr.msk.bf16.vlgmr.msra.gmra.mxu1 %vm237_vm2, %v10022_v19  ;;  %v826_v43 = vsel %vm241_vm1, %v824_v42, 0 }
  0x9c   : > { %8948 = vmatpush3.bf16.msra.mxu1 %v614_v35  ;;  %8949 = vmatprep.mubr.msk.bf16.mxu1 %vm9853_vm0, %v9852_v2  ;;  %v983_v48 = vpop.permute.xlu1 %982 }
  0x9d   : > { %8959 = vmatprep.subr.bf16.mxu1 %v9852_v2  ;;  %v985_v49 = vsel %vm241_vm1, %v983_v48, 0  ;;  %5091 = vrot.lane.b32.xlu0 %v10152_v61, %s9856_s22 }
  0x9e   : > { %v930_v46 = vpop.permute.xlu0 %929 }
  0x9f   : > { %8944 = vmatmul.mubr.msk.bf16.vlgmr.msra.gmra.mxu0 %vm237_vm2, %v10022_v19  ;;  %v932_v47 = vsel %vm241_vm1, %v930_v46, 0 }
  0xa0   : > { %8954 = vmatpush3.bf16.msra.mxu0 %v667_v37  ;;  %8955 = vmatprep.mubr.msk.bf16.mxu0 %vm9853_vm0, %v9852_v2  ;;  %v1798_v25 = vpop.permute.xlu1 %1797 }
  0xa1   : > { %8965 = vmatprep.subr.bf16.mxu0 %v9852_v2  ;;  %v1803_v28 = vsel %vm241_vm1, %v1798_v25, 0  ;;  %v2894_v25 = vsel %vm241_vm1, %v8326_v17, 0 }
  0xa2   : > { %v1036_v50 = vpop.permute.xlu0 %1035 }
  0xa3   : > { %8950 = vmatmul.mubr.msk.bf16.vlgmr.msra.gmra.mxu1 %vm237_vm2, %v10022_v19  ;;  %v1038_v51 = vsel %vm241_vm1, %v1036_v50, 0 }
  0xa4   : > { %8960 = vmatpush3.bf16.msra.mxu1 %v720_v39  ;;  %8961 = vmatprep.mubr.msk.bf16.mxu1 %vm9853_vm0, %v9852_v2  ;;  %v10286_v31 = vpop.permute.xlu1 %1787 }
  0xa5   : > { %8971 = vmatprep.subr.bf16.mxu1 %v9852_v2 }
  0xa6   : > { %v1854_v27 = vpop.permute.xlu0 %1853 }
  0xa7   : > { %8956 = vmatmul.mubr.msk.bf16.vlgmr.msra.gmra.mxu0 %vm237_vm2, %v10022_v19  ;;  %v1856_v30 = vsel %vm241_vm1, %v1854_v27, 0  ;;  %v8327_v27 = vld [vmem:[%s9911_s20 + $0xe] sm:$0x3] }
  0xa8   : > { %8966 = vmatpush3.bf16.msra.mxu0 %v773_v41  ;;  %8967 = vmatprep.mubr.msk.bf16.mxu0 %vm9853_vm0, %v9852_v2  ;;  %v1960_v35 = vpop.permute.xlu1 %1959 }
  0xa9   : > { %8977 = vmatprep.subr.bf16.mxu0 %v9852_v2  ;;  %v1962_v37 = vsel %vm241_vm1, %v1960_v35, 0  ;;  %v2937_v35 = vsel %vm241_vm1, %v8327_v27, 0 }
  0xaa   : > { %v1907_v32 = vpop.permute.xlu0 %1906 }
  0xab   : > { %8962 = vmatmul.mubr.msk.bf16.vlgmr.msra.gmra.mxu1 %vm237_vm2, %v10022_v19  ;;  %v1909_v34 = vsel %vm241_vm1, %v1907_v32, 0 }
  0xac   : > { %8972 = vmatpush3.bf16.msra.mxu1 %v826_v43  ;;  %8973 = vmatprep.mubr.msk.bf16.mxu1 %vm9853_vm0, %v9852_v2  ;;  %v2066_v40 = vpop.permute.xlu1 %2065 }
  0xad   : > { %8983 = vmatprep.subr.bf16.mxu1 %v9852_v2  ;;  %v2068_v41 = vsel %vm241_vm1, %v2066_v40, 0  ;;  %v10461_v40 = vld.sshfl [vmem:[%s9911_s20 + $0x8] sm:$0x3 pattern:$0x76325410] }
  0xae   : > { %v2013_v38 = vpop.permute.xlu0 %2012 }
  0xaf   : > { %8968 = vmatmul.mubr.msk.bf16.vlgmr.msra.gmra.mxu0 %vm237_vm2, %v10022_v19  ;;  %v2015_v39 = vsel %vm241_vm1, %v2013_v38, 0 }
  0xb0   : > { %8978 = vmatpush3.bf16.msra.mxu0 %v879_v45  ;;  %8979 = vmatprep.mubr.msk.bf16.mxu0 %vm9853_vm0, %v9852_v2  ;;  %v2172_v44 = vpop.permute.xlu1 %2171 }
  0xb1   : > { %8989 = vmatprep.subr.bf16.mxu0 %v9852_v2  ;;  %v2174_v45 = vsel %vm241_vm1, %v2172_v44, 0  ;;  %v8329_v44 = vld [vmem:[%s9911_s20 + $0x12] sm:$0x3] }
  0xb2   : > { %v2119_v42 = vpop.permute.xlu0 %2118 }
  0xb3   : > { %8974 = vmatmul.mubr.msk.bf16.vlgmr.msra.gmra.mxu1 %vm237_vm2, %v10022_v19  ;;  %v2121_v43 = vsel %vm241_vm1, %v2119_v42, 0 }
  0xb4   : > { %8984 = vmatpush3.bf16.msra.mxu1 %v932_v47  ;;  %8985 = vmatprep.mubr.msk.bf16.mxu1 %vm9853_vm0, %v9852_v2  ;;  %v2278_v48 = vpop.permute.xlu1 %2277 }
  0xb5   : > { %8995 = vmatprep.subr.bf16.mxu1 %v9852_v2 }
  0xb6   : > { %v2225_v46 = vpop.permute.xlu0 %2224 }
  0xb7   : > { %8980 = vmatmul.mubr.msk.bf16.vlgmr.msra.gmra.mxu0 %vm237_vm2, %v10022_v19  ;;  %v2227_v47 = vsel %vm241_vm1, %v2225_v46, 0 }
  0xb8   : > { %8990 = vmatpush3.bf16.msra.mxu0 %v985_v49  ;;  %8991 = vmatprep.mubr.msk.bf16.mxu0 %vm9853_vm0, %v9852_v2  ;;  %v2280_v49 = vsel %vm241_vm1, %v2278_v48, 0  ;;  %v2384_v52 = vpop.permute.xlu1 %2383 }
  0xb9   : > { %9001 = vmatprep.subr.bf16.mxu0 %v9852_v2 }
  0xba   : > { %v2331_v50 = vpop.permute.xlu0 %2330 }
  0xbb   : > { %8986 = vmatmul.mubr.msk.bf16.vlgmr.msra.gmra.mxu1 %vm237_vm2, %v10022_v19 }
  0xbc   : > { %8996 = vmatpush3.bf16.msra.mxu1 %v1038_v51  ;;  %8997 = vmatprep.mubr.msk.bf16.mxu1 %vm9853_vm0, %v9852_v2  ;;  %v2333_v51 = vsel %vm241_vm1, %v2331_v50, 0  ;;  %v2490_v56 = vpop.permute.xlu1 %2489  ;;  %v3023_v50 = vsel %vm241_vm1, %v8329_v44, 0 }
  0xbd   : > { %9007 = vmatprep.subr.bf16.mxu1 %v9852_v2 }
  0xbe   : > { %v2437_v54 = vpop.permute.xlu0 %2436 }
  0xbf   : > { %8992 = vmatmul.mubr.msk.bf16.vlgmr.msra.gmra.mxu0 %vm237_vm2, %v10022_v19 }
  0xc0   : > { %9002 = vmatpush3.bf16.msra.mxu0 %v1084_v53  ;;  %9003 = vmatprep.mubr.msk.bf16.mxu0 %vm9853_vm0, %v9852_v2  ;;  %v2386_v53 = vsel %vm241_vm1, %v2384_v52, 0  ;;  %v2596_v60 = vpop.permute.xlu1 %2595 }
  0xc1   : > { %9013 = vmatprep.subr.bf16.mxu0 %v9852_v2  ;;  %v2598_v61 = vsel %vm241_vm1, %v2596_v60, 0 }
  0xc2   : > { %v2543_v58 = vpop.permute.xlu0 %2542 }
  0xc3   : > { %8998 = vmatmul.mubr.msk.bf16.vlgmr.msra.gmra.mxu1 %vm237_vm2, %v10022_v19  ;;  %v206_v19 = vld [vmem:[%s9911_s20 + $0x1c] sm:$0x3] }
  0xc4   : > { %9008 = vmatpush3.bf16.msra.mxu1 %v1127_v55  ;;  %9009 = vmatprep.mubr.msk.bf16.mxu1 %vm9853_vm0, %v9852_v2  ;;  %v1686_v21 = vsel %vm241_vm1, %v206_v19, 0  ;;  %v2439_v55 = vsel %vm241_vm1, %v2437_v54, 0  ;;  %v10489_v54 = vld.sshfl [vmem:[%s9911_s20 + $0xc] sm:$0x3 pattern:$0x76325410] }
  0xc5   : > { %9019 = vmatprep.subr.bf16.mxu1 %v9852_v2 }
  0xc6   : > { %v10402_v12 = vpop.permute.xlu0 %2673 }
  0xc7   : > { %9004 = vmatmul.mubr.msk.bf16.vlgmr.msra.gmra.mxu0 %vm237_vm2, %v9896_v1 }
  0xc8   : > { %9014 = vmatpush3.bf16.msra.mxu0 %v1170_v57  ;;  %9015 = vmatprep.mubr.msk.bf16.mxu0 %vm9853_vm0, %v9852_v2  ;;  %v2492_v57 = vsel %vm241_vm1, %v2490_v56, 0 }
  0xc9   : > { %9025 = vmatprep.subr.bf16.mxu0 %v9852_v2 }
  0xcb   : > { %9010 = vmatmul.mubr.msk.bf16.vlgmr.msra.gmra.mxu1 %vm237_vm2, %v9896_v1 }
  0xcc   : > { %9020 = vmatpush3.bf16.msra.mxu1 %v1213_v59  ;;  %9021 = vmatprep.mubr.msk.bf16.mxu1 %vm9853_vm0, %v9852_v2  ;;  %v2545_v59 = vsel %vm241_vm1, %v2543_v58, 0  ;;  %v8331_v58 = vld [vmem:[%s9911_s20 + $0x16] sm:$0x3] }
  0xcd   : > { %9031 = vmatprep.subr.bf16.mxu1 %v9852_v2 }
  0xcf   : > { %9016 = vmatmul.mubr.msk.bf16.vlgmr.msra.gmra.mxu0 %vm237_vm2, %v9896_v1 }
  0xd0   : > { %9026 = vmatpush3.bf16.msra.mxu0 %v1256_v62  ;;  %9027 = vmatprep.mubr.msk.bf16.mxu0 %vm9853_vm0, %v9852_v2  ;;  %v8321_v62 = vld [vmem:[%s9911_s20 + $0x2] sm:$0x3] }
  0xd1   : > { %9037 = vmatprep.subr.bf16.mxu0 %v9852_v2  ;;  %v2679_v63 = vsel %vm241_vm1, %v8321_v62, 0 }
  0xd3   : > { %9022 = vmatmul.mubr.msk.bf16.vlgmr.msra.gmra.mxu1 %vm237_vm2, %v9896_v1 }
  0xd4   : > { %9032 = vmatpush3.bf16.msra.mxu1 %v1299_v0  ;;  %9033 = vmatprep.mubr.msk.bf16.mxu1 %vm9853_vm0, %v9852_v2  ;;  %v8322_v0 = vld [vmem:[%s9911_s20 + $0x4] sm:$0x3] }
  0xd5   : > { %9043 = vmatprep.subr.bf16.mxu1 %v9852_v2  ;;  %v2722_v3 = vsel %vm241_vm1, %v8322_v0, 0  ;;  %v3109_v0 = vsel %vm241_vm1, %v8331_v58, 0 }
  0xd7   : > { %9028 = vmatmul.mubr.msk.bf16.vlgmr.msra.gmra.mxu0 %vm237_vm2, %v9896_v1 }
  0xd8   : > { %9038 = vmatpush3.bf16.msra.mxu0 %v1342_v4  ;;  %9039 = vmatprep.mubr.msk.bf16.mxu0 %vm9853_vm0, %v9852_v2  ;;  %v8323_v4 = vld [vmem:[%s9911_s20 + $0x6] sm:$0x3] }
  0xd9   : > { %9049 = vmatprep.subr.bf16.mxu0 %v9852_v2 }
  0xdb   : > { %9034 = vmatmul.mubr.msk.bf16.vlgmr.msra.gmra.mxu1 %vm237_vm2, %v9896_v1 }
  0xdc   : > { %9044 = vmatpush3.bf16.msra.mxu1 %v1385_v5  ;;  %9045 = vmatprep.mubr.msk.bf16.mxu1 %vm9853_vm0, %v9852_v2  ;;  %v2765_v5 = vsel %vm241_vm1, %v8323_v4, 0 }
  0xdd   : > { %9055 = vmatprep.subr.bf16.mxu1 %v9852_v2 }
  0xdf   : > { %9040 = vmatmul.mubr.msk.bf16.vlgmr.msra.gmra.mxu0 %vm237_vm2, %v9896_v1 }
  0xe0   : > { %9050 = vmatpush3.bf16.msra.mxu0 %v1428_v7  ;;  %9051 = vmatprep.mubr.msk.bf16.mxu0 %vm9853_vm0, %v9852_v2 }
  0xe1   : > { %9061 = vmatprep.subr.bf16.mxu0 %v9852_v2 }
  0xe3   : > { %9046 = vmatmul.mubr.msk.bf16.vlgmr.msra.gmra.mxu1 %vm237_vm2, %v9896_v1 }
  0xe4   : > { %9056 = vmatpush3.bf16.msra.mxu1 %v1471_v9  ;;  %9057 = vmatprep.mubr.msk.bf16.mxu1 %vm9853_vm0, %v9852_v2  ;;  %v2808_v9 = vsel %vm241_vm1, %v8324_v14, 0  ;;  %v10517_v14 = vld.sshfl [vmem:[%s9911_s20 + $0x10] sm:$0x3 pattern:$0x76325410] }
  0xe5   : > { %9067 = vmatprep.subr.bf16.mxu1 %v9852_v2 }
  0xe7   : > { %9052 = vmatmul.mubr.msk.bf16.vlgmr.msra.gmra.mxu0 %vm237_vm2, %v9896_v1 }
  0xe8   : > { %9062 = vmatpush3.bf16.msra.mxu0 %v1514_v11  ;;  %9063 = vmatprep.mubr.msk.bf16.mxu0 %vm9853_vm0, %v9852_v2 }
  0xe9   : > { %9073 = vmatprep.subr.bf16.mxu0 %v9852_v2 }
  0xeb   : > { %9058 = vmatmul.mubr.msk.bf16.vlgmr.msra.gmra.mxu1 %vm237_vm2, %v9896_v1 }
  0xec   : > { %9068 = vmatpush3.bf16.msra.mxu1 %v1557_v10  ;;  %9069 = vmatprep.mubr.msk.bf16.mxu1 %vm9853_vm0, %v9852_v2 }
  0xed   : > { %9079 = vmatprep.subr.bf16.mxu1 %v9852_v2 }
  0xef   : > { %9064 = vmatmul.mubr.msk.bf16.vlgmr.msra.gmra.mxu0 %vm237_vm2, %v9896_v1 }
  0xf0   : > { %9074 = vmatpush3.bf16.msra.mxu0 %v1600_v16  ;;  %9075 = vmatprep.mubr.msk.bf16.mxu0 %vm9853_vm0, %v9852_v2  ;;  %v2851_v16 = vsel %vm241_vm1, %v8325_v8, 0 }
  0xf1   : > { %9085 = vmatprep.subr.bf16.mxu0 %v9852_v2 }
  0xf3   : > { %9070 = vmatmul.mubr.msk.bf16.vlgmr.msra.gmra.mxu1 %vm237_vm2, %v9896_v1 }
  0xf4   : > { %9080 = vmatpush3.bf16.msra.mxu1 %v1643_v18  ;;  %9081 = vmatprep.mubr.msk.bf16.mxu1 %vm9853_vm0, %v9852_v2 }
  0xf5   : > { %9091 = vmatprep.subr.bf16.mxu1 %v9852_v2 }
  0xf7   : > { %9076 = vmatmul.mubr.msk.bf16.vlgmr.msra.gmra.mxu0 %vm237_vm2, %v9896_v1 }
  0xf8   : > { %9086 = vmatpush3.bf16.msra.mxu0 %v1686_v21  ;;  %9087 = vmatprep.mubr.msk.bf16.mxu0 %vm9853_vm0, %v9852_v2  ;;  %v10432_v21 = vld.sshfl [vmem:[%s9911_s20 + $0x4] sm:$0x3 pattern:$0x76325410] }
  0xf9   : > { %9097 = vmatprep.subr.bf16.mxu0 %v9852_v2  ;;  %5904 = vrot.lane.b32.xlu0 %v10432_v21, %s9855_s21 }
  0xfb   : > { %9082 = vmatmul.mubr.msk.bf16.vlgmr.msra.gmra.mxu1 %vm237_vm2, %v9896_v1 }
  0xfc   : > { %9092 = vmatpush3.bf16.msra.mxu1 %v1729_v24  ;;  %9093 = vmatprep.mubr.msk.bf16.mxu1 %vm9853_vm0, %v9852_v2 }
  0xfd   : > { %9103 = vmatprep.subr.bf16.mxu1 %v9852_v2  ;;  %5894 = vrot.lane.b32.xlu0 %v9896_v1, %s9862_s28 }
  0xff   : > { %9088 = vmatmul.mubr.msk.bf16.vlgmr.msra.gmra.mxu0 %vm237_vm2, %v9896_v1 }
 0x100   : > { %9098 = vmatpush3.bf16.msra.mxu0 %v1803_v28  ;;  %9099 = vmatprep.mubr.msk.bf16.mxu0 %vm9853_vm0, %v9852_v2 }
 0x101   : > { %9109 = vmatprep.subr.bf16.mxu0 %v9852_v2 }
 0x103   : > { %9094 = vmatmul.mubr.msk.bf16.vlgmr.msra.gmra.mxu1 %vm237_vm2, %v9896_v1 }
 0x104   : > { %9104 = vmatpush3.bf16.msra.mxu1 %v1856_v30  ;;  %9105 = vmatprep.mubr.msk.bf16.mxu1 %vm9853_vm0, %v9852_v2 }
 0x105   : > { %9115 = vmatprep.subr.bf16.mxu1 %v9852_v2 }
 0x107   : > { %9100 = vmatmul.mubr.msk.bf16.vlgmr.msra.gmra.mxu0 %vm237_vm2, %v10286_v31 }
 0x108   : > { %9110 = vmatpush3.bf16.msra.mxu0 %v1909_v34  ;;  %9111 = vmatprep.mubr.msk.bf16.mxu0 %vm9853_vm0, %v9852_v2 }
 0x109   : > { %9121 = vmatprep.subr.bf16.mxu0 %v9852_v2 }
 0x10b   : > { %9106 = vmatmul.mubr.msk.bf16.vlgmr.msra.gmra.mxu1 %vm237_vm2, %v10286_v31 }
 0x10c   : > { %9116 = vmatpush3.bf16.msra.mxu1 %v1962_v37  ;;  %9117 = vmatprep.mubr.msk.bf16.mxu1 %vm9853_vm0, %v9852_v2  ;;  %v8328_v37 = vld [vmem:[%s9911_s20 + $0x10] sm:$0x3] }
 0x10d   : > { %9127 = vmatprep.subr.bf16.mxu1 %v9852_v2 }
 0x10f   : > { %9112 = vmatmul.mubr.msk.bf16.vlgmr.msra.gmra.mxu0 %vm237_vm2, %v10286_v31 }
 0x110   : > { %9122 = vmatpush3.bf16.msra.mxu0 %v2015_v39  ;;  %9123 = vmatprep.mubr.msk.bf16.mxu0 %vm9853_vm0, %v9852_v2 }
 0x111   : > { %9133 = vmatprep.subr.bf16.mxu0 %v9852_v2 }
 0x113   : > { %9118 = vmatmul.mubr.msk.bf16.vlgmr.msra.gmra.mxu1 %vm237_vm2, %v10286_v31 }
 0x114   : > { %9128 = vmatpush3.bf16.msra.mxu1 %v2068_v41  ;;  %9129 = vmatprep.mubr.msk.bf16.mxu1 %vm9853_vm0, %v9852_v2 }
 0x115   : > { %9139 = vmatprep.subr.bf16.mxu1 %v9852_v2 }
 0x117   : > { %9124 = vmatmul.mubr.msk.bf16.vlgmr.msra.gmra.mxu0 %vm237_vm2, %v10286_v31 }
 0x118   : > { %9134 = vmatpush3.bf16.msra.mxu0 %v2121_v43  ;;  %9135 = vmatprep.mubr.msk.bf16.mxu0 %vm9853_vm0, %v9852_v2  ;;  %v2980_v43 = vsel %vm241_vm1, %v8328_v37, 0 }
 0x119   : > { %9145 = vmatprep.subr.bf16.mxu0 %v9852_v2 }
 0x11b   : > { %9130 = vmatmul.mubr.msk.bf16.vlgmr.msra.gmra.mxu1 %vm237_vm2, %v10286_v31 }
 0x11c   : > { %9140 = vmatpush3.bf16.msra.mxu1 %v2174_v45  ;;  %9141 = vmatprep.mubr.msk.bf16.mxu1 %vm9853_vm0, %v9852_v2 }
 0x11d   : > { %9151 = vmatprep.subr.bf16.mxu1 %v9852_v2 }
 0x11f   : > { %9136 = vmatmul.mubr.msk.bf16.vlgmr.msra.gmra.mxu0 %vm237_vm2, %v10286_v31 }
 0x120   : > { %9146 = vmatpush3.bf16.msra.mxu0 %v2227_v47  ;;  %9147 = vmatprep.mubr.msk.bf16.mxu0 %vm9853_vm0, %v9852_v2  ;;  %v10475_v47 = vld.sshfl [vmem:[%s9911_s20 + $0xa] sm:$0x3 pattern:$0x76325410] }
 0x121   : > { %9157 = vmatprep.subr.bf16.mxu0 %v9852_v2  ;;  %6066 = vrot.lane.b32.xlu0 %v10475_v47, %s9855_s21 }
 0x123   : > { %9142 = vmatmul.mubr.msk.bf16.vlgmr.msra.gmra.mxu1 %vm237_vm2, %v10286_v31 }
 0x124   : > { %9152 = vmatpush3.bf16.msra.mxu1 %v2280_v49  ;;  %9153 = vmatprep.mubr.msk.bf16.mxu1 %vm9853_vm0, %v9852_v2 }
 0x125   : > { %9163 = vmatprep.subr.bf16.mxu1 %v9852_v2 }
 0x127   : > { %9148 = vmatmul.mubr.msk.bf16.vlgmr.msra.gmra.mxu0 %vm237_vm2, %v10286_v31 }
 0x128   : > { %9158 = vmatpush3.bf16.msra.mxu0 %v2333_v51  ;;  %9159 = vmatprep.mubr.msk.bf16.mxu0 %vm9853_vm0, %v9852_v2  ;;  %v8330_v51 = vld [vmem:[%s9911_s20 + $0x14] sm:$0x3] }
 0x129   : > { %9169 = vmatprep.subr.bf16.mxu0 %v9852_v2 }
 0x12b   : > { %9154 = vmatmul.mubr.msk.bf16.vlgmr.msra.gmra.mxu1 %vm237_vm2, %v10286_v31 }
 0x12c   : > { %9164 = vmatpush3.bf16.msra.mxu1 %v2386_v53  ;;  %9165 = vmatprep.mubr.msk.bf16.mxu1 %vm9853_vm0, %v9852_v2 }
 0x12d   : > { %9175 = vmatprep.subr.bf16.mxu1 %v9852_v2 }
 0x12f   : > { %9160 = vmatmul.mubr.msk.bf16.vlgmr.msra.gmra.mxu0 %vm237_vm2, %v10286_v31 }
 0x130   : > { %9170 = vmatpush3.bf16.msra.mxu0 %v2439_v55  ;;  %9171 = vmatprep.mubr.msk.bf16.mxu0 %vm9853_vm0, %v9852_v2 }
 0x131   : > { %9181 = vmatprep.subr.bf16.mxu0 %v9852_v2 }
 0x133   : > { %9166 = vmatmul.mubr.msk.bf16.vlgmr.msra.gmra.mxu1 %vm237_vm2, %v10286_v31 }
 0x134   : > { %9176 = vmatpush3.bf16.msra.mxu1 %v2492_v57  ;;  %9177 = vmatprep.mubr.msk.bf16.mxu1 %vm9853_vm0, %v9852_v2  ;;  %v3066_v57 = vsel %vm241_vm1, %v8330_v51, 0 }
 0x135   : > { %9187 = vmatprep.subr.bf16.mxu1 %v9852_v2 }
 0x137   : > { %9172 = vmatmul.mubr.msk.bf16.vlgmr.msra.gmra.mxu0 %vm237_vm2, %v10286_v31 }
 0x138   : > { %9182 = vmatpush3.bf16.msra.mxu0 %v2545_v59  ;;  %9183 = vmatprep.mubr.msk.bf16.mxu0 %vm9853_vm0, %v9852_v2 }
 0x139   : > { %9193 = vmatprep.subr.bf16.mxu0 %v9852_v2 }
 0x13b   : > { %9178 = vmatmul.mubr.msk.bf16.vlgmr.msra.gmra.mxu1 %vm237_vm2, %v10286_v31 }
 0x13c   : > { %9188 = vmatpush3.bf16.msra.mxu1 %v2598_v61  ;;  %9189 = vmatprep.mubr.msk.bf16.mxu1 %vm9853_vm0, %v9852_v2  ;;  %v10503_v61 = vld.sshfl [vmem:[%s9911_s20 + $0xe] sm:$0x3 pattern:$0x76325410] }
 0x13d   : > { %9199 = vmatprep.subr.bf16.mxu1 %v9852_v2  ;;  %6172 = vrot.lane.b32.xlu0 %v10503_v61, %s9855_s21 }
 0x13f   : > { %9184 = vmatmul.mubr.msk.bf16.vlgmr.msra.gmra.mxu0 %vm237_vm2, %v10286_v31 }
 0x140   : > { %9194 = vmatpush3.bf16.msra.mxu0 %v2679_v63  ;;  %9195 = vmatprep.mubr.msk.bf16.mxu0 %vm9853_vm0, %v9852_v2 }
 0x141   : > { %9205 = vmatprep.subr.bf16.mxu0 %v9852_v2 }
 0x143   : > { %9190 = vmatmul.mubr.msk.bf16.vlgmr.msra.gmra.mxu1 %vm237_vm2, %v10286_v31  ;;  %v10446_v31 = vld.sshfl [vmem:[%s9911_s20 + $0x6] sm:$0x3 pattern:$0x76325410] }
 0x144   : > { %9200 = vmatpush3.bf16.msra.mxu1 %v2722_v3  ;;  %9201 = vmatprep.mubr.msk.bf16.mxu1 %vm9853_vm0, %v9852_v2  ;;  %v8332_v3 = vld [vmem:[%s9911_s20 + $0x18] sm:$0x3] }
 0x145   : > { %9211 = vmatprep.subr.bf16.mxu1 %v9852_v2  ;;  %5960 = vrot.lane.b32.xlu1 %v10446_v31, %s9855_s21  ;;  %v3152_v8 = vsel %vm241_vm1, %v8332_v3, 0 }
 0x147   : > { %v10409_v7 = vpop.f32.mrf.mxu0  ;;  %9196 = vmatmul.mubr.msk.bf16.vlgmr.msra.gmra.mxu0 %vm237_vm2, %v10402_v12 }
 0x148   : > { %9206 = vmatpush3.bf16.msra.mxu0 %v2765_v5  ;;  %9207 = vmatprep.mubr.msk.bf16.mxu0 %vm9853_vm0, %v9852_v2 }
 0x149   : > { %v8909_v6 = vpop.f32.mrf.mxu0  ;;  %9217 = vmatprep.subr.bf16.mxu0 %v9852_v2  ;;  %6013 = vrot.lane.b32.xlu1 %v10461_v40, %s9855_s21 }
 0x14b   : > { %v282_v11 = vpop.f32.mrf.mxu0  ;;  %v10418_v15 = vpop.f32.mrf.mxu1  ;;  %9202 = vmatmul.mubr.msk.bf16.vlgmr.msra.gmra.mxu1 %vm237_vm2, %v10402_v12 }
 0x14c   : > { %9212 = vmatpush3.bf16.msra.mxu1 %v2808_v9  ;;  %9213 = vmatprep.mubr.msk.bf16.mxu1 %vm9853_vm0, %v9852_v2  ;;  %v8333_v11 = vld [vmem:[%s9911_s20 + $0x1a] sm:$0x3] }
 0x14d   : > { %v8910_v10 = vpop.f32.mrf.mxu0  ;;  %v8915_v13 = vpop.f32.mrf.mxu1  ;;  %9223 = vmatprep.subr.bf16.mxu1 %v9852_v2  ;;  %6119 = vrot.lane.b32.xlu1 %v10489_v54, %s9855_s21 }
 0x14f   : > { %v335_v18 = vpop.f32.mrf.mxu1  ;;  %v10427_v19 = vpop.f32.mrf.mxu0  ;;  %9208 = vmatmul.mubr.msk.bf16.vlgmr.msra.gmra.mxu0 %vm237_vm2, %v10402_v12 }
 0x150   : > { %9218 = vmatpush3.bf16.msra.mxu0 %v2851_v16  ;;  %9219 = vmatprep.mubr.msk.bf16.mxu0 %vm9853_vm0, %v9852_v2  ;;  %v10531_v16 = vld.sshfl [vmem:[%s9911_s20 + $0x12] sm:$0x3 pattern:$0x76325410] }
 0x151   : > { %v8916_v22 = vpop.f32.mrf.mxu1  ;;  %v8921_v24 = vpop.f32.mrf.mxu0  ;;  %9229 = vmatprep.subr.bf16.mxu0 %v9852_v2  ;;  %6225 = vrot.lane.b32.xlu1 %v10517_v14, %s9855_s21 }
 0x152   : > { %v3195_v22 = vsel %vm241_vm1, %v8333_v11, 0  ;;  %6278 = vrot.lane.b32.xlu0 %v10531_v16, %s9855_s21  ;;  %v8334_v24 = vld [vmem:[%s9911_s20 + $0x1c] sm:$0x3] }
 0x153   : > { %v388_v28 = vpop.f32.mrf.mxu0  ;;  %v10441_v30 = vpop.f32.mrf.mxu1  ;;  %9214 = vmatmul.mubr.msk.bf16.vlgmr.msra.gmra.mxu1 %vm237_vm2, %v10402_v12 }
 0x154   : > { %9224 = vmatpush3.bf16.msra.mxu1 %v2894_v25  ;;  %9225 = vmatprep.mubr.msk.bf16.mxu1 %vm9853_vm0, %v9852_v2 }
 0x155   : > { %v8922_v32 = vpop.f32.mrf.mxu0  ;;  %v8927_v34 = vpop.f32.mrf.mxu1  ;;  %9235 = vmatprep.subr.bf16.mxu1 %v9852_v2  ;;  %6331 = vrot.lane.b32.xlu1 %v10244_v20, %s9855_s21  ;;  %v8335_v20 = vld [vmem:[%s9911_s20 + $0x1e] sm:$0x3] }
 0x156   : > { %v3238_v34 = vsel %vm241_vm1, %v8334_v24, 0  ;;  %6384 = vrot.lane.b32.xlu0 %v10256_v23, %s9855_s21  ;;  %v8336_v23 = vld [vmem:[%s9911_s20 + $0x20] sm:$0x3] }
 0x157   : > { %v441_v38 = vpop.f32.mrf.mxu1  ;;  %v10456_v39 = vpop.f32.mrf.mxu0  ;;  %9220 = vmatmul.mubr.msk.bf16.vlgmr.msra.gmra.mxu0 %vm237_vm2, %v10402_v12 }
 0x158   : > { %9230 = vmatpush3.bf16.msra.mxu0 %v2937_v35  ;;  %9231 = vmatprep.mubr.msk.bf16.mxu0 %vm9853_vm0, %v9852_v2 }
 0x159   : > { %v8928_v41 = vpop.f32.mrf.mxu1  ;;  %v8933_v42 = vpop.f32.mrf.mxu0  ;;  %9241 = vmatprep.subr.bf16.mxu0 %v9852_v2  ;;  %6437 = vrot.lane.b32.xlu1 %v10267_v26, %s9855_s21 }
 0x15a   : > { %v3281_v42 = vsel %vm241_vm1, %v8335_v20, 0  ;;  %6490 = vrot.lane.b32.xlu0 %v10278_v29, %s9855_s21  ;;  %v3409_v29 = vpop.permute.xlu1 %3408 }
 0x15b   : > { %v494_v45 = vpop.f32.mrf.mxu0  ;;  %v10470_v46 = vpop.f32.mrf.mxu1  ;;  %9226 = vmatmul.mubr.msk.bf16.vlgmr.msra.gmra.mxu1 %vm237_vm2, %v10402_v12 }
 0x15c   : > { %9236 = vmatpush3.bf16.msra.mxu1 %v2980_v43  ;;  %9237 = vmatprep.mubr.msk.bf16.mxu1 %vm9853_vm0, %v9852_v2 }
 0x15d   : > { %v8934_v48 = vpop.f32.mrf.mxu0  ;;  %v8939_v49 = vpop.f32.mrf.mxu1  ;;  %9247 = vmatprep.subr.bf16.mxu1 %v9852_v2  ;;  %6543 = vrot.lane.b32.xlu1 %v10291_v33, %s9855_s21 }
 0x15e   : > { %v3324_v48 = vsel %vm241_vm1, %v8336_v23, 0  ;;  %6596 = vrot.lane.b32.xlu0 %v10302_v36, %s9855_s21 }
 0x15f   : > { %v547_v52 = vpop.f32.mrf.mxu1  ;;  %v10484_v53 = vpop.f32.mrf.mxu0  ;;  %9232 = vmatmul.mubr.msk.bf16.vlgmr.msra.gmra.mxu0 %vm237_vm2, %v10402_v12 }
 0x160   : > { %9242 = vmatpush3.bf16.msra.mxu0 %v3023_v50  ;;  %9243 = vmatprep.mubr.msk.bf16.mxu0 %vm9853_vm0, %v9852_v2  ;;  %v3465_v50 = vpop.permute.xlu0 %3464 }
 0x161   : > { %v8940_v55 = vpop.f32.mrf.mxu1  ;;  %v8945_v56 = vpop.f32.mrf.mxu0  ;;  %9253 = vmatprep.subr.bf16.mxu0 %v9852_v2 }
 0x162   : > { %v3414_v55 = vsel %vm241_vm1, %v3409_v29, 0 }
 0x163   : > { %v600_v59 = vpop.f32.mrf.mxu0  ;;  %v10498_v60 = vpop.f32.mrf.mxu1  ;;  %9238 = vmatmul.mubr.msk.bf16.vlgmr.msra.gmra.mxu1 %vm237_vm2, %v10402_v12 }
 0x164   : > { %9248 = vmatpush3.bf16.msra.mxu1 %v3066_v57  ;;  %9249 = vmatprep.mubr.msk.bf16.mxu1 %vm9853_vm0, %v9852_v2  ;;  %v3467_v59 = vsel %vm241_vm1, %v3465_v50, 0 }
 0x165   : > { %v8946_v62 = vpop.f32.mrf.mxu0  ;;  %v8951_v63 = vpop.f32.mrf.mxu1  ;;  %9259 = vmatprep.subr.bf16.mxu1 %v9852_v2 }
 0x166   : > { %v10594_v62 = vpop.permute.xlu1 %3398  ;;  %v3518_v63 = vpop.permute.xlu0 %3517 }
 0x167   : > { %v653_v4 = vpop.f32.mrf.mxu1  ;;  %v10512_v5 = vpop.f32.mrf.mxu0  ;;  %9244 = vmatmul.mubr.msk.bf16.vlgmr.msra.gmra.mxu0 %vm237_vm2, %v10402_v12 }
 0x168   : > { %9254 = vmatpush3.bf16.msra.mxu0 %v3109_v0  ;;  %9255 = vmatprep.mubr.msk.bf16.mxu0 %vm9853_vm0, %v9852_v2 }
 0x169   : > { %v8952_v6 = vpop.f32.mrf.mxu1  ;;  %v8957_v9 = vpop.f32.mrf.mxu0  ;;  %9265 = vmatprep.subr.bf16.mxu0 %v9852_v2 }
 0x16a   : > { %v3520_v9 = vsel %vm241_vm1, %v3518_v63, 0 }
 0x16b   : > { %v706_v10 = vpop.f32.mrf.mxu0  ;;  %v10526_v13 = vpop.f32.mrf.mxu1  ;;  %9250 = vmatmul.mubr.msk.bf16.vlgmr.msra.gmra.mxu1 %vm237_vm2, %v10402_v12 }
 0x16c   : > { %9260 = vmatpush3.bf16.msra.mxu1 %v3152_v8  ;;  %9261 = vmatprep.mubr.msk.bf16.mxu1 %vm9853_vm0, %v9852_v2  ;;  %v3571_v8 = vpop.permute.xlu1 %3570 }
 0x16d   : > { %v8958_v17 = vpop.f32.mrf.mxu0  ;;  %v8963_v18 = vpop.f32.mrf.mxu1  ;;  %9271 = vmatprep.subr.bf16.mxu1 %v9852_v2  ;;  %v3573_v24 = vsel %vm241_vm1, %v3571_v8, 0 }
 0x16e   : > { %v10607_v17 = vld.sshfl [vmem:[%s9911_s20 + $0x20] sm:$0x3 pattern:$0x76325410] }
 0x16f   : > { %v759_v25 = vpop.f32.mrf.mxu1  ;;  %v10542_v27 = vpop.f32.mrf.mxu0  ;;  %9256 = vmatmul.mubr.msk.bf16.vlgmr.msra.gmra.mxu0 %vm237_vm2, %v10402_v12  ;;  %6649 = vrot.lane.b32.xlu1 %v10607_v17, %s9855_s21 }
 0x170   : > { %9266 = vmatpush3.bf16.msra.mxu0 %v3195_v22  ;;  %9267 = vmatprep.mubr.msk.bf16.mxu0 %vm9853_vm0, %v9852_v2  ;;  %v3624_v25 = vpop.permute.xlu0 %3623 }
 0x171   : > { %v8964_v28 = vpop.f32.mrf.mxu1  ;;  %v8969_v32 = vpop.f32.mrf.mxu0  ;;  %9277 = vmatprep.subr.bf16.mxu0 %v9852_v2 }
 0x173   : > { %v812_v35 = vpop.f32.mrf.mxu0  ;;  %v10555_v37 = vpop.f32.mrf.mxu1  ;;  %9262 = vmatmul.mubr.msk.bf16.vlgmr.msra.gmra.mxu1 %vm237_vm2, %v10402_v12  ;;  %6789 = vrot.lane.b32.xlu1 %v10432_v21, %s9856_s22 }
 0x174   : > { %9272 = vmatpush3.bf16.msra.mxu1 %v3238_v34  ;;  %9273 = vmatprep.mubr.msk.bf16.mxu1 %vm9853_vm0, %v9852_v2  ;;  %v3730_v21 = vpop.permute.xlu0 %3729 }
 0x175   : > { %v8970_v38 = vpop.f32.mrf.mxu0  ;;  %v8975_v41 = vpop.f32.mrf.mxu1  ;;  %9283 = vmatprep.subr.bf16.mxu1 %v9852_v2 }
 0x176   : > { %v3626_v38 = vsel %vm241_vm1, %v3624_v25, 0  ;;  %v3677_v41 = vpop.permute.xlu1 %3676 }
 0x177   : > { %v865_v26 = vpop.f32.mrf.mxu1  ;;  %v10568_v43 = vpop.f32.mrf.mxu0  ;;  %9268 = vmatmul.mubr.msk.bf16.vlgmr.msra.gmra.mxu0 %vm237_vm2, %v10402_v12  ;;  %6779 = vrot.lane.b32.xlu1 %v9896_v1, %s9863_s29 }
 0x178   : > { %9278 = vmatpush3.bf16.msra.mxu0 %v3281_v42  ;;  %9279 = vmatprep.mubr.msk.bf16.mxu0 %vm9853_vm0, %v9852_v2 }
 0x179   : > { %v8976_v44 = vpop.f32.mrf.mxu1  ;;  %v8981_v45 = vpop.f32.mrf.mxu0  ;;  %9289 = vmatprep.subr.bf16.mxu0 %v9852_v2 }
 0x17a   : > { %v3679_v45 = vsel %vm241_vm1, %v3677_v41, 0 }
 0x17b   : > { %v918_v33 = vpop.f32.mrf.mxu0  ;;  %v10578_v49 = vpop.f32.mrf.mxu1  ;;  %9274 = vmatmul.mubr.msk.bf16.vlgmr.msra.gmra.mxu1 %vm237_vm2, %v10402_v12  ;;  %6951 = vrot.lane.b32.xlu1 %v10475_v47, %s9856_s22 }
 0x17c   : > { %9284 = vmatpush3.bf16.msra.mxu1 %v3324_v48  ;;  %9285 = vmatprep.mubr.msk.bf16.mxu1 %vm9853_vm0, %v9852_v2 }
 0x17d   : > { %v8982_v51 = vpop.f32.mrf.mxu0  ;;  %v8987_v52 = vpop.f32.mrf.mxu1  ;;  %9295 = vmatprep.subr.bf16.mxu1 %v9852_v2 }
 0x17e   : > { %v3732_v51 = vsel %vm241_vm1, %v3730_v21, 0 }
 0x17f   : > { %v971_v56 = vpop.f32.mrf.mxu1  ;;  %v10586_v36 = vpop.f32.mrf.mxu0  ;;  %9280 = vmatmul.mubr.msk.bf16.vlgmr.msra.gmra.mxu0 %vm237_vm2, %v10402_v12  ;;  %7057 = vrot.lane.b32.xlu1 %v10503_v61, %s9856_s22 }
 0x180   : > { %9290 = vmatpush3.bf16.msra.mxu0 %v3414_v55  ;;  %9291 = vmatprep.mubr.msk.bf16.mxu0 %vm9853_vm0, %v9852_v2 }
 0x181   : > { %v8988_v57 = vpop.f32.mrf.mxu1  ;;  %v8993_v58 = vpop.f32.mrf.mxu0  ;;  %9301 = vmatprep.subr.bf16.mxu0 %v9852_v2 }
 0x183   : > { %v1024_v0 = vpop.f32.mrf.mxu0  ;;  %v10596_v3 = vpop.f32.mrf.mxu1  ;;  %9286 = vmatmul.mubr.msk.bf16.vlgmr.msra.gmra.mxu1 %vm237_vm2, %v10402_v12  ;;  %7163 = vrot.lane.b32.xlu1 %v10531_v16, %s9856_s22 }
 0x184   : > { %9296 = vmatpush3.bf16.msra.mxu1 %v3467_v59  ;;  %9297 = vmatprep.mubr.msk.bf16.mxu1 %vm9853_vm0, %v9852_v2 }
 0x185   : > { %v8994_v4 = vpop.f32.mrf.mxu0  ;;  %v8999_v6 = vpop.f32.mrf.mxu1  ;;  %9307 = vmatprep.subr.bf16.mxu1 %v9852_v2 }
 0x187   : > { %v1077_v11 = vpop.f32.mrf.mxu1  ;;  %v1120_v10 = vpop.f32.mrf.mxu0  ;;  %9292 = vmatmul.mubr.msk.bf16.vlgmr.msra.gmra.mxu0 %vm237_vm2, %v10594_v62 }
 0x188   : > { %v10610_v12 = vadd.f32 %v1120_v10, %v10409_v7  ;;  %9302 = vmatpush3.bf16.msra.mxu0 %v3520_v9  ;;  %9303 = vmatprep.mubr.msk.bf16.mxu0 %vm9853_vm0, %v9852_v2  ;;  %v10621_v7 = vld.sshfl [vmem:[%s9911_s20 + $0x22] sm:$0x3 pattern:$0x76325410] }
 0x189   : > { %v9000_v18 = vpop.f32.mrf.mxu1  ;;  %v9005_v22 = vpop.f32.mrf.mxu0  ;;  %9313 = vmatprep.subr.bf16.mxu0 %v9852_v2  ;;  %6702 = vrot.lane.b32.xlu0 %v10621_v7, %s9855_s21 }
 0x18b   : > { %v1123_v28 = vpop.f32.mrf.mxu0  ;;  %v1163_v32 = vpop.f32.mrf.mxu1  ;;  %9298 = vmatmul.mubr.msk.bf16.vlgmr.msra.gmra.mxu1 %vm237_vm2, %v10594_v62 }
 0x18c   : > { %v10624_v34 = vadd.f32 %v1163_v32, %v10418_v15  ;;  %9308 = vmatpush3.bf16.msra.mxu1 %v3573_v24  ;;  %9309 = vmatprep.mubr.msk.bf16.mxu1 %vm9853_vm0, %v9852_v2 }
 0x18d   : > { %v9006_v20 = vpop.f32.mrf.mxu0  ;;  %v9011_v35 = vpop.f32.mrf.mxu1  ;;  %9319 = vmatprep.subr.bf16.mxu1 %v9852_v2  ;;  %6845 = vrot.lane.b32.xlu0 %v10446_v31, %s9856_s22 }
 0x18e   : > { %v3783_v31 = vpop.permute.xlu1 %3782 }
 0x18f   : > { %v1166_v42 = vpop.f32.mrf.mxu1  ;;  %v1206_v15 = vpop.f32.mrf.mxu0  ;;  %9304 = vmatmul.mubr.msk.bf16.vlgmr.msra.gmra.mxu0 %vm237_vm2, %v10594_v62  ;;  %v3785_v1 = vsel %vm241_vm1, %v3783_v31, 0 }
 0x190   : > { %v10637_v23 = vadd.f32 %v1206_v15, %v10427_v19  ;;  %9314 = vmatpush3.bf16.msra.mxu0 %v3626_v38  ;;  %9315 = vmatprep.mubr.msk.bf16.mxu0 %vm9853_vm0, %v9852_v2 }
 0x191   : > { %v9012_v26 = vpop.f32.mrf.mxu1  ;;  %v9017_v44 = vpop.f32.mrf.mxu0  ;;  %9325 = vmatprep.subr.bf16.mxu0 %v9852_v2  ;;  %6898 = vrot.lane.b32.xlu0 %v10461_v40, %s9856_s22 }
 0x192   : > { %v3836_v40 = vpop.permute.xlu0 %3835 }
 0x193   : > { %v1209_v48 = vpop.f32.mrf.mxu0  ;;  %v1249_v29 = vpop.f32.mrf.mxu1  ;;  %9310 = vmatmul.mubr.msk.bf16.vlgmr.msra.gmra.mxu1 %vm237_vm2, %v10594_v62  ;;  %v3838_v47 = vsel %vm241_vm1, %v3836_v40, 0 }
 0x194   : > { %v10648_v19 = vadd.f32 %v1249_v29, %v10441_v30  ;;  %9320 = vmatpush3.bf16.msra.mxu1 %v3679_v45  ;;  %9321 = vmatprep.mubr.msk.bf16.mxu1 %vm9853_vm0, %v9852_v2  ;;  %v8561_v29 = vld.sshfl [vmem:[%s9911_s20 + $0x14] sm:$0x3 pattern:$0x76325410] }
 0x195   : > { %v9018_v33 = vpop.f32.mrf.mxu0  ;;  %v9023_v50 = vpop.f32.mrf.mxu1  ;;  %9331 = vmatprep.subr.bf16.mxu1 %v9852_v2  ;;  %7004 = vrot.lane.b32.xlu0 %v10489_v54, %s9856_s22 }
 0x196   : > { %v3889_v54 = vpop.permute.xlu1 %3888 }
 0x197   : > { %v1252_v52 = vpop.f32.mrf.mxu1  ;;  %v1292_v30 = vpop.f32.mrf.mxu0  ;;  %9316 = vmatmul.mubr.msk.bf16.vlgmr.msra.gmra.mxu0 %vm237_vm2, %v10594_v62  ;;  %v3891_v61 = vsel %vm241_vm1, %v3889_v54, 0 }
 0x198   : > { %v10660_v55 = vadd.f32 %v1292_v30, %v10456_v39  ;;  %9326 = vmatpush3.bf16.msra.mxu0 %v3732_v51  ;;  %9327 = vmatprep.mubr.msk.bf16.mxu0 %vm9853_vm0, %v9852_v2 }
 0x199   : > { %v9024_v56 = vpop.f32.mrf.mxu1  ;;  %v9029_v57 = vpop.f32.mrf.mxu0  ;;  %9337 = vmatprep.subr.bf16.mxu0 %v9852_v2  ;;  %7110 = vrot.lane.b32.xlu0 %v10517_v14, %s9856_s22 }
 0x19a   : > { %v3942_v14 = vpop.permute.xlu0 %3941  ;;  %v3995_v16 = vpop.permute.xlu1 %3994 }
 0x19b   : > { %v1295_v58 = vpop.f32.mrf.mxu0  ;;  %v1335_v39 = vpop.f32.mrf.mxu1  ;;  %9322 = vmatmul.mubr.msk.bf16.vlgmr.msra.gmra.mxu1 %vm237_vm2, %v10594_v62  ;;  %v3944_v24 = vsel %vm241_vm1, %v3942_v14, 0  ;;  %v3997_v35 = vsel %vm241_vm1, %v3995_v16, 0 }
 0x19c   : > { %v10673_v59 = vadd.f32 %v1335_v39, %v10470_v46  ;;  %9332 = vmatpush3.bf16.msra.mxu1 %v3785_v1  ;;  %9333 = vmatprep.mubr.msk.bf16.mxu1 %vm9853_vm0, %v9852_v2 }
 0x19d   : > { %v9030_v63 = vpop.f32.mrf.mxu0  ;;  %v9035_v0 = vpop.f32.mrf.mxu1  ;;  %9343 = vmatprep.subr.bf16.mxu1 %v9852_v2  ;;  %7216 = vrot.lane.b32.xlu0 %v8561_v29, %s9856_s22 }
 0x19e   : > { %v4048_v38 = vpop.permute.xlu0 %4047  ;;  %v4101_v45 = vpop.permute.xlu1 %4100 }
 0x19f   : > { %v1338_v4 = vpop.f32.mrf.mxu1  ;;  %v1378_v46 = vpop.f32.mrf.mxu0  ;;  %9328 = vmatmul.mubr.msk.bf16.vlgmr.msra.gmra.mxu0 %vm237_vm2, %v10594_v62  ;;  %v4050_v44 = vsel %vm241_vm1, %v4048_v38, 0  ;;  %v4103_v51 = vsel %vm241_vm1, %v4101_v45, 0 }
 0x1a0   : > { %v10686_v6 = vadd.f32 %v1378_v46, %v10484_v53  ;;  %9338 = vmatpush3.bf16.msra.mxu0 %v3838_v47  ;;  %9339 = vmatprep.mubr.msk.bf16.mxu0 %vm9853_vm0, %v9852_v2 }
 0x1a1   : > { %v9036_v9 = vpop.f32.mrf.mxu1  ;;  %v9041_v8 = vpop.f32.mrf.mxu0  ;;  %9349 = vmatprep.subr.bf16.mxu0 %v9852_v2 }
 0x1a2   : > { %v4154_v31 = vpop.permute.xlu0 %4153  ;;  %v4207_v58 = vpop.permute.xlu1 %4206 }
 0x1a3   : > { %v1381_v11 = vpop.f32.mrf.mxu0  ;;  %v1421_v10 = vpop.f32.mrf.mxu1  ;;  %9334 = vmatmul.mubr.msk.bf16.vlgmr.msra.gmra.mxu1 %vm237_vm2, %v10594_v62  ;;  %v4156_v40 = vsel %vm241_vm1, %v4154_v31, 0  ;;  %v4209_v4 = vsel %vm241_vm1, %v4207_v58, 0 }
 0x1a4   : > { %v10697_v53 = vadd.f32 %v1421_v10, %v10498_v60  ;;  %9344 = vmatpush3.bf16.msra.mxu1 %v3891_v61  ;;  %9345 = vmatprep.mubr.msk.bf16.mxu1 %vm9853_vm0, %v9852_v2 }
 0x1a5   : > { %v9042_v18 = vpop.f32.mrf.mxu0  ;;  %v9047_v22 = vpop.f32.mrf.mxu1  ;;  %9355 = vmatprep.subr.bf16.mxu1 %v9852_v2 }
 0x1a6   : > { %v4294_v46 = vpop.permute.xlu0 %4293  ;;  %v4350_v14 = vpop.permute.xlu1 %4349 }
 0x1a7   : > { %v1424_v25 = vpop.f32.mrf.mxu1  ;;  %v1464_v28 = vpop.f32.mrf.mxu0  ;;  %9340 = vmatmul.mubr.msk.bf16.vlgmr.msra.gmra.mxu0 %vm237_vm2, %v10594_v62  ;;  %v4299_v18 = vsel %vm241_vm1, %v4294_v46, 0 }
 0x1a8   : > { %v10706_v32 = vadd.f32 %v1464_v28, %v10512_v5  ;;  %9350 = vmatpush3.bf16.msra.mxu0 %v3944_v24  ;;  %9351 = vmatprep.mubr.msk.bf16.mxu0 %vm9853_vm0, %v9852_v2 }
 0x1a9   : > { %v9048_v60 = vpop.f32.mrf.mxu1  ;;  %v9053_v20 = vpop.f32.mrf.mxu0  ;;  %9361 = vmatprep.subr.bf16.mxu0 %v9852_v2 }
 0x1aa   : > { %v4352_v60 = vsel %vm241_vm1, %v4350_v14, 0  ;;  %v10776_v20 = vpop.permute.xlu0 %4283 }
 0x1ab   : > { %v1467_v41 = vpop.f32.mrf.mxu0  ;;  %v1507_v42 = vpop.f32.mrf.mxu1  ;;  %9346 = vmatmul.mubr.msk.bf16.vlgmr.msra.gmra.mxu1 %vm237_vm2, %v10594_v62 }
 0x1ac   : > { %v10715_v5 = vadd.f32 %v1507_v42, %v10526_v13  ;;  %9356 = vmatpush3.bf16.msra.mxu1 %v3997_v35  ;;  %9357 = vmatprep.mubr.msk.bf16.mxu1 %vm9853_vm0, %v9852_v2  ;;  %v4403_v35 = vpop.permute.xlu1 %4402 }
 0x1ad   : > { %v9054_v15 = vpop.f32.mrf.mxu0  ;;  %v9059_v26 = vpop.f32.mrf.mxu1  ;;  %9367 = vmatprep.subr.bf16.mxu1 %v9852_v2 }
 0x1ae   : > { %v4456_v45 = vpop.permute.xlu0 %4455 }
 0x1af   : > { %v1510_v21 = vpop.f32.mrf.mxu1  ;;  %v1550_v48 = vpop.f32.mrf.mxu0  ;;  %9352 = vmatmul.mubr.msk.bf16.vlgmr.msra.gmra.mxu0 %vm237_vm2, %v10594_v62 }
 0x1b0   : > { %v10725_v13 = vadd.f32 %v1550_v48, %v10542_v27  ;;  %9362 = vmatpush3.bf16.msra.mxu0 %v4050_v44  ;;  %9363 = vmatprep.mubr.msk.bf16.mxu0 %vm9853_vm0, %v9852_v2  ;;  %v8563_v27 = vld.sshfl [vmem:[%s9911_s20 + $0x16] sm:$0x3 pattern:$0x76325410]  ;;  %v4405_v44 = vsel %vm241_vm1, %v4403_v35, 0 }
 0x1b1   : > { %v9060_v33 = vpop.f32.mrf.mxu1  ;;  %v9065_v50 = vpop.f32.mrf.mxu0  ;;  %9373 = vmatprep.subr.bf16.mxu0 %v9852_v2  ;;  %7269 = vrot.lane.b32.xlu1 %v8563_v27, %s9856_s22 }
 0x1b2   : > { %v4458_v33 = vsel %vm241_vm1, %v4456_v45, 0 }
 0x1b3   : > { %v1553_v52 = vpop.f32.mrf.mxu0  ;;  %v1593_v30 = vpop.f32.mrf.mxu1  ;;  %9358 = vmatmul.mubr.msk.bf16.vlgmr.msra.gmra.mxu1 %vm237_vm2, %v10594_v62 }
 0x1b4   : > { %v10736_v56 = vadd.f32 %v1593_v30, %v10555_v37  ;;  %9368 = vmatpush3.bf16.msra.mxu1 %v4103_v51  ;;  %9369 = vmatprep.mubr.msk.bf16.mxu1 %vm9853_vm0, %v9852_v2  ;;  %v8565_v37 = vld.sshfl [vmem:[%s9911_s20 + $0x18] sm:$0x3 pattern:$0x76325410] }
 0x1b5   : > { %v9066_v57 = vpop.f32.mrf.mxu0  ;;  %v9071_v1 = vpop.f32.mrf.mxu1  ;;  %9379 = vmatprep.subr.bf16.mxu1 %v9852_v2  ;;  %7322 = vrot.lane.b32.xlu0 %v8565_v37, %s9856_s22 }
 0x1b7   : > { %v1596_v39 = vpop.f32.mrf.mxu1  ;;  %v1636_v63 = vpop.f32.mrf.mxu0  ;;  %9364 = vmatmul.mubr.msk.bf16.vlgmr.msra.gmra.mxu0 %vm237_vm2, %v10594_v62 }
 0x1b8   : > { %v10747_v0 = vadd.f32 %v1636_v63, %v10568_v43  ;;  %9374 = vmatpush3.bf16.msra.mxu0 %v4156_v40  ;;  %9375 = vmatprep.mubr.msk.bf16.mxu0 %vm9853_vm0, %v9852_v2  ;;  %v8567_v43 = vld.sshfl [vmem:[%s9911_s20 + $0x1a] sm:$0x3 pattern:$0x76325410] }
 0x1b9   : > { %v9072_v47 = vpop.f32.mrf.mxu1  ;;  %v9077_v54 = vpop.f32.mrf.mxu0  ;;  %9385 = vmatprep.subr.bf16.mxu0 %v9852_v2  ;;  %7375 = vrot.lane.b32.xlu1 %v8567_v43, %s9856_s22 }
 0x1bb   : > { %v1639_v9 = vpop.f32.mrf.mxu0  ;;  %v1679_v8 = vpop.f32.mrf.mxu1  ;;  %9370 = vmatmul.mubr.msk.bf16.vlgmr.msra.gmra.mxu1 %vm237_vm2, %v10594_v62 }
 0x1bc   : > { %v10758_v61 = vadd.f32 %v1679_v8, %v10578_v49  ;;  %9380 = vmatpush3.bf16.msra.mxu1 %v4209_v4  ;;  %9381 = vmatprep.mubr.msk.bf16.mxu1 %vm9853_vm0, %v9852_v2  ;;  %v8569_v49 = vld.sshfl [vmem:[%s9911_s20 + $0x1c] sm:$0x3 pattern:$0x76325410] }
 0x1bd   : > { %v9078_v11 = vpop.f32.mrf.mxu0  ;;  %v9083_v10 = vpop.f32.mrf.mxu1  ;;  %9391 = vmatprep.subr.bf16.mxu1 %v9852_v2  ;;  %7428 = vrot.lane.b32.xlu0 %v8569_v49, %s9856_s22 }
 0x1bf   : > { %v1682_v22 = vpop.f32.mrf.mxu1  ;;  %v1722_v24 = vpop.f32.mrf.mxu0  ;;  %9376 = vmatmul.mubr.msk.bf16.vlgmr.msra.gmra.mxu0 %vm237_vm2, %v10594_v62 }
 0x1c0   : > { %v10769_v16 = vadd.f32 %v1722_v24, %v10586_v36  ;;  %9386 = vmatpush3.bf16.msra.mxu0 %v4299_v18  ;;  %9387 = vmatprep.mubr.msk.bf16.mxu0 %vm9853_vm0, %v9852_v2  ;;  %v8571_v36 = vld.sshfl [vmem:[%s9911_s20 + $0x1e] sm:$0x3 pattern:$0x76325410] }
 0x1c1   : > { %v9084_v25 = vpop.f32.mrf.mxu1  ;;  %v9089_v28 = vpop.f32.mrf.mxu0  ;;  %9397 = vmatprep.subr.bf16.mxu0 %v9852_v2  ;;  %7481 = vrot.lane.b32.xlu1 %v8571_v36, %s9856_s22 }
 0x1c2   : > { %7534 = vrot.lane.b32.xlu0 %v10607_v17, %s9856_s22  ;;  %v4509_v17 = vpop.permute.xlu1 %4508 }
 0x1c3   : > { %v1725_v38 = vpop.f32.mrf.mxu0  ;;  %v1765_v41 = vpop.f32.mrf.mxu1  ;;  %9382 = vmatmul.mubr.msk.bf16.vlgmr.msra.gmra.mxu1 %vm237_vm2, %v10594_v62  ;;  %v4511_v30 = vsel %vm241_vm1, %v4509_v17, 0 }
 0x1c4   : > { %v10782_v42 = vadd.f32 %v1765_v41, %v10596_v3  ;;  %9392 = vmatpush3.bf16.msra.mxu1 %v4352_v60  ;;  %9393 = vmatprep.mubr.msk.bf16.mxu1 %vm9853_vm0, %v9852_v2 }
 0x1c5   : > { %v9090_v15 = vpop.f32.mrf.mxu0  ;;  %v9095_v26 = vpop.f32.mrf.mxu1  ;;  %9403 = vmatprep.subr.bf16.mxu1 %v9852_v2  ;;  %7587 = vrot.lane.b32.xlu1 %v10621_v7, %s9856_s22  ;;  %s8240_s22 = sshll.u32 %s11631_s13, 1 }
 0x1c6   : > { %v4562_v7 = vpop.permute.xlu0 %4561  ;;  %v4615_v39 = vpop.permute.xlu1 %4614  ;;  %s188_s27 = scalar_lea.vmem %s11629_s3, %s8240_s22 }
 0x1c7   : > { %v1768_v62 = vpop.f32.mrf.mxu1  ;;  %v1839_v21 = vpop.f32.mrf.mxu0  ;;  %9388 = vmatmul.mubr.msk.bf16.vlgmr.msra.gmra.mxu0 %vm237_vm2, %v10776_v20  ;;  %v4564_v58 = vsel %vm241_vm1, %v4562_v7, 0  ;;  %v4617_v4 = vsel %vm241_vm1, %v4615_v39, 0 }
 0x1c8   : > { %v10794_v3 = vadd.f32 %v1839_v21, %v10610_v12  ;;  %9398 = vmatpush3.bf16.msra.mxu0 %v4405_v44  ;;  %9399 = vmatprep.mubr.msk.bf16.mxu0 %vm9853_vm0, %v9852_v2 }
 0x1c9   : > { %v9096_v48 = vpop.f32.mrf.mxu1  ;;  %v9101_v29 = vpop.f32.mrf.mxu0  ;;  %9409 = vmatprep.subr.bf16.mxu0 %v9852_v2 }
 0x1ca   : > { %v4668_v46 = vpop.permute.xlu0 %4667  ;;  %v4721_v10 = vpop.permute.xlu1 %4720 }
 0x1cb   : > { %v1842_v50 = vpop.f32.mrf.mxu0  ;;  %v1892_v51 = vpop.f32.mrf.mxu1  ;;  %9394 = vmatmul.mubr.msk.bf16.vlgmr.msra.gmra.mxu1 %vm237_vm2, %v10776_v20  ;;  %v4670_v11 = vsel %vm241_vm1, %v4668_v46, 0  ;;  %v4723_v25 = vsel %vm241_vm1, %v4721_v10, 0 }
 0x1cc   : > { %v10805_v12 = vadd.f32 %v1892_v51, %v10624_v34  ;;  %9404 = vmatpush3.bf16.msra.mxu1 %v4458_v33  ;;  %9405 = vmatprep.mubr.msk.bf16.mxu1 %vm9853_vm0, %v9852_v2 }
 0x1cd   : > { %v9102_v31 = vpop.f32.mrf.mxu0  ;;  %v9107_v52 = vpop.f32.mrf.mxu1  ;;  %9415 = vmatprep.subr.bf16.mxu1 %v9852_v2 }
 0x1ce   : > { %v4774_v28 = vpop.permute.xlu0 %4773  ;;  %v4827_v15 = vpop.permute.xlu1 %4826 }
 0x1cf   : > { %v1895_v27 = vpop.f32.mrf.mxu1  ;;  %v1945_v57 = vpop.f32.mrf.mxu0  ;;  %9400 = vmatmul.mubr.msk.bf16.vlgmr.msra.gmra.mxu0 %vm237_vm2, %v10776_v20  ;;  %v4776_v36 = vsel %vm241_vm1, %v4774_v28, 0  ;;  %v4829_v21 = vsel %vm241_vm1, %v4827_v15, 0 }
 0x1d0   : > { %v10814_v1 = vadd.f32 %v1945_v57, %v10637_v23  ;;  %9410 = vmatpush3.bf16.msra.mxu0 %v4511_v30  ;;  %9411 = vmatprep.mubr.msk.bf16.mxu0 %vm9853_vm0, %v9852_v2 }
 0x1d1   : > { %v9108_v34 = vpop.f32.mrf.mxu1  ;;  %v9113_v40 = vpop.f32.mrf.mxu0  ;;  %9421 = vmatprep.subr.bf16.mxu0 %v9852_v2 }
 0x1d2   : > { %v4880_v48 = vpop.permute.xlu0 %4879  ;;  %v4933_v31 = vpop.permute.xlu1 %4932 }
 0x1d3   : > { %v1948_v63 = vpop.f32.mrf.mxu0  ;;  %v1998_v37 = vpop.f32.mrf.mxu1  ;;  %9406 = vmatmul.mubr.msk.bf16.vlgmr.msra.gmra.mxu1 %vm237_vm2, %v10776_v20  ;;  %v4882_v51 = vsel %vm241_vm1, %v4880_v48, 0  ;;  %v4935_v57 = vsel %vm241_vm1, %v4933_v31, 0 }
 0x1d4   : > { %v10823_v47 = vadd.f32 %v1998_v37, %v10648_v19  ;;  %9416 = vmatpush3.bf16.msra.mxu1 %v4564_v58  ;;  %9417 = vmatprep.mubr.msk.bf16.mxu1 %vm9853_vm0, %v9852_v2 }
 0x1d5   : > { %v9114_v23 = vpop.f32.mrf.mxu0  ;;  %v9119_v54 = vpop.f32.mrf.mxu1  ;;  %9427 = vmatprep.subr.bf16.mxu1 %v9852_v2 }
 0x1d6   : > { %v4986_v34 = vpop.permute.xlu0 %4985  ;;  %v5039_v23 = vpop.permute.xlu1 %5038 }
 0x1d7   : > { %v2001_v9 = vpop.f32.mrf.mxu1  ;;  %v2051_v8 = vpop.f32.mrf.mxu0  ;;  %9412 = vmatmul.mubr.msk.bf16.vlgmr.msra.gmra.mxu0 %vm237_vm2, %v10776_v20  ;;  %v4988_v37 = vsel %vm241_vm1, %v4986_v34, 0 }
 0x1d8   : > { %v10832_v43 = vadd.f32 %v2051_v8, %v10660_v55  ;;  %9422 = vmatpush3.bf16.msra.mxu0 %v4617_v4  ;;  %9423 = vmatprep.mubr.msk.bf16.mxu0 %vm9853_vm0, %v9852_v2  ;;  %v5041_v8 = vsel %vm241_vm1, %v5039_v23, 0 }
 0x1d9   : > { %v9120_v19 = vpop.f32.mrf.mxu1  ;;  %v9125_v14 = vpop.f32.mrf.mxu0  ;;  %9433 = vmatprep.subr.bf16.mxu0 %v9852_v2 }
 0x1da   : > { %v5092_v19 = vpop.permute.xlu0 %5091  ;;  %v10936_v48 = vpop.permute.xlu1 %5169 }
 0x1db   : > { %v2054_v18 = vpop.f32.mrf.mxu0  ;;  %v2104_v22 = vpop.f32.mrf.mxu1  ;;  %9418 = vmatmul.mubr.msk.bf16.vlgmr.msra.gmra.mxu1 %vm237_vm2, %v10776_v20 }
 0x1dc   : > { %v10841_v24 = vadd.f32 %v2104_v22, %v10673_v59  ;;  %9428 = vmatpush3.bf16.msra.mxu1 %v4670_v11  ;;  %9429 = vmatprep.mubr.msk.bf16.mxu1 %vm9853_vm0, %v9852_v2  ;;  %v5094_v22 = vsel %vm241_vm1, %v5092_v19, 0 }
 0x1dd   : > { %v9126_v55 = vpop.f32.mrf.mxu0  ;;  %v9131_v49 = vpop.f32.mrf.mxu1  ;;  %9439 = vmatprep.subr.bf16.mxu1 %v9852_v2 }
 0x1de   : > { %v8449_v55 = vld [vmem:[%s9911_s20 + $0x4] sm:$0x3] }
 0x1df   : > { %v2107_v60 = vpop.f32.mrf.mxu1  ;;  %v2157_v35 = vpop.f32.mrf.mxu0  ;;  %9424 = vmatmul.mubr.msk.bf16.vlgmr.msra.gmra.mxu0 %vm237_vm2, %v10776_v20 }
 0x1e0   : > { %v10850_v38 = vadd.f32 %v2157_v35, %v10686_v6  ;;  %9434 = vmatpush3.bf16.msra.mxu0 %v4723_v25  ;;  %9435 = vmatprep.mubr.msk.bf16.mxu0 %vm9853_vm0, %v9852_v2  ;;  %v5175_v35 = vsel %vm241_vm1, %v8449_v55, 0 }
 0x1e1   : > { %v9132_v59 = vpop.f32.mrf.mxu1  ;;  %v9137_v41 = vpop.f32.mrf.mxu0  ;;  %9445 = vmatprep.subr.bf16.mxu0 %v9852_v2 }
 0x1e2   : > { %v8450_v59 = vld [vmem:[%s9911_s20 + $0x6] sm:$0x3] }
 0x1e3   : > { %v2160_v26 = vpop.f32.mrf.mxu0  ;;  %v2210_v44 = vpop.f32.mrf.mxu1  ;;  %9430 = vmatmul.mubr.msk.bf16.vlgmr.msra.gmra.mxu1 %vm237_vm2, %v10776_v20 }
 0x1e4   : > { %v10859_v45 = vadd.f32 %v2210_v44, %v10697_v53  ;;  %9440 = vmatpush3.bf16.msra.mxu1 %v4776_v36  ;;  %9441 = vmatprep.mubr.msk.bf16.mxu1 %vm9853_vm0, %v9852_v2  ;;  %v5218_v44 = vsel %vm241_vm1, %v8450_v59, 0 }
 0x1e5   : > { %v9138_v6 = vpop.f32.mrf.mxu0  ;;  %v9143_v62 = vpop.f32.mrf.mxu1  ;;  %9451 = vmatprep.subr.bf16.mxu1 %v9852_v2 }
 0x1e6   : > { %v8451_v6 = vld [vmem:[%s9911_s20 + $0x8] sm:$0x3] }
 0x1e7   : > { %v2213_v29 = vpop.f32.mrf.mxu1  ;;  %v2263_v33 = vpop.f32.mrf.mxu0  ;;  %9436 = vmatmul.mubr.msk.bf16.vlgmr.msra.gmra.mxu0 %vm237_vm2, %v10776_v20 }
 0x1e8   : > { %v10868_v17 = vadd.f32 %v2263_v33, %v10706_v32  ;;  %9446 = vmatpush3.bf16.msra.mxu0 %v4829_v21  ;;  %9447 = vmatprep.mubr.msk.bf16.mxu0 %vm9853_vm0, %v9852_v2 }
 0x1e9   : > { %v9144_v53 = vpop.f32.mrf.mxu1  ;;  %v9149_v50 = vpop.f32.mrf.mxu0  ;;  %9457 = vmatprep.subr.bf16.mxu0 %v9852_v2 }
 0x1ea   : > { %v5261_v53 = vsel %vm241_vm1, %v8451_v6, 0  ;;  %v8452_v50 = vld [vmem:[%s9911_s20 + $0xa] sm:$0x3] }
 0x1eb   : > { %v2266_v52 = vpop.f32.mrf.mxu0  ;;  %v2316_v30 = vpop.f32.mrf.mxu1  ;;  %9442 = vmatmul.mubr.msk.bf16.vlgmr.msra.gmra.mxu1 %vm237_vm2, %v10776_v20 }
 0x1ec   : > { %v10877_v7 = vadd.f32 %v2316_v30, %v10715_v5  ;;  %9452 = vmatpush3.bf16.msra.mxu1 %v4882_v51  ;;  %9453 = vmatprep.mubr.msk.bf16.mxu1 %vm9853_vm0, %v9852_v2  ;;  %v5304_v30 = vsel %vm241_vm1, %v8452_v50, 0 }
 0x1ed   : > { %v9150_v32 = vpop.f32.mrf.mxu0  ;;  %v9155_v27 = vpop.f32.mrf.mxu1  ;;  %9463 = vmatprep.subr.bf16.mxu1 %v9852_v2 }
 0x1ee   : > { %v8453_v32 = vld [vmem:[%s9911_s20 + $0xc] sm:$0x3] }
 0x1ef   : > { %v2319_v40 = vpop.f32.mrf.mxu1  ;;  %v2369_v58 = vpop.f32.mrf.mxu0  ;;  %9448 = vmatmul.mubr.msk.bf16.vlgmr.msra.gmra.mxu0 %vm237_vm2, %v10776_v20 }
 0x1f0   : > { %v10886_v39 = vadd.f32 %v2369_v58, %v10725_v13  ;;  %9458 = vmatpush3.bf16.msra.mxu0 %v4935_v57  ;;  %9459 = vmatprep.mubr.msk.bf16.mxu0 %vm9853_vm0, %v9852_v2  ;;  %v5347_v58 = vsel %vm241_vm1, %v8453_v32, 0 }
 0x1f1   : > { %v9156_v5 = vpop.f32.mrf.mxu1  ;;  %v9161_v63 = vpop.f32.mrf.mxu0  ;;  %9469 = vmatprep.subr.bf16.mxu0 %v9852_v2 }
 0x1f2   : > { %v8454_v5 = vld [vmem:[%s9911_s20 + $0xe] sm:$0x3] }
 0x1f3   : > { %v2372_v54 = vpop.f32.mrf.mxu0  ;;  %v2422_v4 = vpop.f32.mrf.mxu1  ;;  %9454 = vmatmul.mubr.msk.bf16.vlgmr.msra.gmra.mxu1 %vm237_vm2, %v10776_v20 }
 0x1f4   : > { %v10895_v46 = vadd.f32 %v2422_v4, %v10736_v56  ;;  %9464 = vmatpush3.bf16.msra.mxu1 %v4988_v37  ;;  %9465 = vmatprep.mubr.msk.bf16.mxu1 %vm9853_vm0, %v9852_v2  ;;  %v5390_v4 = vsel %vm241_vm1, %v8454_v5, 0 }
 0x1f5   : > { %v9162_v13 = vpop.f32.mrf.mxu0  ;;  %v9167_v9 = vpop.f32.mrf.mxu1  ;;  %9475 = vmatprep.subr.bf16.mxu1 %v9852_v2 }
 0x1f6   : > { %v8455_v13 = vld [vmem:[%s9911_s20 + $0x10] sm:$0x3] }
 0x1f7   : > { %v2425_v14 = vpop.f32.mrf.mxu1  ;;  %v2475_v11 = vpop.f32.mrf.mxu0  ;;  %9460 = vmatmul.mubr.msk.bf16.vlgmr.msra.gmra.mxu0 %vm237_vm2, %v10776_v20 }
 0x1f8   : > { %v10904_v56 = vadd.f32 %v2475_v11, %v10747_v0  ;;  %9470 = vmatpush3.bf16.msra.mxu0 %v5041_v8  ;;  %9471 = vmatprep.mubr.msk.bf16.mxu0 %vm9853_vm0, %v9852_v2  ;;  %v5433_v11 = vsel %vm241_vm1, %v8455_v13, 0 }
 0x1f9   : > { %v9168_v10 = vpop.f32.mrf.mxu1  ;;  %v9173_v18 = vpop.f32.mrf.mxu0  ;;  %9481 = vmatprep.subr.bf16.mxu0 %v9852_v2 }
 0x1fa   : > { %v8456_v10 = vld [vmem:[%s9911_s20 + $0x12] sm:$0x3] }
 0x1fb   : > { %v2478_v49 = vpop.f32.mrf.mxu0  ;;  %v2528_v25 = vpop.f32.mrf.mxu1  ;;  %9466 = vmatmul.mubr.msk.bf16.vlgmr.msra.gmra.mxu1 %vm237_vm2, %v10776_v20 }
 0x1fc   : > { %v10914_v0 = vadd.f32 %v2528_v25, %v10758_v61  ;;  %9476 = vmatpush3.bf16.msra.mxu1 %v5094_v22  ;;  %9477 = vmatprep.mubr.msk.bf16.mxu1 %vm9853_vm0, %v9852_v2  ;;  %v5476_v25 = vsel %vm241_vm1, %v8456_v10, 0 }
 0x1fd   : > { %v9174_v28 = vpop.f32.mrf.mxu0  ;;  %v9179_v60 = vpop.f32.mrf.mxu1  ;;  %9487 = vmatprep.subr.bf16.mxu1 %v9852_v2 }
 0x1fe   : > { %v8457_v28 = vld [vmem:[%s9911_s20 + $0x14] sm:$0x3] }
 0x1ff   : > { %v2531_v41 = vpop.f32.mrf.mxu1  ;;  %v2581_v36 = vpop.f32.mrf.mxu0  ;;  %9472 = vmatmul.mubr.msk.bf16.vlgmr.msra.gmra.mxu0 %vm237_vm2, %v10776_v20 }
 0x200   : > { %v10924_v61 = vadd.f32 %v2581_v36, %v10769_v16  ;;  %9482 = vmatpush3.bf16.msra.mxu0 %v5175_v35  ;;  %9483 = vmatprep.mubr.msk.bf16.mxu0 %vm9853_vm0, %v9852_v2  ;;  %v5519_v36 = vsel %vm241_vm1, %v8457_v28, 0 }
 0x201   : > { %v9180_v15 = vpop.f32.mrf.mxu1  ;;  %v9185_v26 = vpop.f32.mrf.mxu0  ;;  %9493 = vmatprep.subr.bf16.mxu0 %v9852_v2 }
 0x202   : > { %v8458_v15 = vld [vmem:[%s9911_s20 + $0x16] sm:$0x3] }
 0x203   : > { %v2584_v62 = vpop.f32.mrf.mxu0  ;;  %v2634_v21 = vpop.f32.mrf.mxu1  ;;  %9478 = vmatmul.mubr.msk.bf16.vlgmr.msra.gmra.mxu1 %vm237_vm2, %v10776_v20 }
 0x204   : > { %v10934_v16 = vadd.f32 %v2634_v21, %v10782_v42  ;;  %9488 = vmatpush3.bf16.msra.mxu1 %v5218_v44  ;;  %9489 = vmatprep.mubr.msk.bf16.mxu1 %vm9853_vm0, %v9852_v2  ;;  %v5562_v21 = vsel %vm241_vm1, %v8458_v15, 0 }
 0x205   : > { %v9186_v29 = vpop.f32.mrf.mxu0  ;;  %v9191_v33 = vpop.f32.mrf.mxu1  ;;  %9499 = vmatprep.subr.bf16.mxu1 %v9852_v2 }
 0x206   : > { %v8459_v29 = vld [vmem:[%s9911_s20 + $0x18] sm:$0x3] }
 0x207   : > { %v2637_v51 = vpop.f32.mrf.mxu1  ;;  %v2715_v31 = vpop.f32.mrf.mxu0  ;;  %9484 = vmatmul.mubr.msk.bf16.vlgmr.msra.gmra.mxu0 %vm237_vm2, %v10936_v48 }
 0x208   : > { %v10946_v20 = vadd.f32 %v2715_v31, %v10794_v3  ;;  %9494 = vmatpush3.bf16.msra.mxu0 %v5261_v53  ;;  %9495 = vmatprep.mubr.msk.bf16.mxu0 %vm9853_vm0, %v9852_v2  ;;  %v5605_v31 = vsel %vm241_vm1, %v8459_v29, 0 }
 0x209   : > { %v9192_v42 = vpop.f32.mrf.mxu1  ;;  %v9197_v52 = vpop.f32.mrf.mxu0  ;;  %9505 = vmatprep.subr.bf16.mxu0 %v9852_v2 }
 0x20a   : > { %v8460_v42 = vld [vmem:[%s9911_s20 + $0x1a] sm:$0x3] }
 0x20b   : > { %v2718_v27 = vpop.f32.mrf.mxu0  ;;  %v2758_v57 = vpop.f32.mrf.mxu1  ;;  %9490 = vmatmul.mubr.msk.bf16.vlgmr.msra.gmra.mxu1 %vm237_vm2, %v10936_v48 }
 0x20c   : > { %v10956_v3 = vadd.f32 %v2758_v57, %v10805_v12  ;;  %9500 = vmatpush3.bf16.msra.mxu1 %v5304_v30  ;;  %9501 = vmatprep.mubr.msk.bf16.mxu1 %vm9853_vm0, %v9852_v2  ;;  %v5648_v57 = vsel %vm241_vm1, %v8460_v42, 0 }
 0x20d   : > { %v9198_v34 = vpop.f32.mrf.mxu0  ;;  %v9203_v40 = vpop.f32.mrf.mxu1  ;;  %9511 = vmatprep.subr.bf16.mxu1 %v9852_v2 }
 0x20e   : > { %v8461_v34 = vld [vmem:[%s9911_s20 + $0x1c] sm:$0x3] }
 0x20f   : > { %v2761_v63 = vpop.f32.mrf.mxu1  ;;  %v2801_v37 = vpop.f32.mrf.mxu0  ;;  %9496 = vmatmul.mubr.msk.bf16.vlgmr.msra.gmra.mxu0 %vm237_vm2, %v10936_v48 }
 0x210   : > { %v10966_v12 = vadd.f32 %v2801_v37, %v10814_v1  ;;  %9506 = vmatpush3.bf16.msra.mxu0 %v5347_v58  ;;  %9507 = vmatprep.mubr.msk.bf16.mxu0 %vm9853_vm0, %v9852_v2  ;;  %v5691_v37 = vsel %vm241_vm1, %v8461_v34, 0 }
 0x211   : > { %v9204_v23 = vpop.f32.mrf.mxu1  ;;  %v9209_v54 = vpop.f32.mrf.mxu0  ;;  %9517 = vmatprep.subr.bf16.mxu0 %v9852_v2 }
 0x212   : > { %v8462_v23 = vld [vmem:[%s9911_s20 + $0x1e] sm:$0x3] }
 0x213   : > { %v2804_v9 = vpop.f32.mrf.mxu0  ;;  %v2844_v8 = vpop.f32.mrf.mxu1  ;;  %9502 = vmatmul.mubr.msk.bf16.vlgmr.msra.gmra.mxu1 %vm237_vm2, %v10936_v48 }
 0x214   : > { %v10976_v1 = vadd.f32 %v2844_v8, %v10823_v47  ;;  %9512 = vmatpush3.bf16.msra.mxu1 %v5390_v4  ;;  %9513 = vmatprep.mubr.msk.bf16.mxu1 %vm9853_vm0, %v9852_v2  ;;  %v5734_v8 = vsel %vm241_vm1, %v8462_v23, 0 }
 0x215   : > { %v9210_v19 = vpop.f32.mrf.mxu0  ;;  %v9215_v14 = vpop.f32.mrf.mxu1  ;;  %9523 = vmatprep.subr.bf16.mxu1 %v9852_v2 }
 0x216   : > { %v8463_v19 = vld [vmem:[%s9911_s20 + $0x20] sm:$0x3] }
 0x217   : > { %v2847_v18 = vpop.f32.mrf.mxu1  ;;  %v2887_v22 = vpop.f32.mrf.mxu0  ;;  %9508 = vmatmul.mubr.msk.bf16.vlgmr.msra.gmra.mxu0 %vm237_vm2, %v10936_v48 }
 0x218   : > { %v10986_v47 = vadd.f32 %v2887_v22, %v10832_v43  ;;  %9518 = vmatpush3.bf16.msra.mxu0 %v5433_v11  ;;  %9519 = vmatprep.mubr.msk.bf16.mxu0 %vm9853_vm0, %v9852_v2  ;;  %v5777_v22 = vsel %vm241_vm1, %v8463_v19, 0 }
 0x219   : > { %v9216_v55 = vpop.f32.mrf.mxu1  ;;  %v9221_v49 = vpop.f32.mrf.mxu0  ;;  %9529 = vmatprep.subr.bf16.mxu0 %v9852_v2 }
 0x21a   : > { %v8464_v55 = vld [vmem:[%s9911_s20 + $0x22] sm:$0x3] }
 0x21b   : > { %v2890_v60 = vpop.f32.mrf.mxu0  ;;  %v2930_v35 = vpop.f32.mrf.mxu1  ;;  %9514 = vmatmul.mubr.msk.bf16.vlgmr.msra.gmra.mxu1 %vm237_vm2, %v10936_v48 }
 0x21c   : > { %v10996_v43 = vadd.f32 %v2930_v35, %v10841_v24  ;;  %9524 = vmatpush3.bf16.msra.mxu1 %v5476_v25  ;;  %9525 = vmatprep.mubr.msk.bf16.mxu1 %vm9853_vm0, %v9852_v2  ;;  %v5820_v35 = vsel %vm241_vm1, %v8464_v55, 0 }
 0x21d   : > { %v9222_v59 = vpop.f32.mrf.mxu0  ;;  %v9227_v41 = vpop.f32.mrf.mxu1  ;;  %9535 = vmatprep.subr.bf16.mxu1 %v9852_v2 }
 0x21e   : > { %v5905_v59 = vpop.permute.xlu0 %5904 }
 0x21f   : > { %v2933_v26 = vpop.f32.mrf.mxu1  ;;  %v2973_v44 = vpop.f32.mrf.mxu0  ;;  %9520 = vmatmul.mubr.msk.bf16.vlgmr.msra.gmra.mxu0 %vm237_vm2, %v10936_v48 }
 0x220   : > { %v11006_v24 = vadd.f32 %v2973_v44, %v10850_v38  ;;  %9530 = vmatpush3.bf16.msra.mxu0 %v5519_v36  ;;  %9531 = vmatprep.mubr.msk.bf16.mxu0 %vm9853_vm0, %v9852_v2 }
 0x221   : > { %v9228_v6 = vpop.f32.mrf.mxu1  ;;  %v9233_v62 = vpop.f32.mrf.mxu0  ;;  %9541 = vmatprep.subr.bf16.mxu0 %v9852_v2 }
 0x222   : > { %v5910_v6 = vsel %vm241_vm1, %v5905_v59, 0 }
 0x223   : > { %v2976_v33 = vpop.f32.mrf.mxu0  ;;  %v3016_v53 = vpop.f32.mrf.mxu1  ;;  %9526 = vmatmul.mubr.msk.bf16.vlgmr.msra.gmra.mxu1 %vm237_vm2, %v10936_v48 }
 0x224   : > { %v11016_v38 = vadd.f32 %v3016_v53, %v10859_v45  ;;  %9536 = vmatpush3.bf16.msra.mxu1 %v5562_v21  ;;  %9537 = vmatprep.mubr.msk.bf16.mxu1 %vm9853_vm0, %v9852_v2 }
 0x225   : > { %v9234_v50 = vpop.f32.mrf.mxu0  ;;  %v9239_v51 = vpop.f32.mrf.mxu1  ;;  %9547 = vmatprep.subr.bf16.mxu1 %v9852_v2 }
 0x226   : > { %v11090_v50 = vpop.permute.xlu0 %5894 }
 0x227   : > { %v3019_v52 = vpop.f32.mrf.mxu1  ;;  %v3059_v30 = vpop.f32.mrf.mxu0  ;;  %9532 = vmatmul.mubr.msk.bf16.vlgmr.msra.gmra.mxu0 %vm237_vm2, %v10936_v48 }
 0x228   : > { %v11026_v45 = vadd.f32 %v3059_v30, %v10868_v17  ;;  %9542 = vmatpush3.bf16.msra.mxu0 %v5605_v31  ;;  %9543 = vmatprep.mubr.msk.bf16.mxu0 %vm9853_vm0, %v9852_v2 }
 0x229   : > { %v9240_v32 = vpop.f32.mrf.mxu1  ;;  %v9245_v27 = vpop.f32.mrf.mxu0  ;;  %9553 = vmatprep.subr.bf16.mxu0 %v9852_v2 }
 0x22a   : > { %v6067_v27 = vpop.permute.xlu0 %6066 }
 0x22b   : > { %v3062_v40 = vpop.f32.mrf.mxu0  ;;  %v3102_v58 = vpop.f32.mrf.mxu1  ;;  %9538 = vmatmul.mubr.msk.bf16.vlgmr.msra.gmra.mxu1 %vm237_vm2, %v10936_v48 }
 0x22c   : > { %v11036_v17 = vadd.f32 %v3102_v58, %v10877_v7  ;;  %9548 = vmatpush3.bf16.msra.mxu1 %v5648_v57  ;;  %9549 = vmatprep.mubr.msk.bf16.mxu1 %vm9853_vm0, %v9852_v2  ;;  %v6069_v58 = vsel %vm241_vm1, %v6067_v27, 0 }
 0x22d   : > { %v9246_v5 = vpop.f32.mrf.mxu0  ;;  %v9251_v63 = vpop.f32.mrf.mxu1  ;;  %9559 = vmatprep.subr.bf16.mxu1 %v9852_v2 }
 0x22f   : > { %v3105_v54 = vpop.f32.mrf.mxu1  ;;  %v3145_v4 = vpop.f32.mrf.mxu0  ;;  %9544 = vmatmul.mubr.msk.bf16.vlgmr.msra.gmra.mxu0 %vm237_vm2, %v10936_v48 }
 0x230   : > { %v11046_v7 = vadd.f32 %v3145_v4, %v10886_v39  ;;  %9554 = vmatpush3.bf16.msra.mxu0 %v5691_v37  ;;  %9555 = vmatprep.mubr.msk.bf16.mxu0 %vm9853_vm0, %v9852_v2 }
 0x231   : > { %v9252_v13 = vpop.f32.mrf.mxu1  ;;  %v9257_v9 = vpop.f32.mrf.mxu0  ;;  %9565 = vmatprep.subr.bf16.mxu0 %v9852_v2 }
 0x232   : > { %v9864_v13 = vmov 0   ;;  %v7648_v9 = vld [vmem:[%s11628_s2 + $0x88] sm:$0xff] }
 0x233   : > { %v3148_v14 = vpop.f32.mrf.mxu0  ;;  %v3188_v11 = vpop.f32.mrf.mxu1  ;;  %9550 = vmatmul.mubr.msk.bf16.vlgmr.msra.gmra.mxu1 %vm237_vm2, %v10936_v48  ;;  %9843 = vset.pattern.permute.xlu0 %v9864_v13 }
 0x234   : > { %v11056_v39 = vadd.f32 %v3188_v11, %v10895_v46  ;;  %9560 = vmatpush3.bf16.msra.mxu1 %v5734_v8  ;;  %9561 = vmatprep.mubr.msk.bf16.mxu1 %vm9853_vm0, %v9852_v2  ;;  %v6173_v8 = vpop.permute.xlu0 %6172 }
 0x235   : > { %v9258_v10 = vpop.f32.mrf.mxu0  ;;  %v9263_v18 = vpop.f32.mrf.mxu1  ;;  %9571 = vmatprep.subr.bf16.mxu1 %v9852_v2  ;;  %7651 = vperm.xlu0 %9843, %v7648_v9  }
 0x236   : > { %v6175_v18 = vsel %vm241_vm1, %v6173_v8, 0 }
 0x237   : > { %v3191_v49 = vpop.f32.mrf.mxu1  ;;  %v3231_v25 = vpop.f32.mrf.mxu0  ;;  %9556 = vmatmul.mubr.msk.bf16.vlgmr.msra.gmra.mxu0 %vm237_vm2, %v10936_v48 }
 0x238   : > { %v11066_v28 = vadd.f32 %v3231_v25, %v10904_v56  ;;  %9566 = vmatpush3.bf16.msra.mxu0 %v5777_v22  ;;  %9567 = vmatprep.mubr.msk.bf16.mxu0 %vm9853_vm0, %v9852_v2  ;;  %v5961_v56 = vpop.permute.xlu1 %5960 }
 0x239   : > { %v9264_v46 = vpop.f32.mrf.mxu1  ;;  %v9269_v60 = vpop.f32.mrf.mxu0  ;;  %9577 = vmatprep.subr.bf16.mxu0 %v9852_v2  ;;  %v5963_v53 = vsel %vm241_vm1, %v5961_v56, 0 }
 0x23b   : > { %v3234_v41 = vpop.f32.mrf.mxu0  ;;  %v3274_v36 = vpop.f32.mrf.mxu1  ;;  %9562 = vmatmul.mubr.msk.bf16.vlgmr.msra.gmra.mxu1 %vm237_vm2, %v10936_v48 }
 0x23c   : > { %v11075_v15 = vadd.f32 %v3274_v36, %v10914_v0  ;;  %9572 = vmatpush3.bf16.msra.mxu1 %v5820_v35  ;;  %9573 = vmatprep.mubr.msk.bf16.mxu1 %vm9853_vm0, %v9852_v2  ;;  %v6014_v51 = vpop.permute.xlu1 %6013  ;;  %v6279_v35 = vpop.permute.xlu0 %6278 }
 0x23d   : > { %v9270_v26 = vpop.f32.mrf.mxu0  ;;  %v9275_v44 = vpop.f32.mrf.mxu1  ;;  %9583 = vmatprep.subr.bf16.mxu1 %v9852_v2  ;;  %v6016_v32 = vsel %vm241_vm1, %v6014_v51, 0 }
 0x23e   : > { %v6281_v26 = vsel %vm241_vm1, %v6279_v35, 0 }
 0x23f   : > { %v3277_v62 = vpop.f32.mrf.mxu1  ;;  %v3317_v21 = vpop.f32.mrf.mxu0  ;;  %9568 = vmatmul.mubr.msk.bf16.vlgmr.msra.gmra.mxu0 %vm237_vm2, %v10936_v48 }
 0x240   : > { %v11084_v29 = vadd.f32 %v3317_v21, %v10924_v61  ;;  %9578 = vmatpush3.bf16.msra.mxu0 %v5910_v6  ;;  %9579 = vmatprep.mubr.msk.bf16.mxu0 %vm9853_vm0, %v9852_v2  ;;  %v6120_v5 = vpop.permute.xlu1 %6119 }
 0x241   : > { %v9276_v0 = vpop.f32.mrf.mxu1  ;;  %v9281_v33 = vpop.f32.mrf.mxu0  ;;  %9589 = vmatprep.subr.bf16.mxu0 %v9852_v2  ;;  %v6122_v4 = vsel %vm241_vm1, %v6120_v5, 0 }
 0x243   : > { %v3320_v31 = vpop.f32.mrf.mxu0  ;;  %v3360_v42 = vpop.f32.mrf.mxu1  ;;  %9574 = vmatmul.mubr.msk.bf16.vlgmr.msra.gmra.mxu1 %vm237_vm2, %v10936_v48 }
 0x244   : > { %v11095_v61 = vadd.f32 %v3360_v42, %v10934_v16  ;;  %9584 = vmatpush3.bf16.msra.mxu1 %v5963_v53  ;;  %9585 = vmatprep.mubr.msk.bf16.mxu1 %vm9853_vm0, %v9852_v2  ;;  %v6226_v22 = vpop.permute.xlu1 %6225  ;;  %v6385_v53 = vpop.permute.xlu0 %6384 }
 0x245   : > { %v9282_v52 = vpop.f32.mrf.mxu0  ;;  %v9287_v30 = vpop.f32.mrf.mxu1  ;;  %9595 = vmatprep.subr.bf16.mxu1 %v9852_v2  ;;  %v6228_v60 = vsel %vm241_vm1, %v6226_v22, 0 }
 0x246   : > { %v6387_v30 = vsel %vm241_vm1, %v6385_v53, 0 }
 0x247   : > { %v3363_v57 = vpop.f32.mrf.mxu1  ;;  %v3450_v34 = vpop.f32.mrf.mxu0  ;;  %9580 = vmatmul.mubr.msk.bf16.vlgmr.msra.gmra.mxu0 %vm237_vm2, %v11090_v50 }
 0x248   : > { %v11104_v48 = vadd.f32 %v3450_v34, %v10946_v20  ;;  %9590 = vmatpush3.bf16.msra.mxu0 %v6016_v32  ;;  %9591 = vmatprep.mubr.msk.bf16.mxu0 %vm9853_vm0, %v9852_v2  ;;  %v6332_v44 = vpop.permute.xlu1 %6331 }
 0x249   : > { %v9288_v16 = vpop.f32.mrf.mxu1  ;;  %v9293_v40 = vpop.f32.mrf.mxu0  ;;  %9601 = vmatprep.subr.bf16.mxu0 %v9852_v2  ;;  %v6334_v33 = vsel %vm241_vm1, %v6332_v44, 0 }
 0x24b   : > { %v3453_v63 = vpop.f32.mrf.mxu0  ;;  %v3503_v37 = vpop.f32.mrf.mxu1  ;;  %9586 = vmatmul.mubr.msk.bf16.vlgmr.msra.gmra.mxu1 %vm237_vm2, %v11090_v50 }
 0x24c   : > { %v11113_v23 = vadd.f32 %v3503_v37, %v10956_v3  ;;  %9596 = vmatpush3.bf16.msra.mxu1 %v6069_v58  ;;  %9597 = vmatprep.mubr.msk.bf16.mxu1 %vm9853_vm0, %v9852_v2  ;;  %v6438_v32 = vpop.permute.xlu1 %6437  ;;  %v6491_v58 = vpop.permute.xlu0 %6490 }
 0x24d   : > { %v9294_v20 = vpop.f32.mrf.mxu0  ;;  %v9299_v54 = vpop.f32.mrf.mxu1  ;;  %9607 = vmatprep.subr.bf16.mxu1 %v9852_v2  ;;  %v6440_v40 = vsel %vm241_vm1, %v6438_v32, 0 }
 0x24e   : > { %v6493_v54 = vsel %vm241_vm1, %v6491_v58, 0 }
 0x24f   : > { %v3506_v3 = vpop.f32.mrf.mxu1  ;;  %v3556_v19 = vpop.f32.mrf.mxu0  ;;  %9592 = vmatmul.mubr.msk.bf16.vlgmr.msra.gmra.mxu0 %vm237_vm2, %v11090_v50 }
 0x250   : > { %v11125_v14 = vadd.f32 %v3556_v19, %v10966_v12  ;;  %9602 = vmatpush3.bf16.msra.mxu0 %v6122_v4  ;;  %9603 = vmatprep.mubr.msk.bf16.mxu0 %vm9853_vm0, %v9852_v2  ;;  %v6544_v4 = vpop.permute.xlu1 %6543 }
 0x251   : > { %v9300_v11 = vpop.f32.mrf.mxu1  ;;  %v9305_v10 = vpop.f32.mrf.mxu0  ;;  %9613 = vmatprep.subr.bf16.mxu0 %v9852_v2  ;;  %v6546_v19 = vsel %vm241_vm1, %v6544_v4, 0 }
 0x252   : > { %v6597_v11 = vpop.permute.xlu0 %6596 }
 0x253   : > { %v3559_v55 = vpop.f32.mrf.mxu0  ;;  %v3609_v49 = vpop.f32.mrf.mxu1  ;;  %9598 = vmatmul.mubr.msk.bf16.vlgmr.msra.gmra.mxu1 %vm237_vm2, %v11090_v50 }
 0x254   : > { %v11134_v25 = vadd.f32 %v3609_v49, %v10976_v1  ;;  %9608 = vmatpush3.bf16.msra.mxu1 %v6175_v18  ;;  %9609 = vmatprep.mubr.msk.bf16.mxu1 %vm9853_vm0, %v9852_v2  ;;  %v6599_v49 = vsel %vm241_vm1, %v6597_v11, 0 }
 0x255   : > { %v9306_v12 = vpop.f32.mrf.mxu0  ;;  %v9311_v46 = vpop.f32.mrf.mxu1  ;;  %9619 = vmatprep.subr.bf16.mxu1 %v9852_v2 }
 0x256   : > { %v6650_v12 = vpop.permute.xlu1 %6649 }
 0x257   : > { %v3612_v59 = vpop.f32.mrf.mxu1  ;;  %v3662_v41 = vpop.f32.mrf.mxu0  ;;  %9604 = vmatmul.mubr.msk.bf16.vlgmr.msra.gmra.mxu0 %vm237_vm2, %v11090_v50 }
 0x258   : > { %v11143_v36 = vadd.f32 %v3662_v41, %v10986_v47  ;;  %9614 = vmatpush3.bf16.msra.mxu0 %v6228_v60  ;;  %9615 = vmatprep.mubr.msk.bf16.mxu0 %vm9853_vm0, %v9852_v2  ;;  %v6652_v41 = vsel %vm241_vm1, %v6650_v12, 0 }
 0x259   : > { %v9312_v1 = vpop.f32.mrf.mxu1  ;;  %v9317_v56 = vpop.f32.mrf.mxu0  ;;  %9625 = vmatprep.subr.bf16.mxu0 %v9852_v2 }
 0x25a   : > { %v6703_v1 = vpop.permute.xlu0 %6702 }
 0x25b   : > { %v3665_v6 = vpop.f32.mrf.mxu0  ;;  %v3715_v62 = vpop.f32.mrf.mxu1  ;;  %9610 = vmatmul.mubr.msk.bf16.vlgmr.msra.gmra.mxu1 %vm237_vm2, %v11090_v50 }
 0x25c   : > { %v11152_v21 = vadd.f32 %v3715_v62, %v10996_v43  ;;  %9620 = vmatpush3.bf16.msra.mxu1 %v6281_v26  ;;  %9621 = vmatprep.mubr.msk.bf16.mxu1 %vm9853_vm0, %v9852_v2  ;;  %v6705_v62 = vsel %vm241_vm1, %v6703_v1, 0 }
 0x25d   : > { %v9318_v47 = vpop.f32.mrf.mxu0  ;;  %v9323_v0 = vpop.f32.mrf.mxu1  ;;  %9631 = vmatprep.subr.bf16.mxu1 %v9852_v2 }
 0x25e   : > { %v6790_v47 = vpop.permute.xlu1 %6789 }
 0x25f   : > { %v3718_v51 = vpop.f32.mrf.mxu1  ;;  %v3768_v31 = vpop.f32.mrf.mxu0  ;;  %9616 = vmatmul.mubr.msk.bf16.vlgmr.msra.gmra.mxu0 %vm237_vm2, %v11090_v50 }
 0x260   : > { %v11161_v42 = vadd.f32 %v3768_v31, %v11006_v24  ;;  %9626 = vmatpush3.bf16.msra.mxu0 %v6334_v33  ;;  %9627 = vmatprep.mubr.msk.bf16.mxu0 %vm9853_vm0, %v9852_v2 }
 0x261   : > { %v9324_v43 = vpop.f32.mrf.mxu1  ;;  %v9329_v52 = vpop.f32.mrf.mxu0  ;;  %9637 = vmatprep.subr.bf16.mxu0 %v9852_v2 }
 0x262   : > { %v6795_v43 = vsel %vm241_vm1, %v6790_v47, 0 }
 0x263   : > { %v3771_v27 = vpop.f32.mrf.mxu0  ;;  %v3821_v57 = vpop.f32.mrf.mxu1  ;;  %9622 = vmatmul.mubr.msk.bf16.vlgmr.msra.gmra.mxu1 %vm237_vm2, %v11090_v50 }
 0x264   : > { %v11170_v34 = vadd.f32 %v3821_v57, %v11016_v38  ;;  %9632 = vmatpush3.bf16.msra.mxu1 %v6387_v30  ;;  %9633 = vmatprep.mubr.msk.bf16.mxu1 %vm9853_vm0, %v9852_v2 }
 0x265   : > { %v9330_v24 = vpop.f32.mrf.mxu0  ;;  %v9335_v16 = vpop.f32.mrf.mxu1  ;;  %9643 = vmatprep.subr.bf16.mxu1 %v9852_v2 }
 0x266   : > { %v11239_v24 = vpop.permute.xlu1 %6779 }
 0x267   : > { %v3824_v5 = vpop.f32.mrf.mxu1  ;;  %v3874_v63 = vpop.f32.mrf.mxu0  ;;  %9628 = vmatmul.mubr.msk.bf16.vlgmr.msra.gmra.mxu0 %vm237_vm2, %v11090_v50 }
 0x268   : > { %v11179_v37 = vadd.f32 %v3874_v63, %v11026_v45  ;;  %9638 = vmatpush3.bf16.msra.mxu0 %v6440_v40  ;;  %9639 = vmatprep.mubr.msk.bf16.mxu0 %vm9853_vm0, %v9852_v2 }
 0x269   : > { %v9336_v38 = vpop.f32.mrf.mxu1  ;;  %v9341_v20 = vpop.f32.mrf.mxu0  ;;  %9649 = vmatprep.subr.bf16.mxu0 %v9852_v2 }
 0x26a   : > { %v6952_v20 = vpop.permute.xlu1 %6951 }
 0x26b   : > { %v3877_v13 = vpop.f32.mrf.mxu0  ;;  %v3927_v9 = vpop.f32.mrf.mxu1  ;;  %9634 = vmatmul.mubr.msk.bf16.vlgmr.msra.gmra.mxu1 %vm237_vm2, %v11090_v50 }
 0x26c   : > { %v11188_v8 = vadd.f32 %v3927_v9, %v11036_v17  ;;  %9644 = vmatpush3.bf16.msra.mxu1 %v6493_v54  ;;  %9645 = vmatprep.mubr.msk.bf16.mxu1 %vm9853_vm0, %v9852_v2  ;;  %v6954_v9 = vsel %vm241_vm1, %v6952_v20, 0 }
 0x26d   : > { %v9342_v45 = vpop.f32.mrf.mxu0  ;;  %v9347_v3 = vpop.f32.mrf.mxu1  ;;  %9655 = vmatprep.subr.bf16.mxu1 %v9852_v2 }
 0x26f   : > { %v3930_v10 = vpop.f32.mrf.mxu1  ;;  %v3980_v18 = vpop.f32.mrf.mxu0  ;;  %9640 = vmatmul.mubr.msk.bf16.vlgmr.msra.gmra.mxu0 %vm237_vm2, %v11090_v50 }
 0x270   : > { %v11197_v22 = vadd.f32 %v3980_v18, %v11046_v7  ;;  %9650 = vmatpush3.bf16.msra.mxu0 %v6546_v19  ;;  %9651 = vmatprep.mubr.msk.bf16.mxu0 %vm9853_vm0, %v9852_v2 }
 0x271   : > { %v9348_v17 = vpop.f32.mrf.mxu1  ;;  %v9353_v55 = vpop.f32.mrf.mxu0  ;;  %9661 = vmatprep.subr.bf16.mxu0 %v9852_v2 }
 0x272   : > { %v7058_v17 = vpop.permute.xlu1 %7057 }
 0x273   : > { %v3983_v46 = vpop.f32.mrf.mxu0  ;;  %v4033_v60 = vpop.f32.mrf.mxu1  ;;  %9646 = vmatmul.mubr.msk.bf16.vlgmr.msra.gmra.mxu1 %vm237_vm2, %v11090_v50 }
 0x274   : > { %v11206_v35 = vadd.f32 %v4033_v60, %v11056_v39  ;;  %9656 = vmatpush3.bf16.msra.mxu1 %v6599_v49  ;;  %9657 = vmatprep.mubr.msk.bf16.mxu1 %vm9853_vm0, %v9852_v2  ;;  %v7060_v60 = vsel %vm241_vm1, %v7058_v17, 0 }
 0x275   : > { %v9354_v7 = vpop.f32.mrf.mxu0  ;;  %v9359_v59 = vpop.f32.mrf.mxu1  ;;  %9667 = vmatprep.subr.bf16.mxu1 %v9852_v2 }
 0x277   : > { %v4036_v56 = vpop.f32.mrf.mxu1  ;;  %v4086_v26 = vpop.f32.mrf.mxu0  ;;  %9652 = vmatmul.mubr.msk.bf16.vlgmr.msra.gmra.mxu0 %vm237_vm2, %v11090_v50 }
 0x278   : > { %v11215_v44 = vadd.f32 %v4086_v26, %v11066_v28  ;;  %9662 = vmatpush3.bf16.msra.mxu0 %v6652_v41  ;;  %9663 = vmatprep.mubr.msk.bf16.mxu0 %vm9853_vm0, %v9852_v2  ;;  %v6846_v28 = vpop.permute.xlu0 %6845 }
 0x279   : > { %v9360_v39 = vpop.f32.mrf.mxu1  ;;  %v9365_v6 = vpop.f32.mrf.mxu0  ;;  %9673 = vmatprep.subr.bf16.mxu0 %v9852_v2  ;;  %v6848_v57 = vsel %vm241_vm1, %v6846_v28, 0 }
 0x27a   : > { %v7164_v39 = vpop.permute.xlu1 %7163 }
 0x27b   : > { %v4089_v0 = vpop.f32.mrf.mxu0  ;;  %v4139_v33 = vpop.f32.mrf.mxu1  ;;  %9658 = vmatmul.mubr.msk.bf16.vlgmr.msra.gmra.mxu1 %vm237_vm2, %v11090_v50 }
 0x27c   : > { %v11224_v53 = vadd.f32 %v4139_v33, %v11075_v15  ;;  %9668 = vmatpush3.bf16.msra.mxu1 %v6705_v62  ;;  %9669 = vmatprep.mubr.msk.bf16.mxu1 %vm9853_vm0, %v9852_v2  ;;  %v6899_v16 = vpop.permute.xlu0 %6898  ;;  %v7166_v33 = vsel %vm241_vm1, %v7164_v39, 0 }
 0x27d   : > { %v9366_v51 = vpop.f32.mrf.mxu0  ;;  %v9371_v31 = vpop.f32.mrf.mxu1  ;;  %9679 = vmatprep.subr.bf16.mxu1 %v9852_v2  ;;  %v6901_v38 = vsel %vm241_vm1, %v6899_v16, 0 }
 0x27f   : > { %v4142_v52 = vpop.f32.mrf.mxu1  ;;  %v4192_v30 = vpop.f32.mrf.mxu0  ;;  %9664 = vmatmul.mubr.msk.bf16.vlgmr.msra.gmra.mxu0 %vm237_vm2, %v11090_v50 }
 0x280   : > { %v11233_v32 = vadd.f32 %v4192_v30, %v11084_v29  ;;  %9674 = vmatpush3.bf16.msra.mxu0 %v6795_v43  ;;  %9675 = vmatprep.mubr.msk.bf16.mxu0 %vm9853_vm0, %v9852_v2  ;;  %v7005_v45 = vpop.permute.xlu0 %7004 }
 0x281   : > { %v9372_v15 = vpop.f32.mrf.mxu1  ;;  %v9377_v27 = vpop.f32.mrf.mxu0  ;;  %9685 = vmatprep.subr.bf16.mxu0 %v9852_v2  ;;  %v7007_v18 = vsel %vm241_vm1, %v7005_v45, 0 }
 0x282   : > { %v7270_v15 = vpop.permute.xlu1 %7269 }
 0x283   : > { %v4195_v40 = vpop.f32.mrf.mxu0  ;;  %v4245_v58 = vpop.f32.mrf.mxu1  ;;  %9670 = vmatmul.mubr.msk.bf16.vlgmr.msra.gmra.mxu1 %vm237_vm2, %v11090_v50 }
 0x284   : > { %v11244_v29 = vadd.f32 %v4245_v58, %v11095_v61  ;;  %9680 = vmatpush3.bf16.msra.mxu1 %v6848_v57  ;;  %9681 = vmatprep.mubr.msk.bf16.mxu1 %vm9853_vm0, %v9852_v2  ;;  %v7111_v7 = vpop.permute.xlu0 %7110  ;;  %v7272_v58 = vsel %vm241_vm1, %v7270_v15, 0 }
 0x285   : > { %v9378_v5 = vpop.f32.mrf.mxu0  ;;  %v9383_v63 = vpop.f32.mrf.mxu1  ;;  %9691 = vmatprep.subr.bf16.mxu1 %v9852_v2  ;;  %v7113_v26 = vsel %vm241_vm1, %v7111_v7, 0 }
 0x287   : > { %v4248_v54 = vpop.f32.mrf.mxu1  ;;  %v4335_v4 = vpop.f32.mrf.mxu0  ;;  %9676 = vmatmul.mubr.msk.bf16.vlgmr.msra.gmra.mxu0 %vm237_vm2, %v11239_v24 }
 0x288   : > { %v11253_v50 = vadd.f32 %v4335_v4, %v11104_v48  ;;  %9686 = vmatpush3.bf16.msra.mxu0 %v6901_v38  ;;  %9687 = vmatprep.mubr.msk.bf16.mxu0 %vm9853_vm0, %v9852_v2  ;;  %v7217_v28 = vpop.permute.xlu0 %7216 }
 0x289   : > { %v9384_v61 = vpop.f32.mrf.mxu1  ;;  %v9389_v13 = vpop.f32.mrf.mxu0  ;;  %9697 = vmatprep.subr.bf16.mxu0 %v9852_v2  ;;  %v7219_v30 = vsel %vm241_vm1, %v7217_v28, 0 }
 0x28a   : > { %v7376_v61 = vpop.permute.xlu1 %7375 }
 0x28b   : > { %v4338_v3 = vpop.f32.mrf.mxu0  ;;  %v4388_v19 = vpop.f32.mrf.mxu1  ;;  %9682 = vmatmul.mubr.msk.bf16.vlgmr.msra.gmra.mxu1 %vm237_vm2, %v11239_v24 }
 0x28c   : > { %v11262_v11 = vadd.f32 %v4388_v19, %v11113_v23  ;;  %9692 = vmatpush3.bf16.msra.mxu1 %v6954_v9  ;;  %9693 = vmatprep.mubr.msk.bf16.mxu1 %vm9853_vm0, %v9852_v2  ;;  %v7323_v5 = vpop.permute.xlu0 %7322  ;;  %v7378_v19 = vsel %vm241_vm1, %v7376_v61, 0 }
 0x28d   : > { %v9390_v48 = vpop.f32.mrf.mxu0  ;;  %v9395_v10 = vpop.f32.mrf.mxu1  ;;  %9703 = vmatprep.subr.bf16.mxu1 %v9852_v2  ;;  %v7325_v4 = vsel %vm241_vm1, %v7323_v5, 0  ;;  %v7815_v5 = vld [vmem:[%s11377_s8 + $0x30] sm:$0xff] }
 0x28f   : > { %v4391_v55 = vpop.f32.mrf.mxu1  ;;  %v4441_v49 = vpop.f32.mrf.mxu0  ;;  %9688 = vmatmul.mubr.msk.bf16.vlgmr.msra.gmra.mxu0 %vm237_vm2, %v11239_v24 }
 0x290   : > { %v11271_v12 = vadd.f32 %v4441_v49, %v11125_v14  ;;  %9698 = vmatpush3.bf16.msra.mxu0 %v7007_v18  ;;  %9699 = vmatprep.mubr.msk.bf16.mxu0 %vm9853_vm0, %v9852_v2  ;;  %v7429_v48 = vpop.permute.xlu0 %7428 }
 0x291   : > { %v9396_v23 = vpop.f32.mrf.mxu1  ;;  %v9401_v46 = vpop.f32.mrf.mxu0  ;;  %9709 = vmatprep.subr.bf16.mxu0 %v9852_v2  ;;  %v7431_v49 = vsel %vm241_vm1, %v7429_v48, 0 }
 0x292   : > { %v7482_v23 = vpop.permute.xlu1 %7481 }
 0x293   : > { %v4444_v59 = vpop.f32.mrf.mxu0  ;;  %v4494_v41 = vpop.f32.mrf.mxu1  ;;  %9694 = vmatmul.mubr.msk.bf16.vlgmr.msra.gmra.mxu1 %vm237_vm2, %v11239_v24 }
 0x294   : > { %v11280_v1 = vadd.f32 %v4494_v41, %v11134_v25  ;;  %9704 = vmatpush3.bf16.msra.mxu1 %v7060_v60  ;;  %9705 = vmatprep.mubr.msk.bf16.mxu1 %vm9853_vm0, %v9852_v2  ;;  %v7484_v41 = vsel %vm241_vm1, %v7482_v23, 0  ;;  %v7809_v23 = vld [vmem:[%s11377_s8] sm:$0xff] }
 0x295   : > { %v9402_v14 = vpop.f32.mrf.mxu0  ;;  %v9407_v56 = vpop.f32.mrf.mxu1  ;;  %9715 = vmatprep.subr.bf16.mxu1 %v9852_v2 }
 0x296   : > { %v7535_v14 = vpop.permute.xlu0 %7534 }
 0x297   : > { %v4497_v6 = vpop.f32.mrf.mxu1  ;;  %v4547_v62 = vpop.f32.mrf.mxu0  ;;  %9700 = vmatmul.mubr.msk.bf16.vlgmr.msra.gmra.mxu0 %vm237_vm2, %v11239_v24 }
 0x298   : > { %v11289_v47 = vadd.f32 %v4547_v62, %v11143_v36  ;;  %9710 = vmatpush3.bf16.msra.mxu0 %v7113_v26  ;;  %9711 = vmatprep.mubr.msk.bf16.mxu0 %vm9853_vm0, %v9852_v2  ;;  %v7537_v62 = vsel %vm241_vm1, %v7535_v14, 0  ;;  %v7819_v14 = vld [vmem:[%s11628_s2 + $0x10] sm:$0xff] }
 0x299   : > { %v9408_v25 = vpop.f32.mrf.mxu1  ;;  %v9413_v0 = vpop.f32.mrf.mxu0  ;;  %9721 = vmatprep.subr.bf16.mxu0 %v9852_v2 }
 0x29a   : > { %v7588_v25 = vpop.permute.xlu1 %7587 }
 0x29b   : > { %v4550_v51 = vpop.f32.mrf.mxu0  ;;  %v4600_v31 = vpop.f32.mrf.mxu1  ;;  %9706 = vmatmul.mubr.msk.bf16.vlgmr.msra.gmra.mxu1 %vm237_vm2, %v11239_v24 }
 0x29c   : > { %v11298_v43 = vadd.f32 %v4600_v31, %v11152_v21  ;;  %9716 = vmatpush3.bf16.msra.mxu1 %v7166_v33  ;;  %9717 = vmatprep.mubr.msk.bf16.mxu1 %vm9853_vm0, %v9852_v2  ;;  %v7590_v31 = vsel %vm241_vm1, %v7588_v25, 0 }
 0x29d   : > { %v9414_v36 = vpop.f32.mrf.mxu0  ;;  %v9419_v52 = vpop.f32.mrf.mxu1  ;;  %9727 = vmatprep.subr.bf16.mxu1 %v9852_v2 }
 0x29f   : > { %v4603_v27 = vpop.f32.mrf.mxu1  ;;  %v4653_v57 = vpop.f32.mrf.mxu0  ;;  %9712 = vmatmul.mubr.msk.bf16.vlgmr.msra.gmra.mxu0 %vm237_vm2, %v11239_v24 }
 0x2a0   : > { %v11307_v16 = vadd.f32 %v4653_v57, %v11161_v42  ;;  %9722 = vmatpush3.bf16.msra.mxu0 %v7219_v30  ;;  %9723 = vmatprep.mubr.msk.bf16.mxu0 %vm9853_vm0, %v9852_v2  ;;  %v7816_v27 = vld [vmem:[%s11377_s8 + $0x38] sm:$0xff] }
 0x2a1   : > { %v9420_v21 = vpop.f32.mrf.mxu1  ;;  %v9425_v40 = vpop.f32.mrf.mxu0  ;;  %9733 = vmatprep.subr.bf16.mxu0 %v9852_v2 }
 0x2a3   : > { %v4656_v63 = vpop.f32.mrf.mxu0  ;;  %v4706_v38 = vpop.f32.mrf.mxu1  ;;  %9718 = vmatmul.mubr.msk.bf16.vlgmr.msra.gmra.mxu1 %vm237_vm2, %v11239_v24 }
 0x2a4   : > { %v11316_v20 = vadd.f32 %v4706_v38, %v11170_v34  ;;  %9728 = vmatpush3.bf16.msra.mxu1 %v7272_v58  ;;  %9729 = vmatprep.mubr.msk.bf16.mxu1 %vm9853_vm0, %v9852_v2 }
 0x2a5   : > { %v9426_v42 = vpop.f32.mrf.mxu0  ;;  %v9431_v54 = vpop.f32.mrf.mxu1  ;;  %9739 = vmatprep.subr.bf16.mxu1 %v9852_v2 }
 0x2a6   : > { %v7814_v54 = vld [vmem:[%s11377_s8 + $0x28] sm:$0xff] }
 0x2a7   : > { %v4709_v13 = vpop.f32.mrf.mxu1  ;;  %v4759_v9 = vpop.f32.mrf.mxu0  ;;  %9724 = vmatmul.mubr.msk.bf16.vlgmr.msra.gmra.mxu0 %vm237_vm2, %v11239_v24 }
 0x2a8   : > { %v11325_v45 = vadd.f32 %v4759_v9, %v11179_v37  ;;  %9734 = vmatpush3.bf16.msra.mxu0 %v7325_v4  ;;  %9735 = vmatprep.mubr.msk.bf16.mxu0 %vm9853_vm0, %v9852_v2 }
 0x2a9   : > { %v9432_v34 = vpop.f32.mrf.mxu1  ;;  %v9437_v3 = vpop.f32.mrf.mxu0  ;;  %9745 = vmatprep.subr.bf16.mxu0 %v9852_v2 }
 0x2ab   : > { %v4762_v10 = vpop.f32.mrf.mxu0  ;;  %v4812_v18 = vpop.f32.mrf.mxu1  ;;  %9730 = vmatmul.mubr.msk.bf16.vlgmr.msra.gmra.mxu1 %vm237_vm2, %v11239_v24 }
 0x2ac   : > { %v11334_v17 = vadd.f32 %v4812_v18, %v11188_v8  ;;  %9740 = vmatpush3.bf16.msra.mxu1 %v7378_v19  ;;  %9741 = vmatprep.mubr.msk.bf16.mxu1 %vm9853_vm0, %v9852_v2  ;;  %v7811_v19 = vld [vmem:[%s11377_s8 + $0x10] sm:$0xff] }
 0x2ad   : > { %v9438_v37 = vpop.f32.mrf.mxu0  ;;  %v9443_v55 = vpop.f32.mrf.mxu1  ;;  %9751 = vmatprep.subr.bf16.mxu1 %v9852_v2 }
 0x2ae   : > { %v7810_v37 = vld [vmem:[%s11377_s8 + $0x8] sm:$0xff] }
 0x2af   : > { %v4815_v46 = vpop.f32.mrf.mxu1  ;;  %v4865_v60 = vpop.f32.mrf.mxu0  ;;  %9736 = vmatmul.mubr.msk.bf16.vlgmr.msra.gmra.mxu0 %vm237_vm2, %v11239_v24 }
 0x2b0   : > { %v11343_v7 = vadd.f32 %v4865_v60, %v11197_v22  ;;  %9746 = vmatpush3.bf16.msra.mxu0 %v7431_v49  ;;  %9747 = vmatprep.mubr.msk.bf16.mxu0 %vm9853_vm0, %v9852_v2 }
 0x2b1   : > { %v9444_v8 = vpop.f32.mrf.mxu1  ;;  %v9449_v59 = vpop.f32.mrf.mxu0  ;;  %9757 = vmatprep.subr.bf16.mxu0 %v9852_v2 }
 0x2b2   : > { %v7818_v8 = vld [vmem:[%s11628_s2 + $0x8] sm:$0xff] }
 0x2b3   : > { %v4868_v56 = vpop.f32.mrf.mxu0  ;;  %v4918_v26 = vpop.f32.mrf.mxu1  ;;  %9742 = vmatmul.mubr.msk.bf16.vlgmr.msra.gmra.mxu1 %vm237_vm2, %v11239_v24 }
 0x2b4   : > { %v11352_v39 = vadd.f32 %v4918_v26, %v11206_v35  ;;  %9752 = vmatpush3.bf16.msra.mxu1 %v7484_v41  ;;  %9753 = vmatprep.mubr.msk.bf16.mxu1 %vm9853_vm0, %v9852_v2 }
 0x2b5   : > { %v9450_v22 = vpop.f32.mrf.mxu0  ;;  %v9455_v6 = vpop.f32.mrf.mxu1  ;;  %9763 = vmatprep.subr.bf16.mxu1 %v9852_v2 }
 0x2b6   : > { %v7820_v22 = vld [vmem:[%s11628_s2 + $0x18] sm:$0xff] }
 0x2b7   : > { %v4921_v0 = vpop.f32.mrf.mxu1  ;;  %v4971_v33 = vpop.f32.mrf.mxu0  ;;  %9748 = vmatmul.mubr.msk.bf16.vlgmr.msra.gmra.mxu0 %vm237_vm2, %v11239_v24 }
 0x2b8   : > { %v11361_v35 = vadd.f32 %v4971_v33, %v11215_v44  ;;  %9758 = vmatpush3.bf16.msra.mxu0 %v7537_v62  ;;  %9759 = vmatprep.mubr.msk.bf16.mxu0 %vm9853_vm0, %v9852_v2 }
 0x2b9   : > { %v9456_v28 = vpop.f32.mrf.mxu1  ;;  %v9461_v51 = vpop.f32.mrf.mxu0 }
 0x2bb   : > { %v4974_v36 = vpop.f32.mrf.mxu0  ;;  %v5024_v52 = vpop.f32.mrf.mxu1  ;;  %9754 = vmatmul.mubr.msk.bf16.vlgmr.msra.gmra.mxu1 %vm237_vm2, %v11239_v24 }
 0x2bc   : > { %v11369_v30 = vadd.f32 %v5024_v52, %v11224_v53  ;;  %9764 = vmatpush3.bf16.msra.mxu1 %v7590_v31  ;;  %9765 = vmatprep.mubr.msk.bf16.mxu1 %vm9853_vm0, %v9852_v2 }
 0x2bd   : > { %v9462_v44 = vpop.f32.mrf.mxu0  ;;  %v9467_v15 = vpop.f32.mrf.mxu1  ;;  %9774 = vmatprep.subr.mxu1 %v7816_v27 }
 0x2bf   : > { %v5027_v57 = vpop.f32.mrf.mxu1  ;;  %v5077_v21 = vpop.f32.mrf.mxu0  ;;  %9760 = vmatmul.mubr.msk.bf16.vlgmr.msra.gmra.mxu0 %vm237_vm2, %v11239_v24 }
 0x2c0   : > { %v11383_v53 = vadd.f32 %v5077_v21, %v11233_v32  ;;  %v7813_v32 = vld [vmem:[%s11377_s8 + $0x20] sm:$0xff] }
 0x2c1   : > { %v9468_v40 = vpop.f32.mrf.mxu1  ;;  %v9473_v58 = vpop.f32.mrf.mxu0 }
 0x2c3   : > { %v5080_v63 = vpop.f32.mrf.mxu0  ;;  %v5130_v38 = vpop.f32.mrf.mxu1  ;;  %9766 = vmatmul.mubr.msk.bf16.vlgmr.msra.gmra.mxu1 %vm237_vm2, %v11239_v24  ;;  %v7812_v24 = vld [vmem:[%s11377_s8 + $0x18] sm:$0xff] }
 0x2c4   : > { %v11389_v42 = vadd.f32 %v5130_v38, %v11244_v29  ;;  %9775 = vmatpush3.msra.mxu1 %v7816_v27 }
 0x2c5   : > { %v9474_v4 = vpop.f32.mrf.mxu0  ;;  %v9479_v61 = vpop.f32.mrf.mxu1  ;;  %9776 = vmatprep.subr.mxu1 %v7815_v5 }
 0x2c6   : > { %9777 = vmatpush3.msra.mxu1 %v7815_v5 }
 0x2c7   : > { %v5133_v13 = vpop.f32.mrf.mxu1  ;;  %v5211_v9 = vpop.f32.mrf.mxu0  ;;  %9778 = vmatprep.subr.mxu1 %v7814_v54 }
 0x2c8   : > { %v11394_v34 = vadd.f32 %v5211_v9, %v11253_v50  ;;  %9779 = vmatpush3.msra.mxu1 %v7814_v54  ;;  %v7817_v50 = vld [vmem:[%s11628_s2] sm:$0xff] }
 0x2c9   : > { %v9480_v3 = vpop.f32.mrf.mxu1  ;;  %v9485_v29 = vpop.f32.mrf.mxu0  ;;  %9780 = vmatprep.subr.mxu1 %v7813_v32  ;;  %9790 = vmatprep.mubr.msk.f32.mxu1 %vm7825_vm3, %v7817_v50 }
 0x2ca   : > { %9781 = vmatpush3.msra.mxu1 %v7813_v32 }
 0x2cb   : > { %v5214_v48 = vpop.f32.mrf.mxu0  ;;  %v5254_v10 = vpop.f32.mrf.mxu1  ;;  %9782 = vmatprep.subr.mxu1 %v7812_v24 }
 0x2cc   : > { %v11399_v18 = vadd.f32 %v5254_v10, %v11262_v11  ;;  %9783 = vmatpush3.msra.mxu1 %v7812_v24 }
 0x2cd   : > { %v9486_v55 = vpop.f32.mrf.mxu0  ;;  %v9491_v49 = vpop.f32.mrf.mxu1  ;;  %9784 = vmatprep.subr.mxu1 %v7811_v19 }
 0x2ce   : > { %9785 = vmatpush3.msra.mxu1 %v7811_v19 }
 0x2cf   : > { %v5257_v46 = vpop.f32.mrf.mxu1  ;;  %v5297_v60 = vpop.f32.mrf.mxu0  ;;  %9786 = vmatprep.subr.mxu1 %v7810_v37 }
 0x2d0   : > { %v11408_v11 = vadd.f32 %v5297_v60, %v11271_v12  ;;  %9787 = vmatpush3.msra.mxu1 %v7810_v37 }
 0x2d1   : > { %v9492_v59 = vpop.f32.mrf.mxu1  ;;  %v9497_v41 = vpop.f32.mrf.mxu0  ;;  %9788 = vmatprep.subr.mxu1 %v7809_v23 }
 0x2d2   : > { %9789 = vmatpush3.msra.mxu1 %v7809_v23 }
 0x2d3   : > { %v5300_v56 = vpop.f32.mrf.mxu0  ;;  %v5340_v26 = vpop.f32.mrf.mxu1  ;;  %9791 = vmatmul.mubr.msk.f32.vlgmr.msra.gmra.mxu1 %vm7825_vm3, %v7818_v8 }
 0x2d4   : > { %v11418_v12 = vadd.f32 %v5340_v26, %v11280_v1  ;;  %9793 = vmatprep.mubr.msk.f32.mxu1 %vm7825_vm3, %v7819_v14 }
 0x2d5   : > { %v9498_v6 = vpop.f32.mrf.mxu0  ;;  %v9503_v62 = vpop.f32.mrf.mxu1 }
 0x2d7   : > { %v5343_v25 = vpop.f32.mrf.mxu1  ;;  %v5383_v0 = vpop.f32.mrf.mxu0  ;;  %9794 = vmatmul.mubr.msk.f32.gmra.mxu1 %vm7825_vm3, %v7820_v22 }
 0x2d8   : > { %v11426_v33 = vadd.f32 %v5383_v0, %v11289_v47 }
 0x2d9   : > { %v9504_v28 = vpop.f32.mrf.mxu1  ;;  %v9509_v51 = vpop.f32.mrf.mxu0 }
 0x2db   : > { %v5386_v31 = vpop.f32.mrf.mxu0  ;;  %v5426_v1 = vpop.f32.mrf.mxu1 }
 0x2dc   : > { %v11429_v36 = vadd.f32 %v5426_v1, %v11298_v43 }
 0x2dd   : > { %v9510_v52 = vpop.f32.mrf.mxu0  ;;  %v9515_v44 = vpop.f32.mrf.mxu1 }
 0x2df   : > { %v5429_v15 = vpop.f32.mrf.mxu1  ;;  %v5469_v27 = vpop.f32.mrf.mxu0 }
 0x2e0   : > { %v11432_v57 = vadd.f32 %v5469_v27, %v11307_v16 }
 0x2e1   : > { %v9516_v21 = vpop.f32.mrf.mxu1  ;;  %v9521_v40 = vpop.f32.mrf.mxu0 }
 0x2e3   : > { %v5472_v58 = vpop.f32.mrf.mxu0  ;;  %v5512_v5 = vpop.f32.mrf.mxu1 }
 0x2e4   : > { %v11435_v47 = vadd.f32 %v5512_v5, %v11316_v20 }
 0x2e5   : > { %v9522_v63 = vpop.f32.mrf.mxu0  ;;  %v9527_v38 = vpop.f32.mrf.mxu1 }
 0x2e7   : > { %v5515_v54 = vpop.f32.mrf.mxu1  ;;  %v5555_v4 = vpop.f32.mrf.mxu0 }
 0x2e8   : > { %v11438_v43 = vadd.f32 %v5555_v4, %v11325_v45 }
 0x2e9   : > { %v9528_v61 = vpop.f32.mrf.mxu1  ;;  %v9533_v32 = vpop.f32.mrf.mxu0 }
 0x2eb   : > { %v5558_v13 = vpop.f32.mrf.mxu0  ;;  %v5598_v9 = vpop.f32.mrf.mxu1 }
 0x2ec   : > { %v11441_v16 = vadd.f32 %v5598_v9, %v11334_v17 }
 0x2ed   : > { %v9534_v24 = vpop.f32.mrf.mxu0  ;;  %v9539_v3 = vpop.f32.mrf.mxu1 }
 0x2ef   : > { %v5601_v29 = vpop.f32.mrf.mxu1  ;;  %v5641_v19 = vpop.f32.mrf.mxu0 }
 0x2f0   : > { %v11444_v20 = vadd.f32 %v5641_v19, %v11343_v7 }
 0x2f1   : > { %v9540_v48 = vpop.f32.mrf.mxu1  ;;  %v9545_v10 = vpop.f32.mrf.mxu0 }
 0x2f3   : > { %v5644_v37 = vpop.f32.mrf.mxu0  ;;  %v5684_v55 = vpop.f32.mrf.mxu1 }
 0x2f4   : > { %v11447_v45 = vadd.f32 %v5684_v55, %v11352_v39 }
 0x2f5   : > { %v9546_v49 = vpop.f32.mrf.mxu0  ;;  %v9551_v50 = vpop.f32.mrf.mxu1 }
 0x2f7   : > { %v5687_v23 = vpop.f32.mrf.mxu1  ;;  %v5727_v46 = vpop.f32.mrf.mxu0 }
 0x2f8   : > { %v11450_v17 = vadd.f32 %v5727_v46, %v11361_v35 }
 0x2f9   : > { %v9552_v60 = vpop.f32.mrf.mxu1  ;;  %v9557_v8 = vpop.f32.mrf.mxu0 }
 0x2fb   : > { %v5730_v59 = vpop.f32.mrf.mxu0  ;;  %v5770_v41 = vpop.f32.mrf.mxu1 }
 0x2fc   : > { %v11453_v7 = vadd.f32 %v5770_v41, %v11369_v30 }
 0x2fd   : > { %v9558_v14 = vpop.f32.mrf.mxu0  ;;  %v9563_v56 = vpop.f32.mrf.mxu1 }
 0x2ff   : > { %v5773_v26 = vpop.f32.mrf.mxu1  ;;  %v5813_v22 = vpop.f32.mrf.mxu0 }
 0x300   : > { %v11456_v39 = vadd.f32 %v5813_v22, %v11383_v53 }
 0x301   : > { %v9564_v6 = vpop.f32.mrf.mxu1  ;;  %v9569_v62 = vpop.f32.mrf.mxu0 }
 0x303   : > { %v5816_v25 = vpop.f32.mrf.mxu0  ;;  %v5856_v0 = vpop.f32.mrf.mxu1 }
 0x304   : > { %v11459_v35 = vadd.f32 %v5856_v0, %v11389_v42 }
 0x305   : > { %v9570_v28 = vpop.f32.mrf.mxu0  ;;  %v9575_v51 = vpop.f32.mrf.mxu1 }
 0x307   : > { %v5859_v31 = vpop.f32.mrf.mxu1  ;;  %v5946_v1 = vpop.f32.mrf.mxu0 }
 0x308   : > { %v11462_v30 = vadd.f32 %v5946_v1, %v11394_v34 }
 0x309   : > { %v9576_v52 = vpop.f32.mrf.mxu1  ;;  %v9581_v44 = vpop.f32.mrf.mxu0 }
 0x30b   : > { %v5949_v15 = vpop.f32.mrf.mxu0  ;;  %v5999_v27 = vpop.f32.mrf.mxu1 }
 0x30c   : > { %v11465_v53 = vadd.f32 %v5999_v27, %v11399_v18 }
 0x30d   : > { %v9582_v21 = vpop.f32.mrf.mxu0  ;;  %v9587_v40 = vpop.f32.mrf.mxu1 }
 0x30f   : > { %v6002_v58 = vpop.f32.mrf.mxu1  ;;  %v6052_v5 = vpop.f32.mrf.mxu0 }
 0x310   : > { %v11468_v42 = vadd.f32 %v6052_v5, %v11408_v11 }
 0x311   : > { %v9588_v63 = vpop.f32.mrf.mxu1  ;;  %v9593_v38 = vpop.f32.mrf.mxu0 }
 0x313   : > { %v6055_v54 = vpop.f32.mrf.mxu0  ;;  %v6105_v4 = vpop.f32.mrf.mxu1 }
 0x314   : > { %v11471_v34 = vadd.f32 %v6105_v4, %v11418_v12 }
 0x315   : > { %v9594_v61 = vpop.f32.mrf.mxu0  ;;  %v9599_v32 = vpop.f32.mrf.mxu1 }
 0x317   : > { %v6108_v13 = vpop.f32.mrf.mxu1  ;;  %v6158_v9 = vpop.f32.mrf.mxu0 }
 0x318   : > { %v11474_v18 = vadd.f32 %v6158_v9, %v11426_v33 }
 0x319   : > { %v9600_v24 = vpop.f32.mrf.mxu1  ;;  %v9605_v3 = vpop.f32.mrf.mxu0 }
 0x31a   : > { %v11508_v3 = vpop.permute.xlu0 %7651 }
 0x31b   : > { %v6161_v29 = vpop.f32.mrf.mxu0  ;;  %v6211_v19 = vpop.f32.mrf.mxu1 }
 0x31c   : > { %v11477_v11 = vadd.f32 %v6211_v19, %v11429_v36 }
 0x31d   : > { %v9606_v48 = vpop.f32.mrf.mxu0  ;;  %v9611_v10 = vpop.f32.mrf.mxu1 }
 0x31f   : > { %v6214_v37 = vpop.f32.mrf.mxu1  ;;  %v6264_v55 = vpop.f32.mrf.mxu0 }
 0x320   : > { %v11480_v12 = vadd.f32 %v6264_v55, %v11432_v57 }
 0x321   : > { %v9612_v49 = vpop.f32.mrf.mxu1  ;;  %v9617_v50 = vpop.f32.mrf.mxu0 }
 0x323   : > { %v6267_v23 = vpop.f32.mrf.mxu0  ;;  %v6317_v46 = vpop.f32.mrf.mxu1 }
 0x324   : > { %v11483_v33 = vadd.f32 %v6317_v46, %v11435_v47 }
 0x325   : > { %v9618_v60 = vpop.f32.mrf.mxu0  ;;  %v9623_v8 = vpop.f32.mrf.mxu1 }
 0x327   : > { %v6320_v59 = vpop.f32.mrf.mxu1  ;;  %v6370_v41 = vpop.f32.mrf.mxu0 }
 0x328   : > { %v11486_v36 = vadd.f32 %v6370_v41, %v11438_v43 }
 0x329   : > { %v9624_v14 = vpop.f32.mrf.mxu1  ;;  %v9629_v56 = vpop.f32.mrf.mxu0 }
 0x32b   : > { %v6373_v26 = vpop.f32.mrf.mxu0  ;;  %v6423_v22 = vpop.f32.mrf.mxu1 }
 0x32c   : > { %v11489_v57 = vadd.f32 %v6423_v22, %v11441_v16 }
 0x32d   : > { %v9630_v6 = vpop.f32.mrf.mxu0  ;;  %v9635_v62 = vpop.f32.mrf.mxu1 }
 0x32f   : > { %v6426_v25 = vpop.f32.mrf.mxu1  ;;  %v6476_v0 = vpop.f32.mrf.mxu0 }
 0x330   : > { %v11492_v47 = vadd.f32 %v6476_v0, %v11444_v20 }
 0x331   : > { %v9636_v28 = vpop.f32.mrf.mxu1  ;;  %v9641_v51 = vpop.f32.mrf.mxu0 }
 0x333   : > { %v6479_v31 = vpop.f32.mrf.mxu0  ;;  %v6529_v1 = vpop.f32.mrf.mxu1 }
 0x334   : > { %v11495_v43 = vadd.f32 %v6529_v1, %v11447_v45 }
 0x335   : > { %v9642_v52 = vpop.f32.mrf.mxu0  ;;  %v9647_v44 = vpop.f32.mrf.mxu1 }
 0x337   : > { %v6532_v15 = vpop.f32.mrf.mxu1  ;;  %v6582_v27 = vpop.f32.mrf.mxu0 }
 0x338   : > { %v11498_v16 = vadd.f32 %v6582_v27, %v11450_v17 }
 0x339   : > { %v9648_v21 = vpop.f32.mrf.mxu1  ;;  %v9653_v40 = vpop.f32.mrf.mxu0 }
 0x33b   : > { %v6585_v58 = vpop.f32.mrf.mxu0  ;;  %v6635_v5 = vpop.f32.mrf.mxu1 }
 0x33c   : > { %v11501_v20 = vadd.f32 %v6635_v5, %v11453_v7 }
 0x33d   : > { %v9654_v63 = vpop.f32.mrf.mxu0  ;;  %v9659_v38 = vpop.f32.mrf.mxu1 }
 0x33f   : > { %v6638_v54 = vpop.f32.mrf.mxu1  ;;  %v6688_v4 = vpop.f32.mrf.mxu0 }
 0x340   : > { %v11504_v45 = vadd.f32 %v6688_v4, %v11456_v39 }
 0x341   : > { %v9660_v61 = vpop.f32.mrf.mxu1  ;;  %v9665_v32 = vpop.f32.mrf.mxu0 }
 0x343   : > { %v6691_v13 = vpop.f32.mrf.mxu0  ;;  %v11506_v9 = vpop.f32.mrf.mxu1 }
 0x345   : > { %v9666_v17 = vpop.f32.mrf.mxu0  ;;  %v9671_v24 = vpop.f32.mrf.mxu1 }
 0x347   : > { %v6744_v29 = vpop.f32.mrf.mxu1  ;;  %v6831_v19 = vpop.f32.mrf.mxu0 }
 0x348   : > { %v7632_v7 = vadd.f32 %v6831_v19, %v11462_v30 }
 0x349   : > { %v9672_v48 = vpop.f32.mrf.mxu1  ;;  %v9677_v10 = vpop.f32.mrf.mxu0 }
 0x34a   : > { %v7654_v37 = vadd.f32 %v11508_v3, %v7632_v7 }
 0x34b   : > { %v6834_v55 = vpop.f32.mrf.mxu0  ;;  %v6884_v39 = vpop.f32.mrf.mxu1 }
 0x34c   : > { %v7633_v49 = vadd.f32 %v6884_v39, %v11465_v53  ;;  %v7670_v60 = vmax.f32 %v7654_v37, 0.0 }
 0x34d   : > { %v9678_v50 = vpop.f32.mrf.mxu0  ;;  %v9683_v23 = vpop.f32.mrf.mxu1 }
 0x34e   : > { %v7655_v46 = vadd.f32 %v11508_v3, %v7633_v49  ;;  %v7687_v26 = vsel %vm7686_vm4, %v7670_v60, 0.0 }
 0x34f   : > { %v6887_v8 = vpop.f32.mrf.mxu1  ;;  %v6937_v59 = vpop.f32.mrf.mxu0 }
 0x350   : > { %v7671_v41 = vmax.f32 %v7655_v46, 0.0  ;;  %v7634_v14 = vadd.f32 %v6937_v59, %v11468_v42 }
 0x351   : > { %v9684_v30 = vpop.f32.mrf.mxu1  ;;  %v9689_v56 = vpop.f32.mrf.mxu0 }
 0x352   : > { %v7688_v22 = vsel %vm7686_vm4, %v7671_v41, 0.0  ;;  %v7656_v6 = vadd.f32 %v11508_v3, %v7634_v14 }
 0x353   : > { %v7689_v53 = vadd.f32 %v7688_v22, %v7687_v26  ;;  %v6940_v62 = vpop.f32.mrf.mxu0  ;;  %v6990_v25 = vpop.f32.mrf.mxu1 }
 0x354   : > { %v7672_v0 = vmax.f32 %v7656_v6, 0.0  ;;  %v7635_v28 = vadd.f32 %v6990_v25, %v11471_v34 }
 0x355   : > { %v9690_v51 = vpop.f32.mrf.mxu0  ;;  %v9695_v31 = vpop.f32.mrf.mxu1 }
 0x356   : > { %v7690_v1 = vsel %vm7686_vm4, %v7672_v0, 0.0  ;;  %v7657_v42 = vadd.f32 %v11508_v3, %v7635_v28 }
 0x357   : > { %v7691_v52 = vadd.f32 %v7690_v1, %v7689_v53  ;;  %v6993_v44 = vpop.f32.mrf.mxu1  ;;  %v7043_v15 = vpop.f32.mrf.mxu0 }
 0x358   : > { %v7673_v27 = vmax.f32 %v7657_v42, 0.0  ;;  %v7636_v21 = vadd.f32 %v7043_v15, %v11474_v18 }
 0x359   : > { %v9696_v40 = vpop.f32.mrf.mxu1  ;;  %v9701_v58 = vpop.f32.mrf.mxu0 }
 0x35a   : > { %v7692_v5 = vsel %vm7686_vm4, %v7673_v27, 0.0  ;;  %v7658_v63 = vadd.f32 %v11508_v3, %v7636_v21 }
 0x35b   : > { %v7693_v38 = vadd.f32 %v7692_v5, %v7691_v52  ;;  %v7046_v34 = vpop.f32.mrf.mxu0  ;;  %v7096_v54 = vpop.f32.mrf.mxu1 }
 0x35c   : > { %v7674_v4 = vmax.f32 %v7658_v63, 0.0  ;;  %v7637_v61 = vadd.f32 %v7096_v54, %v11477_v11 }
 0x35d   : > { %v9702_v32 = vpop.f32.mrf.mxu0  ;;  %v9707_v13 = vpop.f32.mrf.mxu1 }
 0x35e   : > { %v7694_v17 = vsel %vm7686_vm4, %v7674_v4, 0.0  ;;  %v7659_v24 = vadd.f32 %v11508_v3, %v7637_v61 }
 0x35f   : > { %v7695_v29 = vadd.f32 %v7694_v17, %v7693_v38  ;;  %v7099_v18 = vpop.f32.mrf.mxu1  ;;  %v7149_v19 = vpop.f32.mrf.mxu0 }
 0x360   : > { %v7675_v7 = vmax.f32 %v7659_v24, 0.0  ;;  %v7638_v48 = vadd.f32 %v7149_v19, %v11480_v12 }
 0x361   : > { %v9708_v10 = vpop.f32.mrf.mxu1  ;;  %v9713_v37 = vpop.f32.mrf.mxu0 }
 0x362   : > { %v7696_v55 = vsel %vm7686_vm4, %v7675_v7, 0.0  ;;  %v7660_v39 = vadd.f32 %v11508_v3, %v7638_v48 }
 0x363   : > { %v7697_v49 = vadd.f32 %v7696_v55, %v7695_v29  ;;  %v7152_v11 = vpop.f32.mrf.mxu0  ;;  %v7202_v50 = vpop.f32.mrf.mxu1 }
 0x364   : > { %v7676_v23 = vmax.f32 %v7660_v39, 0.0  ;;  %v7639_v46 = vadd.f32 %v7202_v50, %v11483_v33 }
 0x365   : > { %v9714_v60 = vpop.f32.mrf.mxu0  ;;  %v9719_v8 = vpop.f32.mrf.mxu1 }
 0x366   : > { %v7698_v59 = vsel %vm7686_vm4, %v7676_v23, 0.0  ;;  %v7661_v41 = vadd.f32 %v11508_v3, %v7639_v46 }
 0x367   : > { %v7699_v14 = vadd.f32 %v7698_v59, %v7697_v49  ;;  %v7205_v12 = vpop.f32.mrf.mxu1  ;;  %v7255_v30 = vpop.f32.mrf.mxu0 }
 0x368   : > { %v7677_v56 = vmax.f32 %v7661_v41, 0.0  ;;  %v7640_v26 = vadd.f32 %v7255_v30, %v11486_v36 }
 0x369   : > { %v9720_v22 = vpop.f32.mrf.mxu1  ;;  %v9725_v6 = vpop.f32.mrf.mxu0 }
 0x36a   : > { %v7700_v53 = vsel %vm7686_vm4, %v7677_v56, 0.0  ;;  %v7662_v62 = vadd.f32 %v11508_v3, %v7640_v26  ;;  %v6762_v56 = vadd.f32 %v11506_v9, %v11459_v35 }
 0x36b   : > { %v7701_v25 = vadd.f32 %v7700_v53, %v7699_v14  ;;  %v7258_v33 = vpop.f32.mrf.mxu0  ;;  %v7308_v0 = vpop.f32.mrf.mxu1 }
 0x36c   : > { %v7678_v28 = vmax.f32 %v7662_v62, 0.0  ;;  %v7641_v51 = vadd.f32 %v7308_v0, %v11489_v57 }
 0x36d   : > { %v9726_v31 = vpop.f32.mrf.mxu0  ;;  %v9731_v1 = vpop.f32.mrf.mxu1 }
 0x36e   : > { %v7702_v42 = vsel %vm7686_vm4, %v7678_v28, 0.0  ;;  %v7663_v52 = vadd.f32 %v11508_v3, %v7641_v51 }
 0x36f   : > { %v7703_v44 = vadd.f32 %v7702_v42, %v7701_v25  ;;  %v7311_v36 = vpop.f32.mrf.mxu1  ;;  %v7361_v15 = vpop.f32.mrf.mxu0 }
 0x370   : > { %v7679_v27 = vmax.f32 %v7663_v52, 0.0  ;;  %v7642_v21 = vadd.f32 %v7361_v15, %v11492_v47 }
 0x371   : > { %v9732_v40 = vpop.f32.mrf.mxu1  ;;  %v9737_v58 = vpop.f32.mrf.mxu0 }
 0x372   : > { %v7704_v5 = vsel %vm7686_vm4, %v7679_v27, 0.0  ;;  %v7664_v63 = vadd.f32 %v11508_v3, %v7642_v21  ;;  %v7823_v58 = vld [vmem:[%s11628_s2 + $0x68] sm:$0xff] }
 0x373   : > { %v7705_v38 = vadd.f32 %v7704_v5, %v7703_v44  ;;  %v7364_v57 = vpop.f32.mrf.mxu0  ;;  %v7414_v34 = vpop.f32.mrf.mxu1  ;;  %v7721_v44 = vld [vmem:[%s11628_s2 + $0x30] sm:$0xff]  ;;  %v7822_v5 = vld [vmem:[%s11628_s2 + $0x60] sm:$0xff] }
 0x374   : > { %v7680_v54 = vmax.f32 %v7664_v63, 0.0  ;;  %v7643_v4 = vadd.f32 %v7414_v34, %v11495_v43  ;;  %9771 = vmatprep.mubr.msk.f32.mxu0 %vm7725_vm5, %v7721_v44  ;;  %v7821_v57 = vld [vmem:[%s11628_s2 + $0x58] sm:$0xff] }
 0x375   : > { %v9738_v61 = vpop.f32.mrf.mxu0  ;;  %v9743_v32 = vpop.f32.mrf.mxu1 }
 0x376   : > { %v7706_v13 = vsel %vm7686_vm4, %v7680_v54, 0.0  ;;  %v7665_v17 = vadd.f32 %v11508_v3, %v7643_v4  ;;  %v7722_v54 = vld [vmem:[%s11628_s2 + $0x38] sm:$0xff]  ;;  %v7927_v61 = vld [vmem:[%s11628_s2 + $0x20] sm:$0xff] }
 0x377   : > { %v7707_v24 = vadd.f32 %v7706_v13, %v7705_v38  ;;  %v7417_v47 = vpop.f32.mrf.mxu1  ;;  %v7467_v29 = vpop.f32.mrf.mxu0 }
 0x378   : > { %v7681_v18 = vmax.f32 %v7665_v17, 0.0  ;;  %v7644_v19 = vadd.f32 %v7467_v29, %v11498_v16  ;;  %v7928_v47 = vld [vmem:[%s11628_s2 + $0x28] sm:$0xff]  ;;  %v7724_v29 = vld [vmem:[%s11628_s2 + $0x98] sm:$0xff] }
 0x379   : > { %v9744_v7 = vpop.f32.mrf.mxu1  ;;  %v9749_v48 = vpop.f32.mrf.mxu0 }
 0x37a   : > { %v7708_v10 = vsel %vm7686_vm4, %v7681_v18, 0.0  ;;  %v7666_v37 = vadd.f32 %v11508_v3, %v7644_v19  ;;  %v7723_v19 = vld [vmem:[%s11628_s2 + $0x90] sm:$0xff] }
 0x37b   : > { %v7709_v55 = vadd.f32 %v7708_v10, %v7707_v24  ;;  %v7470_v43 = vpop.f32.mrf.mxu0  ;;  %v7520_v39 = vpop.f32.mrf.mxu1 }
 0x37c   : > { %v7682_v49 = vmax.f32 %v7666_v37, 0.0  ;;  %v7645_v11 = vadd.f32 %v7520_v39, %v11501_v20  ;;  %v8016_v43 = vld [vmem:[%s11628_s2 + $0x48] sm:$0x3]  ;;  %v7930_v39 = vld [vmem:[%s11628_s2 + $0x80] sm:$0xff] }
 0x37d   : > { %v9750_v50 = vpop.f32.mrf.mxu0  ;;  %v9755_v23 = vpop.f32.mrf.mxu1 }
 0x37e   : > { %v7710_v46 = vsel %vm7686_vm4, %v7682_v49, 0.0  ;;  %v7667_v60 = vadd.f32 %v11508_v3, %v7645_v11  ;;  %v7929_v11 = vld [vmem:[%s11628_s2 + $0x78] sm:$0xff] }
 0x37f   : > { %v7711_v8 = vadd.f32 %v7710_v46, %v7709_v55  ;;  %v7523_v16 = vpop.f32.mrf.mxu1  ;;  %v7573_v59 = vpop.f32.mrf.mxu0 }
 0x380   : > { %v7683_v41 = vmax.f32 %v7667_v60, 0.0  ;;  %v7646_v14 = vadd.f32 %v7573_v59, %v11504_v45  ;;  %v8015_v16 = vld [vmem:[%s11628_s2 + $0x40] sm:$0x3] }
 0x381   : > { %v9756_v12 = vpop.f32.mrf.mxu1  ;;  %v9761_v30 = vpop.f32.mrf.mxu0 }
 0x382   : > { %v7712_v26 = vsel %vm7686_vm4, %v7683_v41, 0.0  ;;  %v7668_v20 = vadd.f32 %v11508_v3, %v7646_v14  ;;  %v8163_v12 = vld [vmem:[%s11628_s2 + $0xa0] sm:$0x3] }
 0x383   : > { %v7713_v22 = vadd.f32 %v7712_v26, %v7711_v8  ;;  %v7576_v6 = vpop.f32.mrf.mxu0  ;;  %v7626_v53 = vpop.f32.mrf.mxu1 }
 0x384   : > { %v7684_v62 = vmax.f32 %v7668_v20, 0.0  ;;  %v7647_v25 = vadd.f32 %v7626_v53, %v6762_v56 }
 0x385   : > { %v9762_v33 = vpop.f32.mrf.mxu0  ;;  %v9767_v0 = vpop.f32.mrf.mxu1 }
 0x386   : > { %v7714_v28 = vsel %vm7686_vm4, %v7684_v62, 0.0  ;;  %v7669_v45 = vadd.f32 %v11508_v3, %v7647_v25  ;;  %v7824_v3 = vld [vmem:[%s11628_s2 + $0x70] sm:$0xff] }
 0x387   : > { %v7629_v51 = vpop.f32.mrf.mxu1  ;;  %v7715_v31 = vadd.f32 %v7714_v28, %v7713_v22 }
 0x388   : > { %v7685_v1 = vmax.f32 %v7669_v45, 0.0 }
 0x389   : > { %v9768_v42 = vpop.f32.mrf.mxu1 }
 0x38a   : > { %v7716_v35 = vsel %vm7686_vm4, %v7685_v1, 0.0 }
 0x38b   : > { %v7717_v9 = vadd.f32 %v7716_v35, %v7715_v31 }
 0x38d   : > { %v7718_v52 = vsel %vm7686_vm4, %v7717_v9, 0.0 }
 0x38e   : > { %7719 = vadd.xlane.f32.xlu1 %v7718_v52 }
 0x393   : > { %v9792_v36 = vpop.f32.mrf.mxu1 }
 0x394   : > { %v7910_v4 = vadd.f32 %v9792_v36, %v7822_v5 }
 0x395   : > { %v7904_v15 = vpop.f32.mrf.mxu1 }
 0x396   : > { %v7905_v32 = vadd.f32 %v7904_v15, %v7821_v57  ;;  %v7924_v17 = vmax.f32 %v7910_v4, 0.0 }
 0x397   : > { %v9795_v27 = vpop.f32.mrf.mxu1 }
 0x398   : > { %v7920_v21 = vadd.f32 %v9795_v27, %v7824_v3  ;;  %v7923_v24 = vmax.f32 %v7905_v32, 0.0 }
 0x399   : > { %v7914_v40 = vpop.f32.mrf.mxu1 }
 0x39a   : > { %v7926_v63 = vmax.f32 %v7920_v21, 0.0  ;;  %v7915_v38 = vadd.f32 %v7914_v40, %v7823_v58 }
 0x39c   : > { %v7925_v13 = vmax.f32 %v7915_v38, 0.0 }
 0x417   : > { %v7720_v34 = vpop.xlane.xlu1 %7719 }
 0x418   : > { %9769 = vmatprep.subr.mxu0 %v7720_v34 }
 0x419   : > { %9770 = vmatpush3.msra.mxu0 %v7720_v34 }
 0x41a   : > { %9796 = vmatprep.subr.mxu0 %v7926_v63  ;;  %9772 = vmatmul.mubr.msk.f32.vlgmr.msra.gmra.mxu0 %vm7725_vm5, %v7722_v54 }
 0x41b   : > { %9797 = vmatpush3.msra.mxu0 %v7926_v63  ;;  %9804 = vmatprep.mubr.msk.f32.mxu0 %vm7931_vm6, %v7927_v61 }
 0x41c   : > { %9798 = vmatprep.subr.mxu0 %v7925_v13 }
 0x41d   : > { %9799 = vmatpush3.msra.mxu0 %v7925_v13 }
 0x41e   : > { %9800 = vmatprep.subr.mxu0 %v7924_v17 }
 0x41f   : > { %9801 = vmatpush3.msra.mxu0 %v7924_v17 }
 0x420   : > { %9802 = vmatprep.subr.mxu0 %v7923_v24 }
 0x421   : > { %9803 = vmatpush3.msra.mxu0 %v7923_v24 }
 0x422   : > { %9805 = vmatmul.mubr.msk.f32.vlgmr.msra.gmra.mxu0 %vm7931_vm6, %v7928_v47  ;;  %9807 = vmatprep.subr.mxu0 %v9852_v2 }
 0x423   : > { %9811 = vmatprep.mubr.msk.f32.mxu0 %vm9853_vm0, %v9852_v2 }
 0x4da   : > { %v9773_v18 = vpop.f32.mrf.mxu0 }
 0x4db   : > { %v7804_v7 = vadd.f32 %v9773_v18, %v7724_v29 }
 0x4dc   : > { %v7798_v48 = vpop.f32.mrf.mxu0 }
 0x4dd   : > { %v7808_v10 = vmax.f32 %v7804_v7, 0.0  ;;  %v7799_v37 = vadd.f32 %v7798_v48, %v7723_v19 }
 0x4df   : > { %v7807_v55 = vmax.f32 %v7799_v37, 0.0  ;;  %9808 = vmatpush3.msra.mxu0 %v7808_v10 }
 0x4e0   : > { %9809 = vmatprep.subr.mxu0 %v9852_v2 }
 0x4e1   : > { %9810 = vmatpush3.msra.mxu0 %v7807_v55 }
 0x4e2   : > { %v9806_v49 = vpop.f32.mrf.mxu0  ;;  %9812 = vmatmul.mubr.msk.f32.vlgmr.msra.gmra.mxu0 %vm7686_vm4, %v8016_v43  ;;  %9814 = vmatprep.subr.mxu0 %v9852_v2 }
 0x4e3   : > { %v8010_v50 = vadd.f32 %v9806_v49, %v7930_v39  ;;  %9818 = vmatprep.mubr.msk.f32.mxu0 %vm9853_vm0, %v9852_v2 }
 0x4e4   : > { %v8004_v23 = vpop.f32.mrf.mxu0 }
 0x4e5   : > { %v8014_v46 = vmax.f32 %v8010_v50, 0.0  ;;  %v8005_v60 = vadd.f32 %v8004_v23, %v7929_v11 }
 0x4e7   : > { %v8013_v8 = vmax.f32 %v8005_v60, 0.0  ;;  %9815 = vmatpush3.msra.mxu0 %v8014_v46 }
 0x4e8   : > { %9816 = vmatprep.subr.mxu0 %v9852_v2 }
 0x4e9   : > { %9817 = vmatpush3.msra.mxu0 %v8013_v8 }
 0x4ea   : > { %9819 = vmatmul.mubr.msk.f32.vlgmr.msra.gmra.mxu0 %vm7686_vm4, %v8015_v16 }
 0x5a2   : > { %v8086_v59 = vpop.f32.mrf.mxu0 }
 0x5a4   : > { %v9813_v41 = vpop.f32.mrf.mxu0 }
 0x5aa   : > { %v8159_v14 = vpop.f32.mrf.mxu0 }
 0x5ab   : > { %v8160_v30 = vadd.f32 %v8159_v14, %v8086_v59 }
 0x5ac   : > { %v9820_v56 = vpop.f32.mrf.mxu0 }
 0x5ad   : > { %v8164_v26 = vadd.f32 %v8163_v12, %v8160_v30 }
 0x5af   : > { %8166 = vst.msk [vmem:[%s188_s27] sm:$0x3] %vm8165_vm7, %v8164_v26 }
 0x5b0 PF: > { %s13_s12 = sadd.s32 1, %s9850_s12  }
 0x5b1   : > { %p10_p4 = scmp.ge.s32.totalorder %s13_s12, 4  }
 0x5b3   :  { %12 = sbr.rel (!%p10_p4) target bundleno = 1 (0x1), region = 67 }

</bundles_post_ra>
